<compile_context>
chip_gen: v7x
topology: tpu7x:2x2x1
jax: 0.10.0
libtpu: 0.0.40
codegen_flags: <defaults>
</compile_context>

<pallas_src>
import jax
import jax.numpy as jnp
from jax import lax
from jax.experimental import pallas as pl
from jax.experimental.pallas import tpu as pltpu


def _mvc_inner_product_kernel(v_ref, gene_ref, wq_ref, bq_ref, pred_ref):
    # v_ref:    (TB, D)   f32  precomputed cell_emb @ W.weight (hoisted in wrapper)
    # gene_ref: (TB, TL, D)    gene-embedding tile (bf16 for native-MXU / halved DMA)
    # wq_ref:   (D, D)         gene2query.weight, (out, in) nn.Linear layout
    # bq_ref:   (1, D)    f32  gene2query.bias
    # pred_ref: (TB, TL)
    TB, TL, D = gene_ref.shape

    # q = sigmoid(gene @ Wq^T + bq).  Contract the LAST dims of both operands so
    # the MXU consumes the transposed weight natively (no XLU transpose); f32 acc.
    g2 = gene_ref[...].reshape(TB * TL, D)
    q = lax.dot_general(
        g2, wq_ref[...],
        dimension_numbers=(((1,), (1,)), ((), ())),
        preferred_element_type=jnp.float32,
    )                                                      # (TB*TL, D) f32
    q = q + bq_ref[...].astype(jnp.float32)
    # Single-transcendental sigmoid (one EUP push): sigmoid(x) = 0.5*tanh(0.5*x)+0.5
    q = 0.5 * jnp.tanh(0.5 * q) + 0.5

    # Fused W + bmm:  pred[b,l] = (q[b,l] @ W^T) . cell[b] = q[b,l] . (cell[b] @ W)
    # cell @ W is hoisted to the wrapper; here it is just a resident (TB, D) vector.
    v = v_ref[...].astype(jnp.float32)
    pred = jnp.sum(q.reshape(TB, TL, D) * v[:, None, :], axis=-1)   # XLU lane reduce
    pred_ref[...] = pred.astype(pred_ref.dtype)


def _round_up(x: int, m: int) -> int:
    return ((x + m - 1) // m) * m


def _default_vmem_limit_bytes() -> int:
    """~3/4 of physical VMEM, capped at 100 MiB (v7x: ~48 MiB, v5e/v6e: ~96 MiB)."""
    cap = None
    try:
        cap = getattr(pltpu.get_tpu_info(), "vmem_capacity_bytes", None)
    except Exception:
        cap = None
    if not cap:
        cap = 64 * 1024 * 1024  # conservative (v7x-sized) fallback
    return int(min(cap * 3 // 4, 100 * 1024 * 1024))


def mvc_decoder_inner_product(cell_emb, gene_embs, wq_weight, wq_bias, w_weight,
                              *, tile_l=512, tile_b=None,
                              mxu_dtype=jnp.bfloat16, out_dtype=jnp.float32,
                              vmem_limit_bytes=None):
    """Pallas equivalent of MVCDecoder(arch_style='inner product').forward.

    cell_emb:  (B, D)      gene_embs: (B, L, D)
    wq_weight: (D, D), wq_bias: (D,)   -- gene2query (nn.Linear layout)
    w_weight:  (D, D)                  -- W (bias-free nn.Linear)
    Returns {"pred": (B, L)} in `out_dtype` (default f32, matching PyTorch).
    """
    B, L, D = gene_embs.shape
    assert cell_emb.shape == (B, D)
    assert wq_weight.shape == (D, D) and wq_bias.shape == (D,)
    assert w_weight.shape == (D, D)  # d_in == d_model (use_batch_labels=False)

    if vmem_limit_bytes is None:
        vmem_limit_bytes = _default_vmem_limit_bytes()

    # --- Hoist: v = cell_emb @ W.weight (tiny (B,D)x(D,D), shared by all genes).
    v = lax.dot_general(
        cell_emb.astype(jnp.float32), w_weight.astype(jnp.float32),
        dimension_numbers=(((1,), (0,)), ((), ())),
        preferred_element_type=jnp.float32,
    )                                                      # (B, D) f32

    # --- bf16 MXU operands (native MXU precision; halves the gene-tile DMA).
    gdtype = mxu_dtype if mxu_dtype is not None else gene_embs.dtype
    gene_embs = gene_embs.astype(gdtype)
    wq_weight = wq_weight.astype(gdtype)
    bq2 = wq_bias.reshape(1, D).astype(jnp.float32)

    # --- B tiling (optional; for v7x-sized production shapes).
    if tile_b is None or tile_b >= B:
        tb = B
    else:
        tb = tile_b
        assert B % tb == 0 and tb % 8 == 0, "tile_b must divide B and be a multiple of 8"
    nb = B // tb

    # --- L tiling: lane-dense (multiple of 128), >= 2 tiles whenever possible.
    l128 = _round_up(L, 128)
    tl = min(_round_up(tile_l, 128), l128)
    if l128 // tl < 2 and l128 >= 256:
        tl = _round_up(l128 // 2, 128)        # give the parallel axis >=2 steps (v7x)

    # Budget-driven shrink: 2x gene tile (double-buffered) + f32 q intermediate
    # + resident gene2query weight + output tile.  Never shrink below 256.
    gsz = jnp.dtype(gdtype).itemsize
    osz = jnp.dtype(out_dtype).itemsize

    def _budget(t):
        return (2 * tb * t * D * gsz          # gene tile, double-buffered
                + tb * t * D * 4              # f32 q intermediate
                + 2 * D * D * gsz             # resident gene2query weight
                + 2 * tb * t * osz)           # output tile, double-buffered

    while _budget(tl) > int(vmem_limit_bytes * 0.85) and tl > 256:
        tl = max(256, _round_up(tl // 2, 128))

    nl = pl.cdiv(l128, tl)
    l_pad = nl * tl
    if l_pad != L:
        gene_embs = jnp.pad(gene_embs, ((0, 0), (0, l_pad - L), (0, 0)))

    pred = pl.pallas_call(
        _mvc_inner_product_kernel,
        out_shape=jax.ShapeDtypeStruct((B, l_pad), out_dtype),
        grid_spec=pltpu.PrefetchScalarGridSpec(
            num_scalar_prefetch=0,
            grid=(nb, nl),
            in_specs=[
                pl.BlockSpec((tb, D), lambda i, j: (i, 0)),         # cell @ W (f32)
                pl.BlockSpec((tb, tl, D), lambda i, j: (i, j, 0)),  # gene tile (bf16)
                pl.BlockSpec((D, D), lambda i, j: (0, 0)),          # gene2query.weight
                pl.BlockSpec((1, D), lambda i, j: (0, 0)),          # gene2query.bias
            ],
            out_specs=pl.BlockSpec((tb, tl), lambda i, j: (i, j)),
        ),
        compiler_params=pltpu.CompilerParams(
            dimension_semantics=("parallel", "parallel"),
            vmem_limit_bytes=int(vmem_limit_bytes),
        ),
    )(v, gene_embs, wq_weight, bq2)

    if l_pad != L:
        pred = pred[:, :L]
    return {"pred": pred}


# TODO(synk): arch_style="concat query"/"sum query", explicit_zero_prob=True
# (W_zero_logit) and use_batch_labels=True branches of MVCDecoder are not
# implemented in this kernel (not part of the default config).


def _reference(cell_emb, gene_embs, wq_weight, wq_bias, w_weight):
    # Plain-JAX f32 mirror of MVCDecoder.forward (inner product, no zero probs).
    q = jax.nn.sigmoid(jnp.einsum("bld,od->blo", gene_embs, wq_weight) + wq_bias)
    wq = jnp.einsum("blo,io->bli", q, w_weight)          # self.W(query_vecs)
    return jnp.einsum("bli,bi->bl", wq, cell_emb)        # bmm(., cell[..., None]).squeeze(2)


if __name__ == "__main__":
    B, L, D = 4, 512, 128   # small: 4 cells, 512 genes, d_model = 128

    key = jax.random.PRNGKey(0)
    k1, k2, k3, k4, k5 = jax.random.split(key, 5)
    cell_emb = jax.random.normal(k1, (B, D), dtype=jnp.float32)
    gene_embs = jax.random.normal(k2, (B, L, D), dtype=jnp.float32)
    wq_weight = jax.random.normal(k3, (D, D), dtype=jnp.float32) * (D ** -0.5)
    wq_bias = jax.random.normal(k4, (D,), dtype=jnp.float32) * 0.1
    w_weight = jax.random.normal(k5, (D, D), dtype=jnp.float32) * (D ** -0.5)

    out = mvc_decoder_inner_product(cell_emb, gene_embs, wq_weight, wq_bias, w_weight)
    pred = jax.block_until_ready(out["pred"])

    ref = _reference(cell_emb, gene_embs, wq_weight, wq_bias, w_weight)
    assert pred.shape == (B, L), pred.shape
    # bf16 MXU operands (f32 accumulation) => relaxed tolerance vs. f32 reference.
    max_err = float(jnp.max(jnp.abs(pred.astype(jnp.float32) - ref)))
    assert jnp.allclose(pred.astype(jnp.float32), ref, atol=0.25, rtol=0.05), max_err

    print("KERNEL_OK")
</pallas_src>

<mosaic_0001>
module attributes {stable_mosaic.version = 11 : i64} {
  func.func @_mvc_inner_product_kernel(%arg0: i32, %arg1: i32, %arg2: memref<4x128xf32, #tpu.memory_space<vmem>>, %arg3: memref<4x256x128xbf16, #tpu.memory_space<vmem>>, %arg4: memref<128x128xbf16, #tpu.memory_space<vmem>>, %arg5: memref<1x128xf32, #tpu.memory_space<vmem>>, %arg6: memref<4x256xf32, #tpu.memory_space<vmem>>) attributes {dimension_semantics = [#tpu.dimension_semantics<parallel>, #tpu.dimension_semantics<parallel>], iteration_bounds = array<i64: 1, 2>, scalar_prefetch = 0 : i64, scratch_operands = 0 : i64, tpu.core_type = #tpu.core_type<tc>, window_params = [{transform_indices = @transform_0, window_bounds = array<i64: 4, 128>}, {transform_indices = @transform_1, window_bounds = array<i64: 4, 256, 128>}, {pipeline_mode = #tpu.pipeline_mode<synchronous>, transform_indices = @transform_2, window_bounds = array<i64: 128, 128>}, {pipeline_mode = #tpu.pipeline_mode<synchronous>, transform_indices = @transform_3, window_bounds = array<i64: 1, 128>}, {transform_indices = @transform_4, window_bounds = array<i64: 4, 256>}]} {
    %c0 = arith.constant 0 : index
    %c0_0 = arith.constant 0 : index
    %c0_1 = arith.constant 0 : index
    %0 = vector.load %arg3[%c0, %c0_0, %c0_1] : memref<4x256x128xbf16, #tpu.memory_space<vmem>>, vector<4x256x128xbf16>
    %1 = vector.shape_cast %0 : vector<4x256x128xbf16> to vector<1024x128xbf16>
    %c0_2 = arith.constant 0 : index
    %c0_3 = arith.constant 0 : index
    %2 = vector.load %arg4[%c0_2, %c0_3] : memref<128x128xbf16, #tpu.memory_space<vmem>>, vector<128x128xbf16>
    %cst = arith.constant dense<0.000000e+00> : vector<1024x128xf32>
    %3 = tpu.matmul %1, %2, %cst {dimension_numbers = #tpu.dot_dimension_numbers<[1], [1], [0], [0], [0, 0, 1, 0], [], []>} : vector<1024x128xbf16>, vector<128x128xbf16>, vector<1024x128xf32> -> vector<1024x128xf32>
    %c0_4 = arith.constant 0 : index
    %c0_5 = arith.constant 0 : index
    %4 = vector.load %arg5[%c0_4, %c0_5] : memref<1x128xf32, #tpu.memory_space<vmem>>, vector<1x128xf32>
    %5 = vector.broadcast %4 : vector<1x128xf32> to vector<1024x128xf32>
    %6 = arith.addf %3, %5 : vector<1024x128xf32>
    %cst_6 = arith.constant 5.000000e-01 : f32
    %7 = vector.broadcast %cst_6 : f32 to vector<1024x128xf32>
    %8 = arith.mulf %7, %6 : vector<1024x128xf32>
    %9 = math.tanh %8 : vector<1024x128xf32>
    %cst_7 = arith.constant 5.000000e-01 : f32
    %10 = vector.broadcast %cst_7 : f32 to vector<1024x128xf32>
    %11 = arith.mulf %10, %9 : vector<1024x128xf32>
    %cst_8 = arith.constant 5.000000e-01 : f32
    %12 = vector.broadcast %cst_8 : f32 to vector<1024x128xf32>
    %13 = arith.addf %11, %12 : vector<1024x128xf32>
    %c0_9 = arith.constant 0 : index
    %c0_10 = arith.constant 0 : index
    %14 = vector.load %arg2[%c0_9, %c0_10] : memref<4x128xf32, #tpu.memory_space<vmem>>, vector<4x128xf32>
    %15 = vector.shape_cast %13 : vector<1024x128xf32> to vector<4x256x128xf32>
    %16 = vector.shape_cast %14 : vector<4x128xf32> to vector<4x1x128xf32>
    %17 = vector.broadcast %16 : vector<4x1x128xf32> to vector<4x256x128xf32>
    %18 = arith.mulf %15, %17 : vector<4x256x128xf32>
    %cst_11 = arith.constant dense<0.000000e+00> : vector<4x256xf32>
    %19 = vector.multi_reduction <add>, %18, %cst_11 [2] : vector<4x256x128xf32> to vector<4x256xf32>
    %c0_12 = arith.constant 0 : index
    %c0_13 = arith.constant 0 : index
    %20 = vector.load %arg6[%c0_12, %c0_13] : memref<4x256xf32, #tpu.memory_space<vmem>>, vector<4x256xf32>
    tpu.vector_store %arg6[%c0_12, %c0_13], %19 {strides = array<i32>} : memref<4x256xf32, #tpu.memory_space<vmem>>, vector<4x256xf32>,
    return
  }
  func.func @transform_0(%arg0: i32, %arg1: i32) -> (i32, i32) {
    %c0_i32 = arith.constant 0 : i32
    %c0_i32_0 = arith.constant 0 : i32
    return %arg0, %c0_i32 : i32, i32
  }
  func.func @transform_1(%arg0: i32, %arg1: i32) -> (i32, i32, i32) {
    %c0_i32 = arith.constant 0 : i32
    %c0_i32_0 = arith.constant 0 : i32
    return %arg0, %arg1, %c0_i32 : i32, i32, i32
  }
  func.func @transform_2(%arg0: i32, %arg1: i32) -> (i32, i32) {
    %c0_i32 = arith.constant 0 : i32
    %c0_i32_0 = arith.constant 0 : i32
    %c0_i32_1 = arith.constant 0 : i32
    return %c0_i32, %c0_i32_0 : i32, i32
  }
  func.func @transform_3(%arg0: i32, %arg1: i32) -> (i32, i32) {
    %c0_i32 = arith.constant 0 : i32
    %c0_i32_0 = arith.constant 0 : i32
    %c0_i32_1 = arith.constant 0 : i32
    return %c0_i32, %c0_i32_0 : i32, i32
  }
  func.func @transform_4(%arg0: i32, %arg1: i32) -> (i32, i32) {
    %c0_i32 = arith.constant 0 : i32
    return %arg0, %arg1 : i32, i32
  }
}

</mosaic_0001>

<bundles_post_ra>
// kernel: tpu_custom_call.1
= control target key start
LH: loop header
LB: loop body
LE: loop exit
PB: predicated region body
PF: predicated region fallthrough
CT: control target
= control target key end

     0   :  { %s8754_s0 = inlined_call_operand.hbm [shape: f32[4,128], index: 0, kind: input, shape index: {}]   ;;  %s8755_s1 = inlined_call_operand.hbm [shape: bf16[4,512,128], index: 1, kind: input, shape index: {}]   ;;  %s8756_s2 = inlined_call_operand.hbm [shape: bf16[128,128], index: 2, kind: input, shape index: {}]   ;;  %s8757_s3 = inlined_call_operand.vmem [shape: f32[1,128], index: 3, kind: input, shape index: {}]   ;;  %s8758_s4 = inlined_call_operand.hbm [shape: f32[4,512], index: 4, kind: output, shape index: {}]  }
   0x1   :  { %8796 = sst [smem:[#allocation42_spill]] %s8754_s0 }
   0x2   :  { %8797 = sst [smem:[#allocation43_spill]] %s8756_s2 }
   0x3   :  { %9 = vsyncpa [#allocation3], 0 }
   0x4   :  { %10 = vsyncpa [#allocation6], 0 }
   0x5   :  { %12 = vsyncpa [#allocation6 + $0x1], 0 }
   0x6   :  { %13 = vsyncpa [#allocation4], 0 }
   0x7   :  { %15 = vsyncpa [#allocation4 + $0x1], 0  ;;  %s6547_s15 = smov 0   ;;  %s6549_s16 = smov 0  }
   0x8   :  { %s6551_s17 = smov 0   ;;  %s6553_s18 = smov 0  }
   0x9   :  { %s6555_s19 = smov 0   ;;  %s6557_s20 = smov 0  }
   0xa LB: > { %s6578_s21 = sadd.s32 4294967295, %s6505_s20   ;;  %s5601_s22 = sadd.s32 4294967294, %s6505_s20   ;;  %s6505_s20 = sphi %s6557_s20, %s21_s20   ;;  %s6501_s19 = sphi %s6555_s19, %s8953_s19   ;;  %s6497_s18 = sphi %s6553_s18, %s8952_s18   ;;  %s6493_s17 = sphi %s6551_s17, %s8951_s17   ;;  %s6489_s16 = sphi %s6549_s16, %s8950_s16   ;;  %s6485_s15 = sphi %s6547_s15, %s8949_s15  }
   0xb   : > { %s30_s23 = sadd.s32 1, %s6501_s19  ;;  %s68_s24 = sadd.s32 1, %s6493_s17 }
   0xc   : > { %p31_p0 = scmp.ge.s32.totalorder %s30_s23, 2  ;;  %p75_p1 = scmp.ne.s32.totalorder %s6493_s17, %s6489_s16 }
   0xd   : > { %p76_p2 = scmp.eq.s32.totalorder %s6505_s20, 0  ;;  %p81_p3 = scmp.ne.s32.totalorder %s6489_s16, %s6485_s15 }
   0xe   : > { %s8955_s23 = smov (%p31_p0, %s30_s23), 0  ;;  %p8759_p5 = scmp.eq.s32.totalorder %s6578_s21, 0 }
   0xf   : > { %p6590_p4 = por %p76_p2, %p75_p1  ;;  %s64_s26 = ssub.s32 %s6501_s19, %s8955_s23 }
  0x10   : > { %p149_p6 = scmp.eq.s32.totalorder %s6578_s21, 1  ;;  %p66_p7 = scmp.eq.s32.totalorder %s64_s26, 0 }
  0x11   : > { %s8798_s25 = scalar_select %p6590_p4, 1, 0 }
  0x12   : > { %p6600_p8 = por %p8759_p5, %p81_p3  ;;  %p6604_p9 = por %p149_p6, %p75_p1 }
  0x13   : > { %p155_p10 = scmp.eq.s32.totalorder %s5601_s22, 1  ;;  %p5602_p12 = scmp.ge.s32.totalorder %s6505_s20, 1 }
  0x14   : > { %s8799_s27 = scalar_select %p6600_p8, 1, 0 }
  0x15   : > { %s8800_s28 = scalar_select %p6604_p9, 1, 0 }
  0x16   : > { %s6609_s29 = scalar_select %p66_p7, %s6493_s17, %s68_s24  }
  0x17   : > { %p6611_p11 = por %p155_p10, %p81_p3  ;;  %p162_p13 = scmp.lt.s32.totalorder %s6505_s20, 3 }
  0x18   : > { %s6507_s6 = smov [#allocation2]   ;;  %s6508_s8 = smov [#allocation7]  }
  0x19   : > { %s8801_s30 = scalar_select %p6611_p11, 1, 0 }
  0x1a   : > { %p6617_p0 = pnand %p5602_p12, %p162_p13  ;;  %s177_s7 = sshll.u32 %s6507_s6, 4  ;;  %s178_s7 = int_to_ptr.vmem [resolvable:$true] %s177_s7 }
  0x1b   : > { %s187_s9 = sshll.u32 %s6508_s8, 4  ;;  %s8804_s0 = sld [smem:[#allocation42_spill]]  ;;  %s6629_s9 = int_to_ptr.vmem [resolvable:$true] %s187_s9 }
  0x1c   : > { %s8802_s5 = scalar_select %p6617_p0, 1, 0 }
  0x1d   : > { %p5948_p1 = pneg %p6617_p0 }
  0x1f   : > { %p6625_p2 = pnand %p5948_p1, %p8759_p5 }
  0x21   : > { %s6359_s13 = scalar_lea.hbm %s8804_s0, 64  ;;  %p6361_p6 = pneg %p6625_p2 }
  0x22   : > { %p6360_p3 = scmp.ne.s32.totalorder %s8804_s0, %s6359_s13  ;;  %p6366_p12 = scmp.lt.u32.totalorder %s6359_s13, %s8804_s0 }
  0x24   : > { %p6362_p7 = pnand %p6361_p6, %p6360_p3 }
  0x26   : > { %p6363_p10 = pneg %p6362_p7 }
  0x28   : > { %p6368_p13 = pnand %p6366_p12, %p6363_p10 }
  0x2a   : > { %6371 = shalt.err (!%p6368_p13)
}
  0x2b   : > { %s6372_s6 = scalar_lea.vmem %s178_s7, 64  ;;  %p6380_p9 = scmp.lt.s32.totalorder %s178_s7, %s178_s7 }
  0x2c   : > { %p6373_p1 = scmp.ne.s32.totalorder %s178_s7, %s6372_s6  ;;  %p6381_p8 = scmp.lt.s32.totalorder %s6372_s6, %s6372_s6 }
  0x2e   : > { %p6375_p5 = pnand %p6373_p1, %p6361_p6  ;;  %p6382_p0 = por %p6381_p8, %p6380_p9 }
  0x30   : > { %p6376_p11 = pneg %p6375_p5 }
  0x32   : > { %p6383_p4 = pnand %p6382_p0, %p6376_p11 }
  0x34   : > { %6386 = shalt.err (!%p6383_p4)
}
  0x35   : > { %5951 = dma.hbm_to_vmem [thread:$0]  (!%p6625_p2), %s8804_s0, 64, %s178_s7, [#allocation3]  }
  0x36   : > { %s8805_s2 = sld [smem:[#allocation43_spill]] }
  0x3c   : > { %s6387_s14 = scalar_lea.hbm %s8805_s2, 1024 }
  0x3d   : > { %p6388_p5 = scmp.ne.s32.totalorder %s8805_s2, %s6387_s14  ;;  %p6394_p4 = scmp.lt.u32.totalorder %s6387_s14, %s8805_s2 }
  0x3f   : > { %p6390_p8 = pnand %p6388_p5, %p6361_p6 }
  0x41   : > { %p6391_p9 = pneg %p6390_p8 }
  0x43   : > { %p6396_p11 = pnand %p6394_p4, %p6391_p9 }
  0x45   : > { %6399 = shalt.err (!%p6396_p11)
}
  0x46   : > { %s6400_s7 = scalar_lea.vmem %s6629_s9, 1024  ;;  %p6408_p10 = scmp.lt.s32.totalorder %s6629_s9, %s6629_s9 }
  0x47   : > { %p6401_p0 = scmp.ne.s32.totalorder %s6629_s9, %s6400_s7  ;;  %p6409_p12 = scmp.lt.s32.totalorder %s6400_s7, %s6400_s7 }
  0x49   : > { %p6403_p3 = pnand %p6401_p0, %p6361_p6  ;;  %p6410_p13 = por %p6409_p12, %p6408_p10 }
  0x4b   : > { %p6404_p7 = pneg %p6403_p3 }
  0x4d   : > { %p6411_p1 = pnand %p6410_p13, %p6404_p7 }
  0x4f   : > { %6414 = shalt.err (!%p6411_p1)
}
  0x50   : > { %s6509_s8 = smov 64   ;;  %s6510_s11 = smov 4  }
  0x51   : > { %5954 = dma.hbm_to_vmem [thread:$0]  (!%p6625_p2), %s8805_s2, 1024, %s6629_s9, [#allocation6], %s6509_s8, %s6509_s8, %s6510_s11  }
  0x52   : > { %p5605_p5 = scmp.ge.s32.totalorder %s6505_s20, 2 }
  0x54   : > { %200 = sbr.rel (%p5605_p5) target bundleno = 106 (0x6a), region = 28 }
  0x5b   : > { %s204_s14 = sand.u32 1, %s6505_s20   ;;  %s206_s22 = sand.u32 1, %s6493_s17  }
  0x5c   : > { %s5606_s10 = sshll.u32 %s206_s22, 9  ;;  %s5695_s24 = sshll.u32 %s6501_s19, 11 }
  0x5d   : > { %s217_s6 = scalar_lea.hbm %s8755_s1, %s5695_s24  ;;  %p8806_p2 = scmp.ne.s32.totalorder %s8798_s25, 0 }
  0x5e   : > { %s208_s8 = scalar_lea.vmem [#allocation5], %s5606_s10  ;;  %s6511_s13 = smov 4096  }
  0x5f   : > { %s5933_s7 = scalar_select %p8806_p2, [#allocation0], [#allocation11] }
  0x60   : > { %s230_s11 = sshll.u32 %s208_s8, 4  ;;  %5934 = sst [smem:[#allocation10]] (%p8806_p2), %s6511_s13  ;;  %s231_s11 = int_to_ptr.vmem [resolvable:$true] %s230_s11 }
  0x61   : > { %s222_s12 = sld [smem:[%s5933_s7]]   ;;  %s6512_s0 = smov 2048  }
  0x62   : > { %5935 = sst [smem:[#allocation10 + $0x1]] (%p8806_p2), %s6512_s0  ;;  %s6513_s22 = smov 32  }
  0x63   : > { %5936 = sst [smem:[#allocation10 + $0x2]] (%p8806_p2), %s6513_s22  ;;  %s6514_s2 = smov 64  }
  0x64   : > { %5937 = sst [smem:[#allocation10 + $0x3]] (%p8806_p2), %s6514_s2  ;;  %s6515_s10 = smov 4  }
  0x65   : > { %5938 = sst [smem:[#allocation10 + $0x4]] (%p8806_p2), %s6514_s2  ;;  %s205_s9 = scalar_lea.sflag [#allocation6], %s204_s14 }
  0x66   : > { %5939 = sst [smem:[#allocation10 + $0x5]] (%p8806_p2), %s6515_s10  ;;  %s6516_s7 = smov [#allocation9]  }
  0x67   : > { %s5609_s24 = sshll.u32 %s222_s12, 26 }
  0x68   : > { %s5610_s26 = sadd.s32 134217728, %s5609_s24 }
  0x69   : > { %5940 = dma.general (%p8806_p2), %s217_s6, 8192, %s231_s11, %s205_s9, %s6516_s7, [#allocation10], %s5610_s26, 0  }
  0x6a PF: > { %p8807_p6 = scmp.ne.s32.totalorder %s8802_s5, 0 }
  0x6c   : > { %255 = sbr.rel (%p8807_p6) target bundleno = 1106 (0x452), region = 36 }
  0x73   : > { %p8808_p8 = scmp.eq.s32.totalorder %s6578_s21, 0 }
  0x75   : > { %6468 = dma.done.wait (%p8808_p8), [#allocation3], 64   ;;  %p8809_p9 = pmov %p8808_p8 }
  0x76   : > { %s261_s0 = sand.u32 1, %s6578_s21   ;;  %s6711_s2 = sand.u32 1, %s6489_s16  }
  0x77   : > { %6470 = vsyncadd (%p8809_p9), [#allocation3], 4294967232  ;;  %s5613_s14 = sshll.u32 %s6711_s2, 9  ;;  %s262_s25 = scalar_lea.sflag [#allocation6], %s261_s0 }
  0x78   : > { %s6714_s6 = scalar_lea.vmem [#allocation5], %s5613_s14  ;;  %p8810_p4 = scmp.ne.s32.totalorder %s8799_s27, 0 }
  0x7a   : > { %6472 = dma.done.wait (%p8810_p4), %s262_s25, 8192  }
  0x7b   : > { %6474 = vsyncadd (%p8810_p4), %s262_s25, 4294959104  ;;  %p8811_p11 = pmov %p8808_p8 }
  0x7c   : > { %p8812_p0 = pmov %p8808_p8 }
  0x7d   : > { %6476 = dma.done.wait (%p8811_p11), [#allocation6], 1024  }
  0x7e   : > { %6478 = vsyncadd (%p8812_p0), [#allocation6], 4294966272  ;;  %v6028_v0 = vld [vmem:[#allocation7] sm:$0xff]   ;;  %v6029_v1 = vld [vmem:[#allocation7 + $0x8] sm:$0xff]   ;;  %vm4811_vm0 = vcmask 130112   ;;  %vm4818_vm1 = vcmask 195712  }
  0x7f   : > { %5769 = vmatprep.subr.bf16.mxu0 %v6028_v0  ;;  %5913 = vmatprep.subr.bf16.mxu1 %v6028_v0  ;;  %v6030_v2 = vld [vmem:[#allocation7 + $0x10] sm:$0xff]   ;;  %v6036_v3 = vld [vmem:[%s6714_s6] sm:$0xff]   ;;  %v6031_v5 = vld [vmem:[#allocation7 + $0x18] sm:$0xff]   ;;  %vm4825_vm2 = vcmask 261312   ;;  %vm4832_vm3 = vcmask 326912   ;;  %vm4839_vm4 = vcmask 392512  }
  0x80   : > { %5770 = vmatpush3.bf16.xpose.msra.mxu0 %v6028_v0  ;;  %5921 = vmatpush3.bf16.xpose.msra.mxu1 %v6028_v0  ;;  %v6037_v4 = vld [vmem:[%s6714_s6 + $0x100] sm:$0xff]   ;;  %v6033_v7 = vld [vmem:[#allocation7 + $0x28] sm:$0xff]   ;;  %v6034_v8 = vld [vmem:[#allocation7 + $0x30] sm:$0xff]   ;;  %vm4846_vm5 = vcmask 458112   ;;  %vm4853_vm6 = vcmask 523712   ;;  %vm4860_vm7 = vcmask 589312  }
  0x81   : > { %5771 = vmatprep.subr.bf16.mxu0 %v6029_v1  ;;  %5914 = vmatprep.subr.bf16.mxu1 %v6029_v1  ;;  %v6032_v6 = vld [vmem:[#allocation7 + $0x20] sm:$0xff]   ;;  %v6035_v9 = vld [vmem:[#allocation7 + $0x38] sm:$0xff]   ;;  %v6038_v10 = vld [vmem:[%s6714_s6 + $0x8] sm:$0xff]   ;;  %vm4867_vm8 = vcmask 654912   ;;  %vm4874_vm9 = vcmask 720512   ;;  %vm8795_vm10 = vcmask 786112  }
  0x82   : > { %5785 = vmatprep.mubr.bf16.mxu0 %v6036_v3  ;;  %5849 = vmatprep.mubr.bf16.mxu1 %v6037_v4  ;;  %v6039_v11 = vld [vmem:[%s6714_s6 + $0x108] sm:$0xff]   ;;  %v6040_v12 = vld [vmem:[%s6714_s6 + $0x10] sm:$0xff]   ;;  %v6041_v14 = vld [vmem:[%s6714_s6 + $0x18] sm:$0xff]   ;;  %vm4888_vm11 = vcmask 851712   ;;  %vm4895_vm12 = vcmask 917312   ;;  %vm4902_vm13 = vcmask 982912  }
  0x83   : > { %v6042_v13 = vld [vmem:[%s6714_s6 + $0x110] sm:$0xff]   ;;  %v6043_v15 = vld [vmem:[%s6714_s6 + $0x118] sm:$0xff]   ;;  %v6044_v16 = vld [vmem:[%s6714_s6 + $0x20] sm:$0xff]   ;;  %vm4909_vm14 = vcmask 1048512   ;;  %vm5464_vm15 = vcmask 1041409   ;;  %s5615_s13 = sshll.u32 %s6711_s2, 3 }
  0x84   : > { %v6046_v17 = vld [vmem:[%s6714_s6 + $0x120] sm:$0xff]   ;;  %v6045_v18 = vld [vmem:[%s6714_s6 + $0x28] sm:$0xff]   ;;  %v6048_v20 = vld [vmem:[%s6714_s6 + $0x30] sm:$0xff]   ;;  %s5696_s22 = sshll.u32 %s6497_s18, 7  ;;  %s293_s24 = scalar_lea.vmem [#allocation8], %s5615_s13 }
  0x85   : > { %v6047_v19 = vld [vmem:[%s6714_s6 + $0x128] sm:$0xff]   ;;  %v6050_v21 = vld [vmem:[%s6714_s6 + $0x130] sm:$0xff]   ;;  %v6049_v22 = vld [vmem:[%s6714_s6 + $0x38] sm:$0xff]   ;;  %s5493_s10 = sshll.u32 %s293_s24, 4  ;;  %s8705_s7 = scalar_lea.hbm %s8758_s4, %s5696_s22  ;;  %s8707_s10 = int_to_ptr.vmem [resolvable:$true] %s5493_s10 }
  0x86   : > { %v6051_v23 = vld [vmem:[%s6714_s6 + $0x138] sm:$0xff]   ;;  %v6052_v24 = vld [vmem:[%s6714_s6 + $0x40] sm:$0xff]   ;;  %v6053_v26 = vld [vmem:[%s6714_s6 + $0x48] sm:$0xff]   ;;  %s5477_s18 = scalar_lea.sflag [#allocation4], %s6711_s2  ;;  %s6415_s0 = scalar_lea.vmem %s8707_s10, 128 }
  0x87   : > { %v6054_v25 = vld [vmem:[%s6714_s6 + $0x140] sm:$0xff]   ;;  %v6055_v27 = vld [vmem:[%s6714_s6 + $0x148] sm:$0xff]   ;;  %v6056_v28 = vld [vmem:[%s6714_s6 + $0x50] sm:$0xff]   ;;  %p6416_p3 = scmp.ne.s32.totalorder %s8707_s10, %s6415_s0  ;;  %p8947_p7 = scmp.ne.s32.totalorder %s8800_s28, 0 }
  0x88   : > { %5772 = vmatpush3.bf16.xpose.msra.mxu0 %v6029_v1  ;;  %5922 = vmatpush3.bf16.xpose.msra.mxu1 %v6029_v1  ;;  %v6058_v29 = vld [vmem:[%s6714_s6 + $0x150] sm:$0xff]   ;;  %v6057_v30 = vld [vmem:[%s6714_s6 + $0x58] sm:$0xff]   ;;  %v6060_v32 = vld [vmem:[%s6714_s6 + $0x60] sm:$0xff]   ;;  %s6521_s14 = smov [#allocation8]  }
  0x89   : > { %5773 = vmatprep.subr.bf16.mxu0 %v6030_v2  ;;  %5915 = vmatprep.subr.bf16.mxu1 %v6030_v2  ;;  %v6059_v31 = vld [vmem:[%s6714_s6 + $0x158] sm:$0xff]   ;;  %v6062_v33 = vld [vmem:[%s6714_s6 + $0x160] sm:$0xff]   ;;  %v6061_v34 = vld [vmem:[%s6714_s6 + $0x68] sm:$0xff]   ;;  %p6417_p10 = pnand %p6416_p3, %p8947_p7  ;;  %s6419_s25 = sshll.u32 %s6521_s14, 4  ;;  %s6420_s25 = int_to_ptr.vmem [resolvable:$false] %s6419_s25 }
  0x8a   : > { %v6063_v35 = vld [vmem:[%s6714_s6 + $0x168] sm:$0xff]   ;;  %v6064_v36 = vld [vmem:[%s6714_s6 + $0x70] sm:$0xff]   ;;  %v6065_v38 = vld [vmem:[%s6714_s6 + $0x78] sm:$0xff]   ;;  %p6422_p13 = scmp.lt.s32.totalorder %s8707_s10, %s6420_s25 }
  0x8b   : > { %v6066_v37 = vld [vmem:[%s6714_s6 + $0x170] sm:$0xff]   ;;  %v6067_v39 = vld [vmem:[%s6714_s6 + $0x178] sm:$0xff]   ;;  %v6068_v40 = vld [vmem:[%s6714_s6 + $0x80] sm:$0xff]   ;;  %p6418_p12 = pneg %p6417_p10 }
  0x8c   : > { %v6070_v41 = vld [vmem:[%s6714_s6 + $0x180] sm:$0xff]   ;;  %v6069_v42 = vld [vmem:[%s6714_s6 + $0x88] sm:$0xff]   ;;  %v6072_v44 = vld [vmem:[%s6714_s6 + $0x90] sm:$0xff]  }
  0x8d   : > { %v6071_v43 = vld [vmem:[%s6714_s6 + $0x188] sm:$0xff]   ;;  %v6074_v45 = vld [vmem:[%s6714_s6 + $0x190] sm:$0xff]   ;;  %v6073_v46 = vld [vmem:[%s6714_s6 + $0x98] sm:$0xff]  }
  0x8e   : > { %v6075_v47 = vld [vmem:[%s6714_s6 + $0x198] sm:$0xff]   ;;  %v6076_v48 = vld [vmem:[%s6714_s6 + $0xa0] sm:$0xff]   ;;  %v6077_v50 = vld [vmem:[%s6714_s6 + $0xa8] sm:$0xff]  }
  0x8f   : > { %v6078_v49 = vld [vmem:[%s6714_s6 + $0x1a0] sm:$0xff]   ;;  %v6079_v51 = vld [vmem:[%s6714_s6 + $0x1a8] sm:$0xff]   ;;  %v6080_v52 = vld [vmem:[%s6714_s6 + $0xb0] sm:$0xff]  }
  0x90   : > { %5774 = vmatpush3.bf16.xpose.msra.mxu0 %v6030_v2  ;;  %5923 = vmatpush3.bf16.xpose.msra.mxu1 %v6030_v2  ;;  %v6082_v53 = vld [vmem:[%s6714_s6 + $0x1b0] sm:$0xff]   ;;  %v6081_v54 = vld [vmem:[%s6714_s6 + $0xb8] sm:$0xff]   ;;  %v6084_v56 = vld [vmem:[%s6714_s6 + $0xc0] sm:$0xff]  }
  0x91   : > { %5775 = vmatprep.subr.bf16.mxu0 %v6031_v5  ;;  %5916 = vmatprep.subr.bf16.mxu1 %v6031_v5  ;;  %v6083_v55 = vld [vmem:[%s6714_s6 + $0x1b8] sm:$0xff]   ;;  %v6086_v57 = vld [vmem:[%s6714_s6 + $0x1c0] sm:$0xff]   ;;  %v6085_v58 = vld [vmem:[%s6714_s6 + $0xc8] sm:$0xff]  }
  0x92   : > { %v6087_v59 = vld [vmem:[%s6714_s6 + $0x1c8] sm:$0xff]   ;;  %v6088_v60 = vld [vmem:[%s6714_s6 + $0xd0] sm:$0xff]   ;;  %v6089_v62 = vld [vmem:[%s6714_s6 + $0xd8] sm:$0xff]  }
  0x93   : > { %v6090_v61 = vld [vmem:[%s6714_s6 + $0x1d0] sm:$0xff]   ;;  %v6091_v63 = vld [vmem:[%s6714_s6 + $0x1d8] sm:$0xff]   ;;  %v6092_v0 = vld [vmem:[%s6714_s6 + $0xe0] sm:$0xff]  }
  0x94   : > { %v6094_v1 = vld [vmem:[%s6714_s6 + $0x1e0] sm:$0xff]   ;;  %v6093_v2 = vld [vmem:[%s6714_s6 + $0xe8] sm:$0xff]   ;;  %v6096_v4 = vld [vmem:[%s6714_s6 + $0xf0] sm:$0xff]  }
  0x95   : > { %v6095_v3 = vld [vmem:[%s6714_s6 + $0x1e8] sm:$0xff]  }
  0x98   : > { %5776 = vmatpush3.bf16.xpose.msra.mxu0 %v6031_v5  ;;  %5924 = vmatpush3.bf16.xpose.msra.mxu1 %v6031_v5  ;;  %v6098_v5 = vld [vmem:[%s6714_s6 + $0x1f0] sm:$0xff]  }
  0x99   : > { %5777 = vmatprep.subr.bf16.mxu0 %v6032_v6  ;;  %5917 = vmatprep.subr.bf16.mxu1 %v6032_v6 }
  0xa0   : > { %5778 = vmatpush3.bf16.xpose.msra.mxu0 %v6032_v6  ;;  %5925 = vmatpush3.bf16.xpose.msra.mxu1 %v6032_v6  ;;  %v6097_v6 = vld [vmem:[%s6714_s6 + $0xf8] sm:$0xff]  }
  0xa1   : > { %5779 = vmatprep.subr.bf16.mxu0 %v6033_v7  ;;  %5918 = vmatprep.subr.bf16.mxu1 %v6033_v7 }
  0xa8   : > { %5780 = vmatpush3.bf16.xpose.msra.mxu0 %v6033_v7  ;;  %5926 = vmatpush3.bf16.xpose.msra.mxu1 %v6033_v7  ;;  %v6099_v7 = vld [vmem:[%s6714_s6 + $0x1f8] sm:$0xff]   ;;  %s6421_s6 = scalar_lea.vmem %s6420_s25, 256 }
  0xa9   : > { %5781 = vmatprep.subr.bf16.mxu0 %v6034_v8  ;;  %5919 = vmatprep.subr.bf16.mxu1 %v6034_v8  ;;  %p6423_p1 = scmp.lt.s32.totalorder %s6421_s6, %s6415_s0 }
  0xab   : > { %p6424_p2 = por %p6423_p1, %p6422_p13 }
  0xad   : > { %p6425_p6 = pnand %p6424_p2, %p6418_p12 }
  0xb0   : > { %5782 = vmatpush3.bf16.xpose.msra.mxu0 %v6034_v8  ;;  %5927 = vmatpush3.bf16.xpose.msra.mxu1 %v6034_v8  ;;  %v6517_v8 = vmov 1966171168  }
  0xb1   : > { %5783 = vmatprep.subr.bf16.mxu0 %v6035_v9  ;;  %5920 = vmatprep.subr.bf16.mxu1 %v6035_v9 }
  0xb8   : > { %5784 = vmatpush3.bf16.xpose.msra.mxu0 %v6035_v9  ;;  %5928 = vmatpush3.bf16.xpose.msra.mxu1 %v6035_v9  ;;  %v1949_v9 = vunpack.c.l.s4 %v6517_v8 }
  0xbf   : > { %5786 = vmatmul.mubr.bf16.vlgmr.msra.gmra.mrb[0].mxu0 %v6038_v10  ;;  %5850 = vmatmul.mubr.bf16.vlgmr.msra.gmra.mrb[0].mxu1 %v6039_v11  ;;  %v8764_v10 = vlaneseq  ;;  %v6791_v11 = vld [vmem:[%s8757_s3] ss:$0 sm:$0xff] }
  0xc0   : > { %5789 = vmatprep.mubr.bf16.mxu0 %v6040_v12  ;;  %5853 = vmatprep.mubr.bf16.mxu1 %v6042_v13 }
  0xc7   : > { %5790 = vmatmul.mubr.bf16.gmra.mrb[4].mxu0 %v6041_v14  ;;  %5854 = vmatmul.mubr.bf16.gmra.mrb[4].mxu1 %v6043_v15 }
  0xc8   : > { %5793 = vmatprep.mubr.bf16.mxu0 %v6044_v16  ;;  %5857 = vmatprep.mubr.bf16.mxu1 %v6046_v17 }
  0xcf   : > { %5794 = vmatmul.mubr.bf16.gmra.mrb[8].mxu0 %v6045_v18  ;;  %5858 = vmatmul.mubr.bf16.gmra.mrb[8].mxu1 %v6047_v19  ;;  %v1950_v18 = vunpack.c.0.s8 %v1949_v9  ;;  %v6796_v19 = vshrl.u32 %v8764_v10, 7 }
  0xd0   : > { %5797 = vmatprep.mubr.bf16.mxu0 %v6048_v20  ;;  %5861 = vmatprep.mubr.bf16.mxu1 %v6050_v21 }
  0xd1   : > { %8813 = vst [vmem:[#allocation16_spill] sm:$0xff] %v6796_v19 }
  0xd7   : > { %5798 = vmatmul.mubr.bf16.gmra.mrb[12].mxu0 %v6049_v22  ;;  %5862 = vmatmul.mubr.bf16.gmra.mrb[12].mxu1 %v6051_v23 }
  0xd8   : > { %5801 = vmatprep.mubr.bf16.mxu0 %v6052_v24  ;;  %5865 = vmatprep.mubr.bf16.mxu1 %v6054_v25 }
  0xdf   : > { %5802 = vmatmul.mubr.bf16.gmra.mrb[16].mxu0 %v6053_v26  ;;  %5866 = vmatmul.mubr.bf16.gmra.mrb[16].mxu1 %v6055_v27 }
  0xe0   : > { %5805 = vmatprep.mubr.bf16.mxu0 %v6056_v28  ;;  %5869 = vmatprep.mubr.bf16.mxu1 %v6058_v29 }
  0xe7   : > { %5806 = vmatmul.mubr.bf16.gmra.mrb[20].mxu0 %v6057_v30  ;;  %5870 = vmatmul.mubr.bf16.gmra.mrb[20].mxu1 %v6059_v31 }
  0xe8   : > { %5809 = vmatprep.mubr.bf16.mxu0 %v6060_v32  ;;  %5873 = vmatprep.mubr.bf16.mxu1 %v6062_v33  ;;  %v6804_v33 = vsub.s32 %v1950_v18, %v6796_v19 }
  0xef   : > { %5810 = vmatmul.mubr.bf16.gmra.mrb[24].mxu0 %v6061_v34  ;;  %5874 = vmatmul.mubr.bf16.gmra.mrb[24].mxu1 %v6063_v35 }
  0xf0   : > { %5813 = vmatprep.mubr.bf16.mxu0 %v6064_v36  ;;  %5877 = vmatprep.mubr.bf16.mxu1 %v6066_v37  ;;  %v5689_v36 = vld.sshfl [vmem:[#allocation2] sm:$0x33 pattern:$0x75316420] }
  0xf7   : > { %5814 = vmatmul.mubr.bf16.gmra.mrb[28].mxu0 %v6065_v38  ;;  %5878 = vmatmul.mubr.bf16.gmra.mrb[28].mxu1 %v6067_v39 }
  0xf8   : > { %5817 = vmatprep.mubr.bf16.mxu0 %v6068_v40  ;;  %5881 = vmatprep.mubr.bf16.mxu1 %v6070_v41 }
  0xff   : > { %5818 = vmatmul.mubr.bf16.gmra.mrb[32].mxu0 %v6069_v42  ;;  %5882 = vmatmul.mubr.bf16.gmra.mrb[32].mxu1 %v6071_v43 }
 0x100   : > { %5821 = vmatprep.mubr.bf16.mxu0 %v6072_v44  ;;  %5885 = vmatprep.mubr.bf16.mxu1 %v6074_v45  ;;  %v1954_v44 = vrot.slane %v5689_v36, %v6804_v33 }
 0x107   : > { %5822 = vmatmul.mubr.bf16.gmra.mrb[36].mxu0 %v6073_v46  ;;  %5886 = vmatmul.mubr.bf16.gmra.mrb[36].mxu1 %v6075_v47 }
 0x108   : > { %5825 = vmatprep.mubr.bf16.mxu0 %v6076_v48  ;;  %5889 = vmatprep.mubr.bf16.mxu1 %v6078_v49 }
 0x10f   : > { %5826 = vmatmul.mubr.bf16.gmra.mrb[40].mxu0 %v6077_v50  ;;  %5890 = vmatmul.mubr.bf16.gmra.mrb[40].mxu1 %v6079_v51  ;;  %v6811_v51 = vsub.s32 0, %v6796_v19 }
 0x110   : > { %5829 = vmatprep.mubr.bf16.mxu0 %v6080_v52  ;;  %5893 = vmatprep.mubr.bf16.mxu1 %v6082_v53 }
 0x117   : > { %5830 = vmatmul.mubr.bf16.gmra.mrb[44].mxu0 %v6081_v54  ;;  %5894 = vmatmul.mubr.bf16.gmra.mrb[44].mxu1 %v6083_v55 }
 0x118   : > { %5833 = vmatprep.mubr.bf16.mxu0 %v6084_v56  ;;  %5897 = vmatprep.mubr.bf16.mxu1 %v6086_v57  ;;  %v1962_v56 = vcombine.high %v1954_v44, %v1954_v44 }
 0x11f   : > { %5834 = vmatmul.mubr.bf16.gmra.mrb[48].mxu0 %v6085_v58  ;;  %5898 = vmatmul.mubr.bf16.gmra.mrb[48].mxu1 %v6087_v59 }
 0x120   : > { %5837 = vmatprep.mubr.bf16.mxu0 %v6088_v60  ;;  %5901 = vmatprep.mubr.bf16.mxu1 %v6090_v61  ;;  %v6817_v60 = vrot.slane %v1954_v44, %v6811_v51 }
 0x127   : > { %5838 = vmatmul.mubr.bf16.gmra.mrb[52].mxu0 %v6089_v62  ;;  %5902 = vmatmul.mubr.bf16.gmra.mrb[52].mxu1 %v6091_v63 }
 0x128   : > { %5841 = vmatprep.mubr.bf16.mxu0 %v6092_v0  ;;  %5905 = vmatprep.mubr.bf16.mxu1 %v6094_v1 }
 0x12f   : > { %5842 = vmatmul.mubr.bf16.gmra.mrb[56].mxu0 %v6093_v2  ;;  %5906 = vmatmul.mubr.bf16.gmra.mrb[56].mxu1 %v6095_v3 }
 0x130   : > { %5845 = vmatprep.mubr.bf16.mxu0 %v6096_v4  ;;  %5909 = vmatprep.mubr.bf16.mxu1 %v6098_v5  ;;  %v6821_v5 = vrot.slane %v1962_v56, %v6811_v51 }
 0x137   : > { %5846 = vmatmul.mubr.bf16.gmra.mrb[60].mxu0 %v6097_v6  ;;  %5910 = vmatmul.mubr.bf16.gmra.mrb[60].mxu1 %v6099_v7 }
 0x192   : > { %v5787_v12 = vpop.f32.mrb[0].mxu0  ;;  %v5851_v13 = vpop.f32.mrb[0].mxu1 }
 0x193   : > { %v924_v14 = vadd.f32 %v5787_v12, %v6791_v11  ;;  %v1180_v15 = vadd.f32 %v5851_v13, %v6791_v11  ;;  %v915_v16 = vpop.f32.mrb[1].mxu0  ;;  %v1171_v17 = vpop.f32.mrb[1].mxu1 }
 0x194   : > { %v916_v20 = vadd.f32 %v6791_v11, %v915_v16  ;;  %v5788_v21 = vpop.f32.mrb[2].mxu0  ;;  %v1172_v22 = vadd.f32 %v6791_v11, %v1171_v17  ;;  %v5852_v23 = vpop.f32.mrb[2].mxu1 }
 0x195   : > { %v1428_v24 = vmul.f32 0.5, %v924_v14  ;;  %v1492_v25 = vmul.f32 0.5, %v1180_v15  ;;  %v927_v26 = vadd.f32 %v5788_v21, %v6791_v11  ;;  %v918_v27 = vpop.f32.mrb[3].mxu0  ;;  %v1183_v28 = vadd.f32 %v5852_v23, %v6791_v11  ;;  %v1174_v29 = vpop.f32.mrb[3].mxu1 }
 0x196   : > { %v1426_v30 = vmul.f32 0.5, %v916_v20  ;;  %v1175_v31 = vadd.f32 %v6791_v11, %v1174_v29  ;;  %v919_v34 = vadd.f32 %v6791_v11, %v918_v27  ;;  %v1490_v35 = vmul.f32 0.5, %v1172_v22 }
 0x197   : > { %6100 = vtanh.f32 %v1428_v24  ;;  %v1429_v32 = vmul.f32 0.5, %v927_v26  ;;  %v1493_v37 = vmul.f32 0.5, %v1183_v28 }
 0x198   : > { %6102 = vtanh.f32 %v1492_v25  ;;  %v1491_v38 = vmul.f32 0.5, %v1175_v31  ;;  %v1427_v45 = vmul.f32 0.5, %v919_v34 }
 0x199   : > { %6104 = vtanh.f32 %v1426_v30 }
 0x19a   : > { %6106 = vtanh.f32 %v1429_v32  ;;  %v5791_v39 = vpop.f32.mrb[4].mxu0  ;;  %v5855_v40 = vpop.f32.mrb[4].mxu1 }
 0x19b   : > { %v940_v41 = vadd.f32 %v5791_v39, %v6791_v11  ;;  %v931_v42 = vpop.f32.mrb[5].mxu0  ;;  %v1187_v43 = vpop.f32.mrb[5].mxu1  ;;  %6108 = vtanh.f32 %v1490_v35  ;;  %v1196_v53 = vadd.f32 %v5855_v40, %v6791_v11 }
 0x19c   : > { %v5792_v46 = vpop.f32.mrb[6].mxu0  ;;  %v5856_v47 = vpop.f32.mrb[6].mxu1  ;;  %6110 = vtanh.f32 %v1493_v37  ;;  %v932_v62 = vadd.f32 %v6791_v11, %v931_v42  ;;  %v1188_v9 = vadd.f32 %v6791_v11, %v1187_v43 }
 0x19d   : > { %v943_v48 = vadd.f32 %v5792_v46, %v6791_v11  ;;  %v934_v49 = vpop.f32.mrb[7].mxu0  ;;  %v1190_v50 = vpop.f32.mrb[7].mxu1  ;;  %6112 = vtanh.f32 %v1491_v38  ;;  %v1432_v52 = vmul.f32 0.5, %v940_v41  ;;  %v1199_v55 = vadd.f32 %v5856_v47, %v6791_v11 }
 0x19e   : > { %6114 = vtanh.f32 %v1427_v45  ;;  %v935_v58 = vadd.f32 %v6791_v11, %v934_v49  ;;  %v1496_v63 = vmul.f32 0.5, %v1196_v53  ;;  %v1191_v12 = vadd.f32 %v6791_v11, %v1190_v50 }
 0x19f   : > { %v1433_v54 = vmul.f32 0.5, %v943_v48  ;;  %v1497_v59 = vmul.f32 0.5, %v1199_v55  ;;  %v1430_v24 = vmul.f32 0.5, %v932_v62  ;;  %v1494_v31 = vmul.f32 0.5, %v1188_v9 }
 0x1a0   : > { %v1431_v17 = vmul.f32 0.5, %v935_v58  ;;  %v1495_v35 = vmul.f32 0.5, %v1191_v12 }
 0x1a1   : > { %v6101_v57 = vpop.eup %6100  ;;  %6116 = vtanh.f32 %v1433_v54 }
 0x1a2   : > { %v6103_v61 = vpop.eup %6102  ;;  %6118 = vtanh.f32 %v1432_v52  ;;  %v1684_v0 = vmul.f32 0.5, %v6101_v57  ;;  %v5795_v1 = vpop.f32.mrb[8].mxu0 }
 0x1a3   : > { %v5859_v2 = vpop.f32.mrb[8].mxu1  ;;  %v6105_v3 = vpop.eup %6104  ;;  %v1748_v4 = vmul.f32 0.5, %v6103_v61  ;;  %6120 = vtanh.f32 %v1497_v59  ;;  %v956_v32 = vadd.f32 %v5795_v1, %v6791_v11 }
 0x1a4   : > { %v6823_v6 = vpop.f32.mrb[9].mxu0  ;;  %v6825_v7 = vpop.f32.mrb[9].mxu1  ;;  %v1812_v13 = vadd.f32 0.5, %v1684_v0  ;;  %v1682_v14 = vmul.f32 0.5, %v6105_v3  ;;  %6122 = vtanh.f32 %v1496_v63  ;;  %v1212_v55 = vadd.f32 %v5859_v2, %v6791_v11 }
 0x1a5   : > { %v6107_v8 = vpop.eup %6106  ;;  %v5796_v15 = vpop.f32.mrb[10].mxu0  ;;  %v1876_v18 = vadd.f32 0.5, %v1748_v4  ;;  %6124 = vtanh.f32 %v1431_v17  ;;  %v1436_v50 = vmul.f32 0.5, %v956_v32  ;;  %v948_v2 = vadd.f32 %v6791_v11, %v6823_v6 }
 0x1a6   : > { %v5860_v16 = vpop.f32.mrb[10].mxu1  ;;  %v1685_v20 = vmul.f32 0.5, %v6107_v8  ;;  %v950_v21 = vpop.f32.mrb[11].mxu0  ;;  %v1986_v25 = vmul.f32 %v6817_v60, %v1812_v13  ;;  %v1810_v29 = vadd.f32 0.5, %v1682_v14  ;;  %v959_v36 = vadd.f32 %v5796_v15, %v6791_v11 }
 0x1a7   : > { %v6829_v22 = vpop.f32.mrb[11].mxu1  ;;  %v6109_v23 = vpop.eup %6108  ;;  %v2050_v27 = vmul.f32 %v6821_v5, %v1876_v18  ;;  %6126 = vtanh.f32 %v1430_v24  ;;  %v1215_v56 = vadd.f32 %v5860_v16, %v6791_v11  ;;  %v951_v9 = vadd.f32 %v6791_v11, %v950_v21 }
 0x1a8   : > { %v6111_v26 = vpop.eup %6110  ;;  %v1813_v28 = vadd.f32 0.5, %v1685_v20  ;;  %2116 = vadd.xlane.f32.xlu1 %v1986_v25  ;;  %v1746_v37 = vmul.f32 0.5, %v6109_v23  ;;  %v1984_v44 = vmul.f32 %v6817_v60, %v1810_v29  ;;  %6128 = vtanh.f32 %v1494_v31 }
 0x1a9   : > { %v6113_v30 = vpop.eup %6112  ;;  %v1749_v34 = vmul.f32 0.5, %v6111_v26  ;;  %2244 = vadd.xlane.f32.xlu0 %v2050_v27  ;;  %6130 = vtanh.f32 %v1495_v35  ;;  %v1437_v54 = vmul.f32 0.5, %v959_v36  ;;  %v1501_v12 = vmul.f32 0.5, %v1215_v56 }
 0x1aa   : > { %v6115_v38 = vpop.eup %6114  ;;  %v1987_v39 = vmul.f32 %v6817_v60, %v1813_v28  ;;  %v6836_v41 = vpop.f32.mrb[12].mxu0  ;;  %v1874_v45 = vadd.f32 0.5, %v1746_v37  ;;  %v1747_v46 = vmul.f32 0.5, %v6113_v30  ;;  %6132 = vtanh.f32 %v1436_v50 }
 0x1ab   : > { %v1877_v40 = vadd.f32 0.5, %v1749_v34  ;;  %v6838_v42 = vpop.f32.mrb[12].mxu1  ;;  %v6117_v43 = vpop.eup %6116  ;;  %v1683_v62 = vmul.f32 0.5, %v6115_v38  ;;  %6134 = vtanh.f32 %v1437_v54  ;;  %v1500_v13 = vmul.f32 0.5, %v1212_v55 }
 0x1ac   : > { %v6841_v47 = vpop.f32.mrb[13].mxu0  ;;  %v6843_v48 = vpop.f32.mrb[13].mxu1  ;;  %2118 = vadd.xlane.f32.xlu1 %v1987_v39  ;;  %v1875_v61 = vadd.f32 0.5, %v1747_v46  ;;  %v1689_v63 = vmul.f32 0.5, %v6117_v43  ;;  %v2048_v1 = vmul.f32 %v6821_v5, %v1874_v45  ;;  %v1204_v27 = vadd.f32 %v6791_v11, %v6825_v7 }
 0x1ad   : > { %v6119_v49 = vpop.eup %6118  ;;  %v6845_v52 = vpop.f32.mrb[14].mxu0  ;;  %2112 = vadd.xlane.f32.xlu0 %v1984_v44  ;;  %v2051_v59 = vmul.f32 %v6821_v5, %v1877_v40  ;;  %v1811_v8 = vadd.f32 0.5, %v1683_v62  ;;  %v1434_v30 = vmul.f32 0.5, %v948_v2  ;;  %v1435_v31 = vmul.f32 0.5, %v951_v9 }
 0x1ae   : > { %v6847_v53 = vpop.f32.mrb[14].mxu1  ;;  %v6851_v57 = vpop.f32.mrb[15].mxu0  ;;  %v1688_v3 = vmul.f32 0.5, %v6119_v49  ;;  %v2049_v14 = vmul.f32 %v6821_v5, %v1875_v61  ;;  %v1817_v15 = vadd.f32 0.5, %v1689_v63  ;;  %6136 = vtanh.f32 %v1501_v12 }
 0x1af   : > { %v6853_v58 = vpop.f32.mrb[15].mxu1  ;;  %v6121_v0 = vpop.eup %6120  ;;  %v1985_v23 = vmul.f32 %v6817_v60, %v1811_v8  ;;  %v1207_v32 = vadd.f32 %v6791_v11, %v6829_v22  ;;  %6138 = vtanh.f32 %v1500_v13  ;;  %v1498_v45 = vmul.f32 0.5, %v1204_v27 }
 0x1b0   : > { %v6123_v4 = vpop.eup %6122  ;;  %2246 = vadd.xlane.f32.xlu1 %v2051_v59  ;;  %v1753_v16 = vmul.f32 0.5, %v6121_v0  ;;  %v1816_v24 = vadd.f32 0.5, %v1688_v3  ;;  %v1991_v7 = vmul.f32 %v6817_v60, %v1817_v15  ;;  %v972_v22 = vadd.f32 %v6836_v41, %v6791_v11 }
 0x1b1   : > { %2240 = vadd.xlane.f32.xlu0 %v2048_v1  ;;  %v6125_v20 = vpop.eup %6124  ;;  %v1752_v25 = vmul.f32 0.5, %v6123_v4  ;;  %6140 = vtanh.f32 %v1435_v31  ;;  %v1499_v46 = vmul.f32 0.5, %v1207_v32  ;;  %v975_v49 = vadd.f32 %v6845_v52, %v6791_v11 }
 0x1b2   : > { %v6861_v17 = vpop.f32.mrb[16].mxu0  ;;  %v6863_v18 = vpop.f32.mrb[16].mxu1  ;;  %v1881_v37 = vadd.f32 0.5, %v1753_v16  ;;  %v1687_v38 = vmul.f32 0.5, %v6125_v20  ;;  %v1990_v40 = vmul.f32 %v6817_v60, %v1816_v24  ;;  %6142 = vtanh.f32 %v1434_v30 }
 0x1b3   : > { %v6866_v6 = vpop.f32.mrb[17].mxu0  ;;  %v6868_v26 = vpop.f32.mrb[17].mxu1  ;;  %v1880_v43 = vadd.f32 0.5, %v1752_v25  ;;  %6144 = vtanh.f32 %v1498_v45  ;;  %v1440_v52 = vmul.f32 0.5, %v972_v22  ;;  %v1441_v2 = vmul.f32 0.5, %v975_v49 }
 0x1b4   : > { %v6127_v21 = vpop.eup %6126  ;;  %2242 = vadd.xlane.f32.xlu1 %v2049_v14  ;;  %v6872_v28 = vpop.f32.mrb[18].mxu0  ;;  %v2055_v54 = vmul.f32 %v6821_v5, %v1881_v37  ;;  %v1815_v55 = vadd.f32 0.5, %v1687_v38  ;;  %6146 = vtanh.f32 %v1499_v46  ;;  %v1231_v9 = vadd.f32 %v6847_v53, %v6791_v11 }
 0x1b5   : > { %v6874_v29 = vpop.f32.mrb[18].mxu1  ;;  %2114 = vadd.xlane.f32.xlu0 %v1985_v23  ;;  %v6878_v34 = vpop.f32.mrb[19].mxu0  ;;  %v1686_v44 = vmul.f32 0.5, %v6127_v21  ;;  %v2054_v63 = vmul.f32 %v6821_v5, %v1880_v43  ;;  %v1228_v15 = vadd.f32 %v6838_v42, %v6791_v11  ;;  %6148 = vtanh.f32 %v1440_v52 }
 0x1b6   : > { %v6880_v35 = vpop.f32.mrb[19].mxu1  ;;  %v6129_v36 = vpop.eup %6128  ;;  %v1989_v14 = vmul.f32 %v6817_v60, %v1815_v55  ;;  %v964_v53 = vadd.f32 %v6791_v11, %v6841_v47  ;;  %6150 = vtanh.f32 %v1441_v2  ;;  %v967_v30 = vadd.f32 %v6791_v11, %v6851_v57 }
 0x1b7   : > { %v6131_v39 = vpop.eup %6130  ;;  %v1814_v41 = vadd.f32 0.5, %v1686_v44  ;;  %v1750_v0 = vmul.f32 0.5, %v6129_v36  ;;  %v1505_v31 = vmul.f32 0.5, %v1231_v9  ;;  %v1504_v42 = vmul.f32 0.5, %v1228_v15 }
 0x1b8   : > { %2126 = vadd.xlane.f32.xlu1 %v1991_v7  ;;  %v6133_v50 = vpop.eup %6132  ;;  %v1751_v56 = vmul.f32 0.5, %v6131_v39  ;;  %v1220_v22 = vadd.f32 %v6791_v11, %v6843_v48  ;;  %v1223_v55 = vadd.f32 %v6791_v11, %v6853_v58  ;;  %v988_v58 = vadd.f32 %v6861_v17, %v6791_v11 }
 0x1b9   : > { %2124 = vadd.xlane.f32.xlu0 %v1990_v40  ;;  %v6135_v62 = vpop.eup %6134  ;;  %v1988_v24 = vmul.f32 %v6817_v60, %v1814_v41  ;;  %v1878_v25 = vadd.f32 0.5, %v1750_v0  ;;  %v1692_v21 = vmul.f32 0.5, %v6133_v50  ;;  %v1438_v50 = vmul.f32 0.5, %v964_v53 }
 0x1ba   : > { %v6889_v59 = vpop.f32.mrb[20].mxu0  ;;  %v6891_v61 = vpop.f32.mrb[20].mxu1  ;;  %v1879_v16 = vadd.f32 0.5, %v1751_v56  ;;  %v1693_v20 = vmul.f32 0.5, %v6135_v62  ;;  %6152 = vtanh.f32 %v1505_v31  ;;  %v1502_v15 = vmul.f32 0.5, %v1220_v22 }
 0x1bb   : > { %v6894_v1 = vpop.f32.mrb[21].mxu0  ;;  %v6896_v3 = vpop.f32.mrb[21].mxu1  ;;  %v2052_v40 = vmul.f32 %v6821_v5, %v1878_v25  ;;  %v1820_v43 = vadd.f32 0.5, %v1692_v21  ;;  %6154 = vtanh.f32 %v1504_v42 }
 0x1bc   : > { %2254 = vadd.xlane.f32.xlu1 %v2055_v54  ;;  %v6898_v4 = vpop.f32.mrb[22].mxu0  ;;  %v6900_v8 = vpop.f32.mrb[22].mxu1  ;;  %v2053_v32 = vmul.f32 %v6821_v5, %v1879_v16  ;;  %v1821_v36 = vadd.f32 0.5, %v1693_v20  ;;  %v1439_v54 = vmul.f32 0.5, %v967_v30  ;;  %v1503_v16 = vmul.f32 0.5, %v1223_v55 }
 0x1bd   : > { %2252 = vadd.xlane.f32.xlu0 %v2054_v63  ;;  %v6904_v12 = vpop.f32.mrb[23].mxu0  ;;  %v6906_v13 = vpop.f32.mrb[23].mxu1  ;;  %v1994_v2 = vmul.f32 %v6817_v60, %v1820_v43  ;;  %v991_v20 = vadd.f32 %v6872_v28, %v6791_v11  ;;  %v1444_v28 = vmul.f32 0.5, %v988_v58  ;;  %v1247_v43 = vadd.f32 %v6874_v29, %v6791_v11 }
 0x1be   : > { %v6137_v23 = vpop.eup %6136  ;;  %v1995_v48 = vmul.f32 %v6817_v60, %v1821_v36  ;;  %6156 = vtanh.f32 %v1439_v54  ;;  %v980_v29 = vadd.f32 %v6791_v11, %v6866_v6 }
 0x1bf   : > { %v6139_v27 = vpop.eup %6138  ;;  %v1757_v7 = vmul.f32 0.5, %v6137_v23  ;;  %6158 = vtanh.f32 %v1438_v50  ;;  %v1244_v50 = vadd.f32 %v6863_v18, %v6791_v11 }
 0x1c0   : > { %2122 = vadd.xlane.f32.xlu1 %v1989_v14  ;;  %v6141_v39 = vpop.eup %6140  ;;  %v1756_v47 = vmul.f32 0.5, %v6139_v27  ;;  %6160 = vtanh.f32 %v1502_v15 }
 0x1c1   : > { %2120 = vadd.xlane.f32.xlu0 %v1988_v24  ;;  %v6143_v57 = vpop.eup %6142  ;;  %v1885_v41 = vadd.f32 0.5, %v1757_v7  ;;  %v1691_v0 = vmul.f32 0.5, %v6141_v39  ;;  %6162 = vtanh.f32 %v1503_v16  ;;  %v1508_v18 = vmul.f32 0.5, %v1244_v50 }
 0x1c2   : > { %v6917_v37 = vpop.f32.mrb[24].mxu0  ;;  %v6919_v38 = vpop.f32.mrb[24].mxu1  ;;  %v1884_v9 = vadd.f32 0.5, %v1756_v47  ;;  %v1690_v14 = vmul.f32 0.5, %v6143_v57  ;;  %6164 = vtanh.f32 %v1444_v28  ;;  %v1442_v28 = vmul.f32 0.5, %v980_v29 }
 0x1c3   : > { %v6922_v44 = vpop.f32.mrb[25].mxu0  ;;  %v6924_v45 = vpop.f32.mrb[25].mxu1  ;;  %v2059_v24 = vmul.f32 %v6821_v5, %v1885_v41  ;;  %v1819_v25 = vadd.f32 0.5, %v1691_v0 }
 0x1c4   : > { %2250 = vadd.xlane.f32.xlu1 %v2053_v32  ;;  %v6928_v46 = vpop.f32.mrb[26].mxu0  ;;  %v6930_v49 = vpop.f32.mrb[26].mxu1  ;;  %v2058_v31 = vmul.f32 %v6821_v5, %v1884_v9  ;;  %v1818_v17 = vadd.f32 0.5, %v1690_v14  ;;  %v1509_v9 = vmul.f32 0.5, %v1247_v43  ;;  %v1239_v43 = vadd.f32 %v6791_v11, %v6880_v35 }
 0x1c5   : > { %2248 = vadd.xlane.f32.xlu0 %v2052_v40  ;;  %v6934_v56 = vpop.f32.mrb[27].mxu0  ;;  %v6936_v62 = vpop.f32.mrb[27].mxu1  ;;  %v1445_v40 = vmul.f32 0.5, %v991_v20  ;;  %v1993_v22 = vmul.f32 %v6817_v60, %v1819_v25  ;;  %v1004_v35 = vadd.f32 %v6889_v59, %v6791_v11 }
 0x1c6   : > { %v6145_v63 = vpop.eup %6144 }
 0x1c7   : > { %v6147_v52 = vpop.eup %6146  ;;  %v1754_v42 = vmul.f32 0.5, %v6145_v63  ;;  %6166 = vtanh.f32 %v1445_v40 }
 0x1c8   : > { %2134 = vadd.xlane.f32.xlu1 %v1995_v48  ;;  %v6149_v23 = vpop.eup %6148  ;;  %v1755_v21 = vmul.f32 0.5, %v6147_v52  ;;  %v1992_v48 = vmul.f32 %v6817_v60, %v1818_v17  ;;  %6168 = vtanh.f32 %v1509_v9  ;;  %v1007_v9 = vadd.f32 %v6898_v4, %v6791_v11 }
 0x1c9   : > { %2132 = vadd.xlane.f32.xlu0 %v1994_v2  ;;  %v6151_v30 = vpop.eup %6150  ;;  %v1882_v41 = vadd.f32 0.5, %v1754_v42  ;;  %v1696_v0 = vmul.f32 0.5, %v6149_v23  ;;  %v983_v2 = vadd.f32 %v6791_v11, %v6878_v34  ;;  %6170 = vtanh.f32 %v1508_v18 }
 0x1ca   : > { %v6945_v27 = vpop.f32.mrb[28].mxu0  ;;  %v6947_v53 = vpop.f32.mrb[28].mxu1  ;;  %v1883_v54 = vadd.f32 0.5, %v1755_v21  ;;  %v1697_v55 = vmul.f32 0.5, %v6151_v30  ;;  %v1448_v4 = vmul.f32 0.5, %v1004_v35 }
 0x1cb   : > { %v6950_v32 = vpop.f32.mrb[29].mxu0  ;;  %v6952_v36 = vpop.f32.mrb[29].mxu1  ;;  %v1824_v25 = vadd.f32 0.5, %v1696_v0  ;;  %v1443_v40 = vmul.f32 0.5, %v983_v2  ;;  %v1507_v2 = vmul.f32 0.5, %v1239_v43 }
 0x1cc   : > { %2262 = vadd.xlane.f32.xlu1 %v2059_v24  ;;  %v6954_v7 = vpop.f32.mrb[30].mxu0  ;;  %v6956_v39 = vpop.f32.mrb[30].mxu1  ;;  %v2057_v14 = vmul.f32 %v6821_v5, %v1883_v54  ;;  %v1825_v15 = vadd.f32 0.5, %v1697_v55  ;;  %v2056_v24 = vmul.f32 %v6821_v5, %v1882_v41 }
 0x1cd   : > { %2260 = vadd.xlane.f32.xlu0 %v2058_v31  ;;  %v6960_v47 = vpop.f32.mrb[31].mxu0  ;;  %v6962_v57 = vpop.f32.mrb[31].mxu1  ;;  %v1236_v31 = vadd.f32 %v6791_v11, %v6868_v26  ;;  %v1998_v41 = vmul.f32 %v6817_v60, %v1824_v25  ;;  %6172 = vtanh.f32 %v1443_v40 }
 0x1ce   : > { %v6153_v63 = vpop.eup %6152  ;;  %v1999_v26 = vmul.f32 %v6817_v60, %v1825_v15  ;;  %6174 = vtanh.f32 %v1442_v28 }
 0x1cf   : > { %v6155_v52 = vpop.eup %6154  ;;  %v1761_v58 = vmul.f32 0.5, %v6153_v63  ;;  %v1506_v29 = vmul.f32 0.5, %v1236_v31 }
 0x1d0   : > { %2130 = vadd.xlane.f32.xlu1 %v1993_v22  ;;  %v6157_v23 = vpop.eup %6156  ;;  %v1760_v6 = vmul.f32 0.5, %v6155_v52 }
 0x1d1   : > { %2128 = vadd.xlane.f32.xlu0 %v1992_v48  ;;  %v6159_v34 = vpop.eup %6158  ;;  %v1889_v55 = vadd.f32 0.5, %v1761_v58  ;;  %v1695_v63 = vmul.f32 0.5, %v6157_v23  ;;  %6176 = vtanh.f32 %v1506_v29 }
 0x1d2   : > { %v6973_v16 = vpop.f32.mrb[32].mxu0  ;;  %v6975_v20 = vpop.f32.mrb[32].mxu1  ;;  %v1888_v0 = vadd.f32 0.5, %v1760_v6  ;;  %v1694_v52 = vmul.f32 0.5, %v6159_v34  ;;  %6178 = vtanh.f32 %v1507_v2 }
 0x1d3   : > { %v6978_v21 = vpop.f32.mrb[33].mxu0  ;;  %v6980_v30 = vpop.f32.mrb[33].mxu1  ;;  %v1823_v15 = vadd.f32 0.5, %v1695_v63  ;;  %6180 = vtanh.f32 %v1448_v4 }
 0x1d4   : > { %2258 = vadd.xlane.f32.xlu1 %v2057_v14  ;;  %v6984_v17 = vpop.f32.mrb[34].mxu0  ;;  %v6986_v42 = vpop.f32.mrb[34].mxu1  ;;  %v2063_v14 = vmul.f32 %v6821_v5, %v1889_v55  ;;  %v2062_v6 = vmul.f32 %v6821_v5, %v1888_v0  ;;  %v1822_v59 = vadd.f32 0.5, %v1694_v52  ;;  %v1263_v55 = vadd.f32 %v6900_v8, %v6791_v11 }
 0x1d5   : > { %2256 = vadd.xlane.f32.xlu0 %v2056_v24  ;;  %v6990_v22 = vpop.f32.mrb[35].mxu0  ;;  %v6992_v50 = vpop.f32.mrb[35].mxu1  ;;  %v996_v8 = vadd.f32 %v6791_v11, %v6894_v1 }
 0x1d6   : > { %v6161_v54 = vpop.eup %6160  ;;  %v1996_v35 = vmul.f32 %v6817_v60, %v1822_v59 }
 0x1d7   : > { %v6163_v48 = vpop.eup %6162  ;;  %v1758_v34 = vmul.f32 0.5, %v6161_v54 }
 0x1d8   : > { %2142 = vadd.xlane.f32.xlu1 %v1999_v26  ;;  %v6165_v18 = vpop.eup %6164  ;;  %v1759_v58 = vmul.f32 0.5, %v6163_v48  ;;  %v1449_v26 = vmul.f32 0.5, %v1007_v9  ;;  %v1997_v48 = vmul.f32 %v6817_v60, %v1823_v15  ;;  %v999_v15 = vadd.f32 %v6791_v11, %v6904_v12 }
 0x1d9   : > { %2140 = vadd.xlane.f32.xlu0 %v1998_v41  ;;  %v6167_v25 = vpop.eup %6166  ;;  %v1260_v41 = vadd.f32 %v6891_v61, %v6791_v11  ;;  %v1886_v2 = vadd.f32 0.5, %v1758_v34 }
 0x1da   : > { %v7001_v23 = vpop.f32.mrb[36].mxu0  ;;  %v7003_v24 = vpop.f32.mrb[36].mxu1  ;;  %v1887_v0 = vadd.f32 0.5, %v1759_v58  ;;  %v1701_v52 = vmul.f32 0.5, %v6167_v25  ;;  %6182 = vtanh.f32 %v1449_v26 }
 0x1db   : > { %v7006_v31 = vpop.f32.mrb[37].mxu0  ;;  %v7008_v40 = vpop.f32.mrb[37].mxu1  ;;  %v1512_v61 = vmul.f32 0.5, %v1260_v41  ;;  %v2060_v4 = vmul.f32 %v6821_v5, %v1886_v2 }
 0x1dc   : > { %2270 = vadd.xlane.f32.xlu1 %v2063_v14  ;;  %v7010_v28 = vpop.f32.mrb[38].mxu0  ;;  %v7012_v43 = vpop.f32.mrb[38].mxu1  ;;  %v1700_v14 = vmul.f32 0.5, %v6165_v18  ;;  %v2061_v58 = vmul.f32 %v6821_v5, %v1887_v0  ;;  %v1829_v25 = vadd.f32 0.5, %v1701_v52  ;;  %v1446_v52 = vmul.f32 0.5, %v996_v8 }
 0x1dd   : > { %2268 = vadd.xlane.f32.xlu0 %v2062_v6  ;;  %v7016_v63 = vpop.f32.mrb[39].mxu0  ;;  %v7018_v54 = vpop.f32.mrb[39].mxu1  ;;  %v1513_v6 = vmul.f32 0.5, %v1263_v55  ;;  %v1252_v55 = vadd.f32 %v6791_v11, %v6896_v3 }
 0x1de   : > { %v6169_v29 = vpop.eup %6168  ;;  %v2003_v3 = vmul.f32 %v6817_v60, %v1829_v25 }
 0x1df   : > { %v6171_v9 = vpop.eup %6170  ;;  %v1765_v10 = vmul.f32 0.5, %v6169_v29  ;;  %v1447_v29 = vmul.f32 0.5, %v999_v15  ;;  %6184 = vtanh.f32 %v1513_v6  ;;  %v1510_v6 = vmul.f32 0.5, %v1252_v55 }
 0x1e0   : > { %2138 = vadd.xlane.f32.xlu1 %v1997_v48  ;;  %v6173_v34 = vpop.eup %6172  ;;  %v1828_v48 = vadd.f32 0.5, %v1700_v14  ;;  %v1764_v1 = vmul.f32 0.5, %v6171_v9  ;;  %6186 = vtanh.f32 %v1512_v61  ;;  %v1023_v61 = vadd.f32 %v6928_v46, %v6791_v11 }
 0x1e1   : > { %2136 = vadd.xlane.f32.xlu0 %v1996_v35  ;;  %v6175_v12 = vpop.eup %6174  ;;  %v1255_v35 = vadd.f32 %v6791_v11, %v6906_v13  ;;  %v1020_v13 = vadd.f32 %v6917_v37, %v6791_v11  ;;  %6188 = vtanh.f32 %v1447_v29 }
 0x1e2   : > { %v7029_v59 = vpop.f32.mrb[40].mxu0  ;;  %v7031_v18 = vpop.f32.mrb[40].mxu1  ;;  %v1892_v8 = vadd.f32 0.5, %v1764_v1  ;;  %v1698_v15 = vmul.f32 0.5, %v6175_v12  ;;  %6190 = vtanh.f32 %v1446_v52 }
 0x1e3   : > { %8814 = vst [vmem:[#allocation17_spill] sm:$0xff] %v7031_v18  ;;  %v7034_v26 = vpop.f32.mrb[41].mxu0  ;;  %v7036_v19 = vpop.f32.mrb[41].mxu1  ;;  %v2002_v18 = vmul.f32 %v6817_v60, %v1828_v48  ;;  %6192 = vtanh.f32 %v1510_v6  ;;  %v1452_v46 = vmul.f32 0.5, %v1020_v13 }
 0x1e4   : > { %8815 = vst [vmem:[#allocation18_spill] sm:$0xff] %v7034_v26  ;;  %8816 = vst [vmem:[#allocation19_spill] sm:$0xff] %v7036_v19  ;;  %2266 = vadd.xlane.f32.xlu1 %v2061_v58  ;;  %v7040_v41 = vpop.f32.mrb[42].mxu0  ;;  %v7042_v0 = vpop.f32.mrb[42].mxu1  ;;  %v1893_v58 = vadd.f32 0.5, %v1765_v10  ;;  %v1699_v19 = vmul.f32 0.5, %v6173_v34  ;;  %v2066_v55 = vmul.f32 %v6821_v5, %v1892_v8 }
 0x1e5   : > { %2264 = vadd.xlane.f32.xlu0 %v2060_v4  ;;  %v7046_v2 = vpop.f32.mrb[43].mxu0  ;;  %v7048_v14 = vpop.f32.mrb[43].mxu1  ;;  %v1511_v4 = vmul.f32 0.5, %v1255_v35  ;;  %v1826_v37 = vadd.f32 0.5, %v1698_v15  ;;  %v1276_v15 = vadd.f32 %v6919_v38, %v6791_v11 }
 0x1e6   : > { %8817 = vst [vmem:[#allocation20_spill] sm:$0xff] %v7048_v14  ;;  %v6177_v9 = vpop.eup %6176  ;;  %v2067_v10 = vmul.f32 %v6821_v5, %v1893_v58  ;;  %v1827_v25 = vadd.f32 0.5, %v1699_v19 }
 0x1e7   : > { %v6179_v26 = vpop.eup %6178  ;;  %v1762_v29 = vmul.f32 0.5, %v6177_v9  ;;  %6194 = vtanh.f32 %v1511_v4  ;;  %v1516_v38 = vmul.f32 0.5, %v1276_v15 }
 0x1e8   : > { %2150 = vadd.xlane.f32.xlu1 %v2003_v3  ;;  %v6181_v14 = vpop.eup %6180  ;;  %v1763_v34 = vmul.f32 0.5, %v6179_v26  ;;  %v1453_v26 = vmul.f32 0.5, %v1023_v61  ;;  %v1279_v3 = vadd.f32 %v6930_v49, %v6791_v11  ;;  %v2001_v8 = vmul.f32 %v6817_v60, %v1827_v25 }
 0x1e9   : > { %2148 = vadd.xlane.f32.xlu0 %v2002_v18  ;;  %v6183_v12 = vpop.eup %6182  ;;  %v1890_v4 = vadd.f32 0.5, %v1762_v29  ;;  %6196 = vtanh.f32 %v1452_v46  ;;  %v1012_v49 = vadd.f32 %v6791_v11, %v6922_v44  ;;  %v1015_v25 = vadd.f32 %v6791_v11, %v6934_v56 }
 0x1ea   : > { %v7057_v48 = vpop.f32.mrb[44].mxu0  ;;  %v7059_v1 = vpop.f32.mrb[44].mxu1  ;;  %v1891_v6 = vadd.f32 0.5, %v1763_v34  ;;  %v1705_v13 = vmul.f32 0.5, %v6183_v12  ;;  %6198 = vtanh.f32 %v1453_v26 }
 0x1eb   : > { %v7062_v35 = vpop.f32.mrb[45].mxu0  ;;  %v7064_v18 = vpop.f32.mrb[45].mxu1  ;;  %v2064_v46 = vmul.f32 %v6821_v5, %v1890_v4 }
 0x1ec   : > { %8818 = vst [vmem:[#allocation21_spill] sm:$0xff] %v7062_v35  ;;  %8819 = vst [vmem:[#allocation22_spill] sm:$0xff] %v7064_v18  ;;  %2278 = vadd.xlane.f32.xlu1 %v2067_v10  ;;  %v7066_v52 = vpop.f32.mrb[46].mxu0  ;;  %v7068_v19 = vpop.f32.mrb[46].mxu1  ;;  %v2000_v18 = vmul.f32 %v6817_v60, %v1826_v37  ;;  %v2065_v34 = vmul.f32 %v6821_v5, %v1891_v6  ;;  %v1833_v12 = vadd.f32 0.5, %v1705_v13  ;;  %v1450_v6 = vmul.f32 0.5, %v1012_v49 }
 0x1ed   : > { %2276 = vadd.xlane.f32.xlu0 %v2066_v55  ;;  %v7072_v58 = vpop.f32.mrb[47].mxu0  ;;  %v7074_v9 = vpop.f32.mrb[47].mxu1  ;;  %v1704_v55 = vmul.f32 0.5, %v6181_v14  ;;  %v1451_v13 = vmul.f32 0.5, %v1015_v25 }
 0x1ee   : > { %8820 = vst [vmem:[#allocation23_spill] sm:$0xff] %v7072_v58  ;;  %8821 = vst [vmem:[#allocation24_spill] sm:$0xff] %v7074_v9  ;;  %v6185_v10 = vpop.eup %6184  ;;  %v1517_v9 = vmul.f32 0.5, %v1279_v3 }
 0x1ef   : > { %v6187_v61 = vpop.eup %6186  ;;  %v1769_v58 = vmul.f32 0.5, %v6185_v10  ;;  %v1271_v10 = vadd.f32 %v6791_v11, %v6936_v62  ;;  %v1036_v62 = vadd.f32 %v6945_v27, %v6791_v11 }
 0x1f0   : > { %2146 = vadd.xlane.f32.xlu1 %v2001_v8  ;;  %v6189_v29 = vpop.eup %6188  ;;  %v1832_v8 = vadd.f32 0.5, %v1704_v55  ;;  %v1768_v44 = vmul.f32 0.5, %v6187_v61  ;;  %6200 = vtanh.f32 %v1517_v9 }
 0x1f1   : > { %2144 = vadd.xlane.f32.xlu0 %v2000_v18  ;;  %v6191_v56 = vpop.eup %6190  ;;  %v1268_v18 = vadd.f32 %v6791_v11, %v6924_v45  ;;  %6202 = vtanh.f32 %v1516_v38  ;;  %v2007_v45 = vmul.f32 %v6817_v60, %v1833_v12  ;;  %v1039_v38 = vadd.f32 %v6954_v7, %v6791_v11 }
 0x1f2   : > { %v7085_v37 = vpop.f32.mrb[48].mxu0  ;;  %v7087_v14 = vpop.f32.mrb[48].mxu1  ;;  %v1896_v49 = vadd.f32 0.5, %v1768_v44  ;;  %v1702_v25 = vmul.f32 0.5, %v6191_v56  ;;  %6204 = vtanh.f32 %v1451_v13  ;;  %v1456_v11 = vmul.f32 0.5, %v1036_v62 }
 0x1f3   : > { %8822 = vst [vmem:[#allocation25_spill] sm:$0xff] %v7087_v14  ;;  %v7090_v26 = vpop.f32.mrb[49].mxu0  ;;  %v7092_v35 = vpop.f32.mrb[49].mxu1  ;;  %v2006_v14 = vmul.f32 %v6817_v60, %v1832_v8  ;;  %v1514_v9 = vmul.f32 0.5, %v1268_v18  ;;  %6206 = vtanh.f32 %v1450_v6  ;;  %v7129_v6 = vld [vmem:[%s8757_s3] ss:$0 sm:$0xff] }
 0x1f4   : > { %8823 = vst [vmem:[#allocation26_spill] sm:$0xff] %v7090_v26  ;;  %8824 = vst [vmem:[#allocation27_spill] sm:$0xff] %v7092_v35  ;;  %2274 = vadd.xlane.f32.xlu1 %v2065_v34  ;;  %v7096_v3 = vpop.f32.mrb[50].mxu0  ;;  %v7098_v15 = vpop.f32.mrb[50].mxu1  ;;  %v1897_v34 = vadd.f32 0.5, %v1769_v58  ;;  %v1703_v35 = vmul.f32 0.5, %v6189_v29  ;;  %v2070_v18 = vmul.f32 %v6821_v5, %v1896_v49 }
 0x1f5   : > { %2272 = vadd.xlane.f32.xlu0 %v2064_v46  ;;  %v7102_v4 = vpop.f32.mrb[51].mxu0  ;;  %v7104_v55 = vpop.f32.mrb[51].mxu1  ;;  %v1515_v46 = vmul.f32 0.5, %v1271_v10  ;;  %v1830_v27 = vadd.f32 0.5, %v1702_v25  ;;  %6208 = vtanh.f32 %v1514_v9  ;;  %v1292_v25 = vadd.f32 %v7129_v6, %v6947_v53 }
 0x1f6   : > { %8825 = vst [vmem:[#allocation28_spill] sm:$0xff] %v7104_v55  ;;  %v6193_v61 = vpop.eup %6192  ;;  %v2071_v58 = vmul.f32 %v6821_v5, %v1897_v34  ;;  %v1831_v12 = vadd.f32 0.5, %v1703_v35 }
 0x1f7   : > { %v6195_v26 = vpop.eup %6194  ;;  %v1766_v13 = vmul.f32 0.5, %v6193_v61  ;;  %6210 = vtanh.f32 %v1515_v46  ;;  %v1295_v61 = vadd.f32 %v7129_v6, %v6956_v39  ;;  %v1028_v39 = vadd.f32 %v7129_v6, %v6950_v32 }
 0x1f8   : > { %2158 = vadd.xlane.f32.xlu1 %v2007_v45  ;;  %v6197_v55 = vpop.eup %6196  ;;  %v1767_v29 = vmul.f32 0.5, %v6195_v26  ;;  %v1457_v26 = vmul.f32 0.5, %v1039_v38  ;;  %v2005_v49 = vmul.f32 %v6817_v60, %v1831_v12  ;;  %v2004_v38 = vmul.f32 %v6817_v60, %v1830_v27 }
 0x1f9   : > { %2156 = vadd.xlane.f32.xlu0 %v2006_v14  ;;  %v6199_v56 = vpop.eup %6198  ;;  %6212 = vtanh.f32 %v1456_v11  ;;  %v1031_v12 = vadd.f32 %v7129_v6, %v6960_v47  ;;  %v1520_v53 = vmul.f32 0.5, %v1292_v25 }
 0x1fa   : > { %v7113_v8 = vpop.f32.mrb[52].mxu0  ;;  %v7115_v44 = vpop.f32.mrb[52].mxu1  ;;  %v1895_v9 = vadd.f32 0.5, %v1767_v29  ;;  %v1709_v62 = vmul.f32 0.5, %v6199_v56  ;;  %6214 = vtanh.f32 %v1457_v26 }
 0x1fb   : > { %v7118_v10 = vpop.f32.mrb[53].mxu0  ;;  %v7120_v14 = vpop.f32.mrb[53].mxu1 }
 0x1fc   : > { %8826 = vst [vmem:[#allocation29_spill] sm:$0xff] %v7118_v10  ;;  %8827 = vst [vmem:[#allocation30_spill] sm:$0xff] %v7120_v14  ;;  %2286 = vadd.xlane.f32.xlu1 %v2071_v58  ;;  %v7122_v7 = vpop.f32.mrb[54].mxu0  ;;  %v7124_v35 = vpop.f32.mrb[54].mxu1  ;;  %v1894_v58 = vadd.f32 0.5, %v1766_v13  ;;  %v2069_v29 = vmul.f32 %v6821_v5, %v1895_v9  ;;  %v1837_v56 = vadd.f32 0.5, %v1709_v62 }
 0x1fd   : > { %2284 = vadd.xlane.f32.xlu0 %v2070_v18  ;;  %v7133_v45 = vpop.f32.mrb[55].mxu0  ;;  %v7135_v34 = vpop.f32.mrb[55].mxu1  ;;  %v1708_v18 = vmul.f32 0.5, %v6197_v55  ;;  %v1454_v62 = vmul.f32 0.5, %v1028_v39 }
 0x1fe   : > { %8828 = vst [vmem:[#allocation31_spill] sm:$0xff] %v7133_v45  ;;  %8829 = vst [vmem:[#allocation32_spill] sm:$0xff] %v7135_v34  ;;  %v6201_v46 = vpop.eup %6200  ;;  %v1521_v34 = vmul.f32 0.5, %v1295_v61  ;;  %v2068_v11 = vmul.f32 %v6821_v5, %v1894_v58  ;;  %v1284_v61 = vadd.f32 %v7129_v6, %v6952_v36  ;;  %v2011_v36 = vmul.f32 %v6817_v60, %v1837_v56 }
 0x1ff   : > { %v6203_v14 = vpop.eup %6202  ;;  %v1773_v10 = vmul.f32 0.5, %v6201_v46  ;;  %v1455_v46 = vmul.f32 0.5, %v1031_v12 }
 0x200   : > { %2154 = vadd.xlane.f32.xlu1 %v2005_v49  ;;  %v6205_v13 = vpop.eup %6204  ;;  %v1836_v49 = vadd.f32 0.5, %v1708_v18  ;;  %v1772_v32 = vmul.f32 0.5, %v6203_v14  ;;  %6216 = vtanh.f32 %v1521_v34  ;;  %v1518_v34 = vmul.f32 0.5, %v1284_v61 }
 0x201   : > { %2152 = vadd.xlane.f32.xlu0 %v2004_v38  ;;  %v6207_v47 = vpop.eup %6206  ;;  %v1287_v38 = vadd.f32 %v7129_v6, %v6962_v57  ;;  %6218 = vtanh.f32 %v1520_v53  ;;  %v1052_v57 = vadd.f32 %v7129_v6, %v6973_v16  ;;  %v1055_v53 = vadd.f32 %v7129_v6, %v6984_v17 }
 0x202   : > { %v7146_v27 = vpop.f32.mrb[56].mxu0  ;;  %v7148_v55 = vpop.f32.mrb[56].mxu1  ;;  %v1900_v39 = vadd.f32 0.5, %v1772_v32  ;;  %v1706_v12 = vmul.f32 0.5, %v6207_v47  ;;  %6220 = vtanh.f32 %v1455_v46 }
 0x203   : > { %8830 = vst [vmem:[#allocation33_spill] sm:$0xff] %v7148_v55  ;;  %v7151_v26 = vpop.f32.mrb[57].mxu0  ;;  %v7153_v45 = vpop.f32.mrb[57].mxu1  ;;  %v2010_v55 = vmul.f32 %v6817_v60, %v1836_v49  ;;  %6222 = vtanh.f32 %v1454_v62  ;;  %v1460_v17 = vmul.f32 0.5, %v1052_v57 }
 0x204   : > { %8831 = vst [vmem:[#allocation34_spill] sm:$0xff] %v7151_v26  ;;  %8832 = vst [vmem:[#allocation35_spill] sm:$0xff] %v7153_v45  ;;  %2282 = vadd.xlane.f32.xlu1 %v2069_v29  ;;  %v7157_v25 = vpop.f32.mrb[58].mxu0  ;;  %v7159_v9 = vpop.f32.mrb[58].mxu1  ;;  %v1901_v29 = vadd.f32 0.5, %v1773_v10  ;;  %v1707_v45 = vmul.f32 0.5, %v6205_v13  ;;  %v2074_v61 = vmul.f32 %v6821_v5, %v1900_v39  ;;  %6224 = vtanh.f32 %v1518_v34 }
 0x205   : > { %2280 = vadd.xlane.f32.xlu0 %v2068_v11  ;;  %v7163_v14 = vpop.f32.mrb[59].mxu0  ;;  %v7165_v58 = vpop.f32.mrb[59].mxu1  ;;  %v1519_v11 = vmul.f32 0.5, %v1287_v38  ;;  %v1834_v16 = vadd.f32 0.5, %v1706_v12  ;;  %v1308_v12 = vadd.f32 %v7129_v6, %v6975_v20 }
 0x206   : > { %8833 = vst [vmem:[#allocation36_spill] sm:$0xff] %v7165_v58  ;;  %v6209_v18 = vpop.eup %6208  ;;  %v2075_v10 = vmul.f32 %v6821_v5, %v1901_v29  ;;  %v1835_v56 = vadd.f32 0.5, %v1707_v45  ;;  %v1311_v45 = vadd.f32 %v7129_v6, %v6986_v42 }
 0x207   : > { %v6211_v26 = vpop.eup %6210  ;;  %v1770_v46 = vmul.f32 0.5, %v6209_v18  ;;  %6226 = vtanh.f32 %v1519_v11  ;;  %v2008_v42 = vmul.f32 %v6817_v60, %v1834_v16  ;;  %v1044_v11 = vadd.f32 %v7129_v6, %v6978_v21 }
 0x208   : > { %2166 = vadd.xlane.f32.xlu1 %v2011_v36  ;;  %v6213_v58 = vpop.eup %6212  ;;  %v1771_v13 = vmul.f32 0.5, %v6211_v26  ;;  %v1461_v36 = vmul.f32 0.5, %v1055_v53  ;;  %v2009_v39 = vmul.f32 %v6817_v60, %v1835_v56  ;;  %6228 = vtanh.f32 %v1460_v17 }
 0x209   : > { %2164 = vadd.xlane.f32.xlu0 %v2010_v55  ;;  %v6215_v47 = vpop.eup %6214  ;;  %v1525_v53 = vmul.f32 0.5, %v1311_v45  ;;  %v1047_v56 = vadd.f32 %v7129_v6, %v6990_v22  ;;  %v1524_v20 = vmul.f32 0.5, %v1308_v12  ;;  %v1300_v21 = vadd.f32 %v7129_v6, %v6980_v30 }
 0x20a   : > { %v7174_v49 = vpop.f32.mrb[60].mxu0  ;;  %v7176_v32 = vpop.f32.mrb[60].mxu1  ;;  %v1899_v34 = vadd.f32 0.5, %v1771_v13  ;;  %v1713_v57 = vmul.f32 0.5, %v6215_v47  ;;  %6230 = vtanh.f32 %v1461_v36  ;;  %v1303_v22 = vadd.f32 %v7129_v6, %v6992_v50 }
 0x20b   : > { %8834 = vst [vmem:[#allocation37_spill] sm:$0xff] %v7176_v32  ;;  %v7179_v38 = vpop.f32.mrb[61].mxu0  ;;  %v7181_v55 = vpop.f32.mrb[61].mxu1  ;;  %6232 = vtanh.f32 %v1525_v53  ;;  %v1459_v45 = vmul.f32 0.5, %v1047_v56  ;;  %v1522_v30 = vmul.f32 0.5, %v1300_v21 }
 0x20c   : > { %8835 = vst [vmem:[#allocation38_spill] sm:$0xff] %v7179_v38  ;;  %8836 = vst [vmem:[#allocation39_spill] sm:$0xff] %v7181_v55  ;;  %2294 = vadd.xlane.f32.xlu1 %v2075_v10  ;;  %v7185_v26 = vpop.f32.mrb[62].mxu0  ;;  %v7187_v62 = vpop.f32.mrb[62].mxu1  ;;  %v1898_v55 = vadd.f32 0.5, %v1770_v46  ;;  %v1712_v38 = vmul.f32 0.5, %v6213_v58  ;;  %v2073_v13 = vmul.f32 %v6821_v5, %v1899_v34  ;;  %6234 = vtanh.f32 %v1524_v20 }
 0x20d   : > { %2292 = vadd.xlane.f32.xlu0 %v2074_v61  ;;  %v7189_v29 = vpop.f32.mrb[63].mxu0  ;;  %v7191_v18 = vpop.f32.mrb[63].mxu1  ;;  %v1841_v47 = vadd.f32 0.5, %v1713_v57  ;;  %v1523_v50 = vmul.f32 0.5, %v1303_v22 }
 0x20e   : > { %8837 = vst [vmem:[#allocation40_spill] sm:$0xff] %v7189_v29  ;;  %8838 = vst [vmem:[#allocation41_spill] sm:$0xff] %v7191_v18  ;;  %v6217_v10 = vpop.eup %6216  ;;  %v2072_v58 = vmul.f32 %v6821_v5, %v1898_v55  ;;  %v1840_v46 = vadd.f32 0.5, %v1712_v38  ;;  %v1458_v29 = vmul.f32 0.5, %v1044_v11 }
 0x20f   : > { %v6219_v32 = vpop.eup %6218  ;;  %v1777_v61 = vmul.f32 0.5, %v6217_v10  ;;  %v1068_v10 = vadd.f32 %v7129_v6, %v7001_v23 }
 0x210   : > { %2162 = vadd.xlane.f32.xlu1 %v2009_v39  ;;  %v6221_v16 = vpop.eup %6220  ;;  %v1776_v17 = vmul.f32 0.5, %v6219_v32  ;;  %v2015_v39 = vmul.f32 %v6817_v60, %v1841_v47  ;;  %v2014_v32 = vmul.f32 %v6817_v60, %v1840_v46  ;;  %6236 = vtanh.f32 %v1458_v29 }
 0x211   : > { %2160 = vadd.xlane.f32.xlu0 %v2008_v42  ;;  %v6223_v18 = vpop.eup %6222  ;;  %v1905_v12 = vadd.f32 0.5, %v1777_v61  ;;  %v1711_v55 = vmul.f32 0.5, %v6221_v16  ;;  %6238 = vtanh.f32 %v1459_v45  ;;  %v1071_v42 = vadd.f32 %v7129_v6, %v7010_v28 }
 0x212   : > { %v6225_v36 = vpop.eup %6224  ;;  %v1904_v34 = vadd.f32 0.5, %v1776_v17  ;;  %v1710_v57 = vmul.f32 0.5, %v6223_v18  ;;  %6240 = vtanh.f32 %v1522_v30  ;;  %v1464_v23 = vmul.f32 0.5, %v1068_v10 }
 0x213   : > { %v6227_v38 = vpop.eup %6226  ;;  %v2079_v53 = vmul.f32 %v6821_v5, %v1905_v12  ;;  %v1839_v56 = vadd.f32 0.5, %v1711_v55  ;;  %v1774_v16 = vmul.f32 0.5, %v6225_v36  ;;  %6242 = vtanh.f32 %v1523_v50 }
 0x214   : > { %2290 = vadd.xlane.f32.xlu1 %v2073_v13  ;;  %v6229_v11 = vpop.eup %6228  ;;  %v1775_v20 = vmul.f32 0.5, %v6227_v38  ;;  %v6357_v13 = vld.sshfl [vmem:[#allocation2] sm:$0x33 pattern:$0x75316420]  ;;  %v2078_v29 = vmul.f32 %v6821_v5, %v1904_v34  ;;  %v1838_v61 = vadd.f32 0.5, %v1710_v57  ;;  %v1327_v46 = vadd.f32 %v7129_v6, %v7012_v43 }
 0x215   : > { %2288 = vadd.xlane.f32.xlu0 %v2072_v58  ;;  %v1947_v47 = vcombine.high %v6357_v13, %v6357_v13  ;;  %v6231_v18 = vpop.eup %6230  ;;  %v1324_v58 = vadd.f32 %v7129_v6, %v7003_v24  ;;  %v1465_v28 = vmul.f32 0.5, %v1071_v42  ;;  %v2013_v21 = vmul.f32 %v6817_v60, %v1839_v56 }
 0x216   : > { %v6233_v17 = vpop.eup %6232  ;;  %v1903_v45 = vadd.f32 0.5, %v1775_v20  ;;  %v1717_v22 = vmul.f32 0.5, %v6231_v18  ;;  %v2012_v36 = vmul.f32 %v6817_v60, %v1838_v61  ;;  %v1902_v12 = vadd.f32 0.5, %v1774_v16 }
 0x217   : > { %v1716_v55 = vmul.f32 0.5, %v6229_v11  ;;  %v6235_v38 = vpop.eup %6234  ;;  %6244 = vtanh.f32 %v1464_v23  ;;  %v1060_v24 = vadd.f32 %v7129_v6, %v7006_v31  ;;  %v1063_v43 = vadd.f32 %v7129_v6, %v7016_v63 }
 0x218   : > { %2174 = vadd.xlane.f32.xlu1 %v2015_v39  ;;  %v1961_v39 = vrot.slane %v1947_v47, %v6804_v33  ;;  %6246 = vtanh.f32 %v1465_v28  ;;  %v1529_v34 = vmul.f32 0.5, %v1327_v46  ;;  %v1781_v57 = vmul.f32 0.5, %v6233_v17 }
 0x219   : > { %2172 = vadd.xlane.f32.xlu0 %v2014_v32  ;;  %v1528_v32 = vmul.f32 0.5, %v1324_v58  ;;  %v2077_v33 = vmul.f32 %v6821_v5, %v1903_v45  ;;  %v1845_v60 = vadd.f32 0.5, %v1717_v22  ;;  %v2076_v31 = vmul.f32 %v6821_v5, %v1902_v12 }
 0x21a   : > { %v6237_v30 = vpop.eup %6236  ;;  %v7228_v10 = vrot.slane %v1961_v39, %v6811_v51  ;;  %v1963_v50 = vcombine.high %v1961_v39, %v1961_v39  ;;  %v1844_v11 = vadd.f32 0.5, %v1716_v55  ;;  %v1316_v63 = vadd.f32 %v7129_v6, %v7008_v40 }
 0x21b   : > { %v6239_v42 = vpop.eup %6238  ;;  %6248 = vtanh.f32 %v1528_v32  ;;  %v1462_v56 = vmul.f32 0.5, %v1060_v24  ;;  %v1463_v20 = vmul.f32 0.5, %v1063_v43  ;;  %v1319_v13 = vadd.f32 %v7129_v6, %v7018_v54  ;;  %v8839_v43 = vld [vmem:[#allocation17_spill] sm:$0xff] }
 0x21c   : > { %2302 = vadd.xlane.f32.xlu1 %v2079_v53  ;;  %v1780_v53 = vmul.f32 0.5, %v6235_v38  ;;  %6250 = vtanh.f32 %v1529_v34  ;;  %v6241_v47 = vpop.eup %6240  ;;  %v2019_v18 = vmul.f32 %v7228_v10, %v1845_v60  ;;  %v7237_v5 = vrot.slane %v1963_v50, %v6811_v51 }
 0x21d   : > { %2300 = vadd.xlane.f32.xlu0 %v2078_v29  ;;  %v1909_v29 = vadd.f32 0.5, %v1781_v57  ;;  %v1715_v61 = vmul.f32 0.5, %v6239_v42  ;;  %v6243_v16 = vpop.eup %6242  ;;  %v2018_v23 = vmul.f32 %v7228_v10, %v1844_v11  ;;  %v1714_v58 = vmul.f32 0.5, %v6237_v30 }
 0x21e   : > { %v1908_v40 = vadd.f32 0.5, %v1780_v53  ;;  %v1526_v28 = vmul.f32 0.5, %v1316_v63  ;;  %v1084_v46 = vadd.f32 %v7129_v6, %v7029_v59  ;;  %6252 = vtanh.f32 %v1463_v20 }
 0x21f   : > { %v1527_v54 = vmul.f32 0.5, %v1319_v13  ;;  %v1087_v17 = vadd.f32 %v7129_v6, %v7040_v41  ;;  %6254 = vtanh.f32 %v1462_v56  ;;  %v2083_v51 = vmul.f32 %v7237_v5, %v1909_v29 }
 0x220   : > { %2170 = vadd.xlane.f32.xlu1 %v2013_v21  ;;  %v1843_v45 = vadd.f32 0.5, %v1715_v61  ;;  %v1779_v22 = vmul.f32 0.5, %v6243_v16  ;;  %v1842_v12 = vadd.f32 0.5, %v1714_v58  ;;  %v1778_v55 = vmul.f32 0.5, %v6241_v47 }
 0x221   : > { %2168 = vadd.xlane.f32.xlu0 %v2012_v36  ;;  %v6245_v21 = vpop.eup %6244  ;;  %v2082_v36 = vmul.f32 %v7237_v5, %v1908_v40  ;;  %6256 = vtanh.f32 %v1526_v28  ;;  %v1468_v59 = vmul.f32 0.5, %v1084_v46  ;;  %v1469_v38 = vmul.f32 0.5, %v1087_v17 }
 0x222   : > { %v6247_v39 = vpop.eup %6246  ;;  %6258 = vtanh.f32 %v1527_v54  ;;  %v1343_v41 = vadd.f32 %v7129_v6, %v7042_v0  ;;  %v2017_v32 = vmul.f32 %v7228_v10, %v1843_v45  ;;  %v1340_v34 = vadd.f32 %v7129_v6, %v8839_v43 }
 0x223   : > { %v1907_v57 = vadd.f32 0.5, %v1779_v22  ;;  %v1721_v30 = vmul.f32 0.5, %v6247_v39  ;;  %v2016_v60 = vmul.f32 %v7228_v10, %v1842_v12  ;;  %v1906_v50 = vadd.f32 0.5, %v1778_v55 }
 0x224   : > { %2298 = vadd.xlane.f32.xlu1 %v2077_v33  ;;  %v1720_v42 = vmul.f32 0.5, %v6245_v21  ;;  %6260 = vtanh.f32 %v1468_v59  ;;  %v1079_v0 = vadd.f32 %v7129_v6, %v7046_v2  ;;  %v1533_v53 = vmul.f32 0.5, %v1343_v41  ;;  %v8842_v2 = vld [vmem:[#allocation20_spill] sm:$0xff] }
 0x225   : > { %2296 = vadd.xlane.f32.xlu0 %v2076_v31  ;;  %v6249_v24 = vpop.eup %6248  ;;  %v8840_v31 = vld [vmem:[#allocation18_spill] sm:$0xff]  ;;  %6262 = vtanh.f32 %v1469_v38  ;;  %v1532_v63 = vmul.f32 0.5, %v1340_v34  ;;  %v2081_v56 = vmul.f32 %v7237_v5, %v1907_v57  ;;  %v1849_v20 = vadd.f32 0.5, %v1721_v30 }
 0x226   : > { %v6251_v33 = vpop.eup %6250  ;;  %v1076_v11 = vadd.f32 %v7129_v6, %v8840_v31  ;;  %v1848_v29 = vadd.f32 0.5, %v1720_v42  ;;  %v1784_v61 = vmul.f32 0.5, %v6249_v24  ;;  %v1467_v28 = vmul.f32 0.5, %v1079_v0 }
 0x227   : > { %v1785_v13 = vmul.f32 0.5, %v6251_v33  ;;  %6264 = vtanh.f32 %v1533_v53  ;;  %v1335_v46 = vadd.f32 %v7129_v6, %v8842_v2  ;;  %v1100_v38 = vadd.f32 %v7129_v6, %v7057_v48 }
 0x228   : > { %2182 = vadd.xlane.f32.xlu1 %v2019_v18  ;;  %v6253_v47 = vpop.eup %6252  ;;  %v2080_v18 = vmul.f32 %v7237_v5, %v1906_v50  ;;  %v1466_v58 = vmul.f32 0.5, %v1076_v11  ;;  %6266 = vtanh.f32 %v1532_v63  ;;  %v1912_v12 = vadd.f32 0.5, %v1784_v61 }
 0x229   : > { %2180 = vadd.xlane.f32.xlu0 %v2018_v23  ;;  %v6255_v16 = vpop.eup %6254  ;;  %v8841_v23 = vld [vmem:[#allocation19_spill] sm:$0xff]  ;;  %v1913_v45 = vadd.f32 0.5, %v1785_v13  ;;  %v1719_v22 = vmul.f32 0.5, %v6253_v47  ;;  %6268 = vtanh.f32 %v1467_v28  ;;  %v1531_v41 = vmul.f32 0.5, %v1335_v46 }
 0x22a   : > { %v1332_v40 = vadd.f32 %v7129_v6, %v8841_v23  ;;  %v1718_v55 = vmul.f32 0.5, %v6255_v16  ;;  %6270 = vtanh.f32 %v1466_v58  ;;  %v2086_v50 = vmul.f32 %v7237_v5, %v1912_v12  ;;  %v8843_v23 = vld [vmem:[#allocation21_spill] sm:$0xff] }
 0x22b   : > { %v6257_v17 = vpop.eup %6256  ;;  %v2087_v57 = vmul.f32 %v7237_v5, %v1913_v45  ;;  %v1847_v30 = vadd.f32 0.5, %v1719_v22  ;;  %v1472_v31 = vmul.f32 0.5, %v1100_v38  ;;  %v1359_v0 = vadd.f32 %v7129_v6, %v7068_v19 }
 0x22c   : > { %2310 = vadd.xlane.f32.xlu1 %v2083_v51  ;;  %v2023_v51 = vmul.f32 %v7228_v10, %v1849_v20  ;;  %v6259_v39 = vpop.eup %6258  ;;  %v1530_v59 = vmul.f32 0.5, %v1332_v40  ;;  %v1846_v48 = vadd.f32 0.5, %v1718_v55  ;;  %v1782_v42 = vmul.f32 0.5, %v6257_v17  ;;  %v8844_v40 = vld [vmem:[#allocation23_spill] sm:$0xff] }
 0x22d   : > { %2308 = vadd.xlane.f32.xlu0 %v2082_v36  ;;  %v2022_v36 = vmul.f32 %v7228_v10, %v1848_v29  ;;  %v1783_v33 = vmul.f32 0.5, %v6259_v39  ;;  %v2021_v63 = vmul.f32 %v7228_v10, %v1847_v30  ;;  %v1092_v19 = vadd.f32 %v7129_v6, %v8843_v23 }
 0x22e   : > { %v6261_v43 = vpop.eup %6260  ;;  %6272 = vtanh.f32 %v1530_v59  ;;  %v1910_v29 = vadd.f32 0.5, %v1782_v42  ;;  %v1095_v58 = vadd.f32 %v7129_v6, %v8844_v40  ;;  %v8845_v59 = vld [vmem:[#allocation22_spill] sm:$0xff] }
 0x22f   : > { %6274 = vtanh.f32 %v1531_v41  ;;  %v1911_v20 = vadd.f32 0.5, %v1783_v33  ;;  %v1724_v61 = vmul.f32 0.5, %v6261_v43  ;;  %v1348_v38 = vadd.f32 %v7129_v6, %v8845_v59  ;;  %v8846_v43 = vld [vmem:[#allocation24_spill] sm:$0xff] }
 0x230   : > { %2178 = vadd.xlane.f32.xlu1 %v2017_v32  ;;  %v1103_v32 = vadd.f32 %v7129_v6, %v7066_v52  ;;  %6276 = vtanh.f32 %v1472_v31  ;;  %v2084_v39 = vmul.f32 %v7237_v5, %v1910_v29  ;;  %v1470_v41 = vmul.f32 0.5, %v1092_v19 }
 0x231   : > { %2176 = vadd.xlane.f32.xlu0 %v2016_v60  ;;  %v6263_v60 = vpop.eup %6262  ;;  %v2085_v17 = vmul.f32 %v7237_v5, %v1911_v20  ;;  %v1116_v20 = vadd.f32 %v7129_v6, %v7085_v37 }
 0x232   : > { %v1473_v52 = vmul.f32 0.5, %v1103_v32  ;;  %v1725_v13 = vmul.f32 0.5, %v6263_v60  ;;  %v6265_v47 = vpop.eup %6264  ;;  %v1471_v32 = vmul.f32 0.5, %v1095_v58 }
 0x233   : > { %v6267_v16 = vpop.eup %6266  ;;  %v1789_v45 = vmul.f32 0.5, %v6265_v47 }
 0x234   : > { %2306 = vadd.xlane.f32.xlu1 %v2081_v56  ;;  %v1356_v56 = vadd.f32 %v7129_v6, %v7059_v1  ;;  %6278 = vtanh.f32 %v1473_v52  ;;  %v1537_v1 = vmul.f32 0.5, %v1359_v0  ;;  %v6269_v22 = vpop.eup %6268  ;;  %v1788_v12 = vmul.f32 0.5, %v6267_v16 }
 0x235   : > { %2304 = vadd.xlane.f32.xlu0 %v2080_v18  ;;  %v7262_v54 = vpop.xlane.xlu1 %2116  ;;  %v2020_v18 = vmul.f32 %v7228_v10, %v1846_v48  ;;  %v6271_v55 = vpop.eup %6270  ;;  %v1917_v48 = vadd.f32 0.5, %v1789_v45  ;;  %v1723_v42 = vmul.f32 0.5, %v6269_v22 }
 0x236   : > { %v7264_v21 = vpop.xlane.xlu0 %2244  ;;  %v1536_v2 = vmul.f32 0.5, %v1356_v56  ;;  %6280 = vtanh.f32 %v1537_v1  ;;  %v1916_v0 = vadd.f32 0.5, %v1788_v12  ;;  %v1534_v56 = vmul.f32 0.5, %v1348_v38 }
 0x237   : > { %v2091_v16 = vmul.f32 %v7237_v5, %v1917_v48  ;;  %v1851_v23 = vadd.f32 0.5, %v1723_v42 }
 0x238   : > { %2190 = vadd.xlane.f32.xlu1 %v2023_v51  ;;  %v1853_v51 = vadd.f32 0.5, %v1725_v13  ;;  %v6273_v33 = vpop.eup %6272  ;;  %6282 = vtanh.f32 %v1536_v2  ;;  %v2090_v58 = vmul.f32 %v7237_v5, %v1916_v0  ;;  %v1476_v2 = vmul.f32 0.5, %v1116_v20 }
 0x239   : > { %2188 = vadd.xlane.f32.xlu0 %v2022_v36  ;;  %v7270_v24 = vpop.xlane.xlu1 %2118  ;;  %v1852_v36 = vadd.f32 0.5, %v1724_v61  ;;  %v6275_v31 = vpop.eup %6274  ;;  %6284 = vtanh.f32 %v1471_v32  ;;  %v1786_v1 = vmul.f32 0.5, %v6273_v33  ;;  %v2025_v22 = vmul.f32 %v7228_v10, %v1851_v23 }
 0x23a   : > { %v7274_v34 = vpop.xlane.xlu0 %2112  ;;  %v6277_v29 = vpop.eup %6276  ;;  %6286 = vtanh.f32 %v1470_v41  ;;  %v1787_v19 = vmul.f32 0.5, %v6275_v31 }
 0x23b   : > { %v2026_v52 = vmul.f32 %v7228_v10, %v1852_v36  ;;  %6288 = vtanh.f32 %v1534_v56  ;;  %v1914_v41 = vadd.f32 0.5, %v1786_v1  ;;  %v1728_v32 = vmul.f32 0.5, %v6277_v29 }
 0x23c   : > { %2318 = vadd.xlane.f32.xlu1 %v2087_v57  ;;  %v1351_v57 = vadd.f32 %v7129_v6, %v8846_v43  ;;  %v1915_v12 = vadd.f32 0.5, %v1787_v19 }
 0x23d   : > { %2316 = vadd.xlane.f32.xlu0 %v2086_v50  ;;  %v7278_v11 = vpop.xlane.xlu1 %2246  ;;  %v2027_v50 = vmul.f32 %v7228_v10, %v1853_v51  ;;  %v1375_v51 = vadd.f32 %v7129_v6, %v7098_v15  ;;  %v8848_v15 = vld [vmem:[#allocation26_spill] sm:$0xff]  ;;  %v2088_v20 = vmul.f32 %v7237_v5, %v1914_v41 }
 0x23e   : > { %v7282_v53 = vpop.xlane.xlu0 %2240  ;;  %v1535_v13 = vmul.f32 0.5, %v1351_v57  ;;  %v6279_v40 = vpop.eup %6278  ;;  %v1111_v57 = vadd.f32 %v7129_v6, %v7102_v4  ;;  %v1108_v33 = vadd.f32 %v7129_v6, %v8848_v15  ;;  %v1856_v4 = vadd.f32 0.5, %v1728_v32 }
 0x23f   : > { %v1541_v48 = vmul.f32 0.5, %v1375_v51 }
 0x240   : > { %2186 = vadd.xlane.f32.xlu1 %v2021_v63  ;;  %v1722_v63 = vmul.f32 0.5, %v6271_v55  ;;  %6290 = vtanh.f32 %v1535_v13  ;;  %v1729_v55 = vmul.f32 0.5, %v6279_v40  ;;  %v6281_v59 = vpop.eup %6280  ;;  %v1475_v29 = vmul.f32 0.5, %v1111_v57  ;;  %v8850_v40 = vld [vmem:[#allocation27_spill] sm:$0xff] }
 0x241   : > { %2184 = vadd.xlane.f32.xlu0 %v2020_v18  ;;  %v7292_v28 = vpop.xlane.xlu1 %2242  ;;  %v1119_v18 = vadd.f32 %v7129_v6, %v7096_v3  ;;  %6292 = vtanh.f32 %v1476_v2  ;;  %v1474_v19 = vmul.f32 0.5, %v1108_v33 }
 0x242   : > { %v7294_v46 = vpop.xlane.xlu0 %2114  ;;  %v1850_v37 = vadd.f32 0.5, %v1722_v63  ;;  %v6283_v43 = vpop.eup %6282  ;;  %v1857_v0 = vadd.f32 0.5, %v1729_v55  ;;  %v1793_v63 = vmul.f32 0.5, %v6281_v59 }
 0x243   : > { %v1477_v3 = vmul.f32 0.5, %v1119_v18  ;;  %v6285_v56 = vpop.eup %6284  ;;  %v1792_v13 = vmul.f32 0.5, %v6283_v43  ;;  %v1132_v43 = vadd.f32 %v7129_v6, %v7113_v8 }
 0x244   : > { %2314 = vadd.xlane.f32.xlu1 %v2085_v17  ;;  %v2024_v38 = vmul.f32 %v7228_v10, %v1850_v37  ;;  %v6287_v18 = vpop.eup %6286  ;;  %v1921_v51 = vadd.f32 0.5, %v1793_v63 }
 0x245   : > { %2312 = vadd.xlane.f32.xlu0 %v2084_v39  ;;  %v7302_v30 = vpop.xlane.xlu1 %2126  ;;  %v8847_v39 = vld [vmem:[#allocation25_spill] sm:$0xff]  ;;  %6294 = vtanh.f32 %v1477_v3  ;;  %v6289_v1 = vpop.eup %6288  ;;  %v2031_v3 = vmul.f32 %v7228_v10, %v1857_v0  ;;  %v1726_v55 = vmul.f32 0.5, %v6287_v18  ;;  %v1480_v8 = vmul.f32 0.5, %v1132_v43 }
 0x246   : > { %v7304_v60 = vpop.xlane.xlu0 %2124  ;;  %v1372_v36 = vadd.f32 %v7129_v6, %v8847_v39  ;;  %6296 = vtanh.f32 %v1541_v48  ;;  %v2095_v33 = vmul.f32 %v7237_v5, %v1921_v51 }
 0x247   : > { %v1854_v63 = vadd.f32 0.5, %v1726_v55 }
 0x248   : > { %2198 = vadd.xlane.f32.xlu1 %v2027_v50  ;;  %v1540_v42 = vmul.f32 0.5, %v1372_v36  ;;  %v2030_v36 = vmul.f32 %v7228_v10, %v1856_v4 }
 0x249   : > { %2196 = vadd.xlane.f32.xlu0 %v2026_v52  ;;  %v7310_v47 = vpop.xlane.xlu1 %2254  ;;  %v2089_v52 = vmul.f32 %v7237_v5, %v1915_v12  ;;  %v1920_v12 = vadd.f32 0.5, %v1792_v13 }
 0x24a   : > { %v7314_v61 = vpop.xlane.xlu0 %2252  ;;  %6298 = vtanh.f32 %v1540_v42  ;;  %v6291_v39 = vpop.eup %6290 }
 0x24b   : > { %6300 = vtanh.f32 %v1475_v29  ;;  %v6293_v57 = vpop.eup %6292  ;;  %v1791_v42 = vmul.f32 0.5, %v6291_v39  ;;  %v2094_v0 = vmul.f32 %v7237_v5, %v1920_v12  ;;  %v1388_v29 = vadd.f32 %v7129_v6, %v7115_v44  ;;  %v8852_v39 = vld [vmem:[#allocation29_spill] sm:$0xff] }
 0x24c   : > { %2326 = vadd.xlane.f32.xlu1 %v2091_v16  ;;  %v8849_v16 = vld [vmem:[#allocation28_spill] sm:$0xff]  ;;  %6302 = vtanh.f32 %v1474_v19 }
 0x24d   : > { %2324 = vadd.xlane.f32.xlu0 %v2090_v58  ;;  %v7318_v17 = vpop.xlane.xlu1 %2122  ;;  %v1367_v23 = vadd.f32 %v7129_v6, %v8849_v16  ;;  %v1364_v58 = vadd.f32 %v7129_v6, %v8850_v40  ;;  %v1919_v16 = vadd.f32 0.5, %v1791_v42  ;;  %v2028_v40 = vmul.f32 %v7228_v10, %v1854_v63 }
 0x24e   : > { %v7322_v45 = vpop.xlane.xlu0 %2120 }
 0x24f   : > { %v1539_v59 = vmul.f32 0.5, %v1367_v23  ;;  %v1538_v41 = vmul.f32 0.5, %v1364_v58 }
 0x250   : > { %2194 = vadd.xlane.f32.xlu1 %v2025_v22  ;;  %v1727_v22 = vmul.f32 0.5, %v6285_v56 }
 0x251   : > { %2192 = vadd.xlane.f32.xlu0 %v2024_v38  ;;  %v7332_v50 = vpop.xlane.xlu1 %2250  ;;  %v1135_v38 = vadd.f32 %v7129_v6, %v7122_v7  ;;  %v1790_v7 = vmul.f32 0.5, %v6289_v1  ;;  %6304 = vtanh.f32 %v1539_v59  ;;  %v1732_v1 = vmul.f32 0.5, %v6293_v57 }
 0x252   : > { %v7334_v31 = vpop.xlane.xlu0 %2248  ;;  %v1855_v48 = vadd.f32 0.5, %v1727_v22  ;;  %6306 = vtanh.f32 %v1538_v41  ;;  %v1544_v59 = vmul.f32 0.5, %v1388_v29  ;;  %v2093_v41 = vmul.f32 %v7237_v5, %v1919_v16  ;;  %v8854_v29 = vld [vmem:[#allocation30_spill] sm:$0xff] }
 0x253   : > { %v1481_v56 = vmul.f32 0.5, %v1135_v38  ;;  %v1918_v58 = vadd.f32 0.5, %v1790_v7  ;;  %v1380_v16 = vadd.f32 %v7129_v6, %v8854_v29 }
 0x254   : > { %2322 = vadd.xlane.f32.xlu1 %v2089_v52  ;;  %v6295_v52 = vpop.eup %6294  ;;  %v2029_v18 = vmul.f32 %v7228_v10, %v1855_v48  ;;  %v1860_v48 = vadd.f32 0.5, %v1732_v1 }
 0x255   : > { %2320 = vadd.xlane.f32.xlu0 %v2088_v20  ;;  %v7342_v37 = vpop.xlane.xlu1 %2134  ;;  %v1391_v20 = vadd.f32 %v7129_v6, %v7124_v35  ;;  %v1733_v23 = vmul.f32 0.5, %v6295_v52  ;;  %v6297_v19 = vpop.eup %6296  ;;  %6308 = vtanh.f32 %v1481_v56 }
 0x256   : > { %v7344_v2 = vpop.xlane.xlu0 %2132  ;;  %v6299_v35 = vpop.eup %6298  ;;  %6310 = vtanh.f32 %v1480_v8  ;;  %v1797_v55 = vmul.f32 0.5, %v6297_v19 }
 0x257   : > { %v1545_v22 = vmul.f32 0.5, %v1391_v20  ;;  %v6301_v12 = vpop.eup %6300  ;;  %v1861_v43 = vadd.f32 0.5, %v1733_v23  ;;  %v1796_v57 = vmul.f32 0.5, %v6299_v35  ;;  %v2034_v35 = vmul.f32 %v7228_v10, %v1860_v48 }
 0x258   : > { %2206 = vadd.xlane.f32.xlu1 %v2031_v3  ;;  %v8851_v3 = vld [vmem:[#allocation31_spill] sm:$0xff]  ;;  %v6303_v42 = vpop.eup %6302  ;;  %v1731_v7 = vmul.f32 0.5, %v6301_v12 }
 0x259   : > { %2204 = vadd.xlane.f32.xlu0 %v2030_v36  ;;  %v7350_v32 = vpop.xlane.xlu1 %2262  ;;  %v1127_v51 = vadd.f32 %v7129_v6, %v8851_v3  ;;  %v1124_v36 = vadd.f32 %v7129_v6, %v8852_v39  ;;  %6312 = vtanh.f32 %v1545_v22  ;;  %v2035_v19 = vmul.f32 %v7228_v10, %v1861_v43 }
 0x25a   : > { %v7354_v15 = vpop.xlane.xlu0 %2260  ;;  %6314 = vtanh.f32 %v1544_v59  ;;  %v1924_v1 = vadd.f32 0.5, %v1796_v57  ;;  %v1151_v39 = vadd.f32 %v7129_v6, %v7157_v25  ;;  %v1859_v12 = vadd.f32 0.5, %v1731_v7 }
 0x25b   : > { %v1479_v52 = vmul.f32 0.5, %v1127_v51  ;;  %v1478_v56 = vmul.f32 0.5, %v1124_v36  ;;  %v6305_v8 = vpop.eup %6304  ;;  %v1148_v43 = vadd.f32 %v7129_v6, %v7146_v27  ;;  %v1407_v7 = vadd.f32 %v7129_v6, %v7159_v9  ;;  %v7411_v9 = vld [vmem:[%s8757_s3] ss:$0 sm:$0xff] }
 0x25c   : > { %2334 = vadd.xlane.f32.xlu1 %v2095_v33  ;;  %v2092_v33 = vmul.f32 %v7237_v5, %v1918_v58  ;;  %v1730_v58 = vmul.f32 0.5, %v6303_v42  ;;  %v1795_v51 = vmul.f32 0.5, %v6305_v8  ;;  %v2098_v42 = vmul.f32 %v7237_v5, %v1924_v1 }
 0x25d   : > { %2332 = vadd.xlane.f32.xlu0 %v2094_v0  ;;  %v7360_v4 = vpop.xlane.xlu1 %2130  ;;  %v8853_v0 = vld [vmem:[#allocation32_spill] sm:$0xff]  ;;  %6316 = vtanh.f32 %v1479_v52  ;;  %v1484_v27 = vmul.f32 0.5, %v1148_v43  ;;  %v2033_v29 = vmul.f32 %v7228_v10, %v1859_v12 }
 0x25e   : > { %v7362_v13 = vpop.xlane.xlu0 %2128  ;;  %v1383_v63 = vadd.f32 %v7129_v6, %v8853_v0  ;;  %6318 = vtanh.f32 %v1478_v56  ;;  %v1923_v52 = vadd.f32 0.5, %v1795_v51  ;;  %v6518_v56 = vmov 0  }
 0x25f   : > { %6026 = vset.pattern.permute.xlu1 %v6518_v56  ;;  %6027 = vset.pattern.permute.xlu0 %v6518_v56 }
 0x260   : > { %2202 = vadd.xlane.f32.xlu1 %v2029_v18  ;;  %v1925_v18 = vadd.f32 0.5, %v1797_v55  ;;  %v1543_v3 = vmul.f32 0.5, %v1383_v63  ;;  %v1542_v55 = vmul.f32 0.5, %v1380_v16  ;;  %v1485_v63 = vmul.f32 0.5, %v1151_v39  ;;  %v8855_v16 = vld [vmem:[#allocation33_spill] sm:$0xff] }
 0x261   : > { %2200 = vadd.xlane.f32.xlu0 %v2028_v40  ;;  %v7372_v44 = vpop.xlane.xlu1 %2258  ;;  %v6307_v40 = vpop.eup %6306 }
 0x262   : > { %v7374_v38 = vpop.xlane.xlu0 %2256  ;;  %v6309_v36 = vpop.eup %6308  ;;  %v1794_v48 = vmul.f32 0.5, %v6307_v40  ;;  %6320 = vtanh.f32 %v1543_v3  ;;  %v1143_v3 = vadd.f32 %v7411_v9, %v7163_v14 }
 0x263   : > { %v6311_v57 = vpop.eup %6310  ;;  %v1737_v0 = vmul.f32 0.5, %v6309_v36  ;;  %6322 = vtanh.f32 %v1542_v55  ;;  %v1549_v36 = vmul.f32 0.5, %v1407_v7  ;;  %v8856_v55 = vld [vmem:[#allocation34_spill] sm:$0xff]  ;;  %v8857_v7 = vld [vmem:[#allocation36_spill] sm:$0xff] }
 0x264   : > { %2330 = vadd.xlane.f32.xlu1 %v2093_v41  ;;  %v2099_v41 = vmul.f32 %v7237_v5, %v1925_v18  ;;  %v6313_v8 = vpop.eup %6312  ;;  %v1922_v40 = vadd.f32 0.5, %v1794_v48  ;;  %6324 = vtanh.f32 %v1485_v63  ;;  %v1483_v63 = vmul.f32 0.5, %v1143_v3 }
 0x265   : > { %2328 = vadd.xlane.f32.xlu0 %v2092_v33  ;;  %v7380_v20 = vpop.xlane.xlu1 %2142  ;;  %v1858_v33 = vadd.f32 0.5, %v1730_v58  ;;  %v1736_v58 = vmul.f32 0.5, %v6311_v57  ;;  %v1865_v51 = vadd.f32 0.5, %v1737_v0  ;;  %v1801_v39 = vmul.f32 0.5, %v6313_v8 }
 0x266   : > { %v7384_v23 = vpop.xlane.xlu0 %2140  ;;  %6326 = vtanh.f32 %v1484_v27  ;;  %v2096_v0 = vmul.f32 %v7237_v5, %v1922_v40  ;;  %v1399_v27 = vadd.f32 %v7411_v9, %v8857_v7 }
 0x267   : > { %v2032_v1 = vmul.f32 %v7228_v10, %v1858_v33  ;;  %v2097_v33 = vmul.f32 %v7237_v5, %v1923_v52  ;;  %v1864_v14 = vadd.f32 0.5, %v1736_v58  ;;  %v1929_v8 = vadd.f32 0.5, %v1801_v39  ;;  %v8858_v52 = vld [vmem:[#allocation35_spill] sm:$0xff] }
 0x268   : > { %2214 = vadd.xlane.f32.xlu1 %v2035_v19  ;;  %v1404_v19 = vadd.f32 %v7129_v6, %v8855_v16  ;;  %6328 = vtanh.f32 %v1549_v36  ;;  %v1396_v58 = vadd.f32 %v7411_v9, %v8858_v52  ;;  %v2039_v40 = vmul.f32 %v7228_v10, %v1865_v51 }
 0x269   : > { %2212 = vadd.xlane.f32.xlu0 %v2034_v35  ;;  %v7388_v22 = vpop.xlane.xlu1 %2270  ;;  %v6315_v35 = vpop.eup %6314  ;;  %v2038_v39 = vmul.f32 %v7228_v10, %v1864_v14  ;;  %v2103_v14 = vmul.f32 %v7237_v5, %v1929_v8 }
 0x26a   : > { %v7392_v59 = vpop.xlane.xlu0 %2268  ;;  %v6317_v12 = vpop.eup %6316  ;;  %v1548_v43 = vmul.f32 0.5, %v1404_v19  ;;  %v1546_v51 = vmul.f32 0.5, %v1396_v58 }
 0x26b   : > { %v6319_v48 = vpop.eup %6318  ;;  %v1735_v56 = vmul.f32 0.5, %v6317_v12  ;;  %v1164_v12 = vadd.f32 %v7411_v9, %v7174_v49 }
 0x26c   : > { %2342 = vadd.xlane.f32.xlu1 %v2099_v41  ;;  %v1140_v41 = vadd.f32 %v7411_v9, %v8856_v55  ;;  %v6321_v16 = vpop.eup %6320  ;;  %6330 = vtanh.f32 %v1548_v43 }
 0x26d   : > { %2340 = vadd.xlane.f32.xlu0 %v2098_v42  ;;  %v7398_v25 = vpop.xlane.xlu1 %2138  ;;  %v1800_v42 = vmul.f32 0.5, %v6315_v35  ;;  %v1734_v35 = vmul.f32 0.5, %v6319_v48  ;;  %v6323_v36 = vpop.eup %6322  ;;  %6332 = vtanh.f32 %v1483_v63  ;;  %v1799_v55 = vmul.f32 0.5, %v6321_v16 }
 0x26e   : > { %v7402_v18 = vpop.xlane.xlu0 %2136  ;;  %v1482_v19 = vmul.f32 0.5, %v1140_v41  ;;  %v1547_v41 = vmul.f32 0.5, %v1399_v27  ;;  %v1798_v7 = vmul.f32 0.5, %v6323_v36  ;;  %v1488_v27 = vmul.f32 0.5, %v1164_v12 }
 0x26f   : > { %v1928_v3 = vadd.f32 0.5, %v1800_v42  ;;  %v6325_v42 = vpop.eup %6324  ;;  %v1862_v63 = vadd.f32 0.5, %v1734_v35  ;;  %v1927_v52 = vadd.f32 0.5, %v1799_v55  ;;  %v8862_v35 = vld [vmem:[#allocation37_spill] sm:$0xff] }
 0x270   : > { %2210 = vadd.xlane.f32.xlu1 %v2033_v29  ;;  %6334 = vtanh.f32 %v1482_v19  ;;  %v6327_v16 = vpop.eup %6326  ;;  %v1741_v19 = vmul.f32 0.5, %v6325_v42  ;;  %v1926_v36 = vadd.f32 0.5, %v1798_v7 }
 0x271   : > { %2208 = vadd.xlane.f32.xlu0 %v2032_v1  ;;  %v7415_v6 = vpop.xlane.xlu1 %2266  ;;  %v2102_v49 = vmul.f32 %v7237_v5, %v1928_v3  ;;  %6336 = vtanh.f32 %v1547_v41  ;;  %v1420_v3 = vadd.f32 %v7411_v9, %v8862_v35  ;;  %v1740_v12 = vmul.f32 0.5, %v6327_v16 }
 0x272   : > { %v7419_v57 = vpop.xlane.xlu0 %2264  ;;  %6338 = vtanh.f32 %v1546_v51  ;;  %v2036_v55 = vmul.f32 %v7228_v10, %v1862_v63  ;;  %v1869_v35 = vadd.f32 0.5, %v1741_v19  ;;  %v2101_v63 = vmul.f32 %v7237_v5, %v1927_v52 }
 0x273   : > { %6340 = vtanh.f32 %v1488_v27  ;;  %v1552_v16 = vmul.f32 0.5, %v1420_v3  ;;  %v1868_v27 = vadd.f32 0.5, %v1740_v12 }
 0x274   : > { %2338 = vadd.xlane.f32.xlu1 %v2097_v33  ;;  %v1167_v33 = vadd.f32 %v7411_v9, %v7185_v26 }
 0x275   : > { %2336 = vadd.xlane.f32.xlu0 %v2096_v0  ;;  %v7425_v29 = vpop.xlane.xlu1 %2150  ;;  %v1863_v0 = vadd.f32 0.5, %v1735_v56  ;;  %v1423_v56 = vadd.f32 %v7411_v9, %v7187_v62  ;;  %v8864_v62 = vld [vmem:[#allocation40_spill] sm:$0xff] }
 0x276   : > { %v7429_v1 = vpop.xlane.xlu0 %2148  ;;  %v1489_v26 = vmul.f32 0.5, %v1167_v33  ;;  %v8863_v33 = vld [vmem:[#allocation38_spill] sm:$0xff]  ;;  %v1159_v51 = vadd.f32 %v7411_v9, %v8864_v62 }
 0x277   : > { %8859 = vst [vmem:[#allocation17_spill] sm:$0xff] %v7429_v1  ;;  %v2037_v58 = vmul.f32 %v7228_v10, %v1863_v0  ;;  %v1553_v42 = vmul.f32 0.5, %v1423_v56  ;;  %v8865_v1 = vld [vmem:[#allocation41_spill] sm:$0xff] }
 0x278   : > { %2222 = vadd.xlane.f32.xlu1 %v2039_v40  ;;  %6342 = vtanh.f32 %v1489_v26  ;;  %v1415_v56 = vadd.f32 %v7411_v9, %v8865_v1 }
 0x279   : > { %2220 = vadd.xlane.f32.xlu0 %v2038_v39  ;;  %v7435_v43 = vpop.xlane.xlu1 %2278  ;;  %v6329_v39 = vpop.eup %6328  ;;  %6344 = vtanh.f32 %v1553_v42 }
 0x27a   : > { %v7439_v48 = vpop.xlane.xlu0 %2276  ;;  %v6331_v41 = vpop.eup %6330  ;;  %v1805_v7 = vmul.f32 0.5, %v6329_v39  ;;  %6346 = vtanh.f32 %v1552_v16  ;;  %v8866_v39 = vld [vmem:[#allocation39_spill] sm:$0xff]  ;;  %v1551_v1 = vmul.f32 0.5, %v1415_v56 }
 0x27b   : > { %8860 = vst [vmem:[#allocation18_spill] sm:$0xff] %v7439_v48  ;;  %v1804_v48 = vmul.f32 0.5, %v6331_v41  ;;  %v1412_v52 = vadd.f32 %v7411_v9, %v8866_v39 }
 0x27c   : > { %2350 = vadd.xlane.f32.xlu1 %v2103_v14  ;;  %v1156_v14 = vadd.f32 %v7411_v9, %v8863_v33  ;;  %v1933_v3 = vadd.f32 0.5, %v1805_v7 }
 0x27d   : > { %2348 = vadd.xlane.f32.xlu0 %v2102_v49  ;;  %v7443_v40 = vpop.xlane.xlu1 %2146  ;;  %v6333_v49 = vpop.eup %6332 }
 0x27e   : > { %v7447_v8 = vpop.xlane.xlu0 %2144  ;;  %v6335_v26 = vpop.eup %6334  ;;  %v1486_v33 = vmul.f32 0.5, %v1156_v14  ;;  %v1739_v62 = vmul.f32 0.5, %v6333_v49  ;;  %v1932_v49 = vadd.f32 0.5, %v1804_v48 }
 0x27f   : > { %8861 = vst [vmem:[#allocation19_spill] sm:$0xff] %v7447_v8  ;;  %v6337_v41 = vpop.eup %6336  ;;  %v1738_v14 = vmul.f32 0.5, %v6335_v26 }
 0x280   : > { %2218 = vadd.xlane.f32.xlu1 %v2037_v58  ;;  %v2100_v58 = vmul.f32 %v7237_v5, %v1926_v36  ;;  %v2043_v36 = vmul.f32 %v7228_v10, %v1869_v35  ;;  %v6339_v42 = vpop.eup %6338  ;;  %6348 = vtanh.f32 %v1486_v33  ;;  %v1803_v9 = vmul.f32 0.5, %v6337_v41 }
 0x281   : > { %2216 = vadd.xlane.f32.xlu0 %v2036_v55  ;;  %v7457_v0 = vpop.xlane.xlu1 %2274  ;;  %v1487_v55 = vmul.f32 0.5, %v1159_v51  ;;  %v2042_v51 = vmul.f32 %v7228_v10, %v1868_v27  ;;  %v6341_v16 = vpop.eup %6340  ;;  %v2107_v35 = vmul.f32 %v7237_v5, %v1933_v3  ;;  %v1866_v48 = vadd.f32 0.5, %v1738_v14 }
 0x282   : > { %v7459_v8 = vpop.xlane.xlu0 %2272  ;;  %v6343_v26 = vpop.eup %6342  ;;  %v2106_v27 = vmul.f32 %v7237_v5, %v1932_v49  ;;  %v1744_v3 = vmul.f32 0.5, %v6341_v16 }
 0x283   : > { %6350 = vtanh.f32 %v1487_v55  ;;  %v1931_v55 = vadd.f32 0.5, %v1803_v9  ;;  %v1745_v56 = vmul.f32 0.5, %v6343_v26  ;;  %v2040_v14 = vmul.f32 %v7228_v10, %v1866_v48 }
 0x284   : > { %2346 = vadd.xlane.f32.xlu1 %v2101_v63  ;;  %v1867_v63 = vadd.f32 0.5, %v1739_v62  ;;  %6352 = vtanh.f32 %v1551_v1 }
 0x285   : > { %2344 = vadd.xlane.f32.xlu0 %v2100_v58  ;;  %v7465_v19 = vpop.xlane.xlu1 %2158  ;;  %v1550_v58 = vmul.f32 0.5, %v1412_v52  ;;  %v1873_v1 = vadd.f32 0.5, %v1745_v56 }
 0x286   : > { %v7469_v12 = vpop.xlane.xlu0 %2156  ;;  %v2041_v52 = vmul.f32 %v7228_v10, %v1867_v63 }
 0x287   : > { %8867 = vst [vmem:[#allocation20_spill] sm:$0xff] %v7469_v12  ;;  %v1802_v12 = vmul.f32 0.5, %v6339_v42  ;;  %6354 = vtanh.f32 %v1550_v58  ;;  %v2105_v58 = vmul.f32 %v7237_v5, %v1931_v55  ;;  %v2047_v56 = vmul.f32 %v7228_v10, %v1873_v1 }
 0x288   : > { %2230 = vadd.xlane.f32.xlu1 %v2043_v36  ;;  %v6345_v36 = vpop.eup %6344 }
 0x289   : > { %2228 = vadd.xlane.f32.xlu0 %v2042_v51  ;;  %v7473_v7 = vpop.xlane.xlu1 %2286  ;;  %v1930_v41 = vadd.f32 0.5, %v1802_v12  ;;  %v6347_v51 = vpop.eup %6346 }
 0x28a   : > { %v7475_v39 = vpop.xlane.xlu0 %2284  ;;  %v6349_v42 = vpop.eup %6348  ;;  %v1808_v63 = vmul.f32 0.5, %v6347_v51 }
 0x28b   : > { %8868 = vst [vmem:[#allocation21_spill] sm:$0xff] %v7475_v39  ;;  %v2104_v12 = vmul.f32 %v7237_v5, %v1930_v41 }
 0x28c   : > { %2358 = vadd.xlane.f32.xlu1 %v2107_v35  ;;  %v1809_v35 = vmul.f32 0.5, %v6345_v36 }
 0x28d   : > { %2356 = vadd.xlane.f32.xlu0 %v2106_v27  ;;  %v7479_v33 = vpop.xlane.xlu1 %2154  ;;  %v6351_v26 = vpop.eup %6350  ;;  %v1872_v27 = vadd.f32 0.5, %v1744_v3 }
 0x28e   : > { %v7481_v62 = vpop.xlane.xlu0 %2152  ;;  %v1743_v48 = vmul.f32 0.5, %v6351_v26  ;;  %v6353_v36 = vpop.eup %6352 }
 0x28f   : > { %8869 = vst [vmem:[#allocation23_spill] sm:$0xff] %v7481_v62  ;;  %v1742_v62 = vmul.f32 0.5, %v6349_v42  ;;  %v2046_v55 = vmul.f32 %v7228_v10, %v1872_v27  ;;  %v1807_v51 = vmul.f32 0.5, %v6353_v36 }
 0x290   : > { %2226 = vadd.xlane.f32.xlu1 %v2041_v52  ;;  %v1937_v52 = vadd.f32 0.5, %v1809_v35  ;;  %v1871_v41 = vadd.f32 0.5, %v1743_v48 }
 0x291   : > { %2224 = vadd.xlane.f32.xlu0 %v2040_v14  ;;  %v7485_v49 = vpop.xlane.xlu1 %2282  ;;  %v6355_v39 = vpop.eup %6354  ;;  %v1870_v26 = vadd.f32 0.5, %v1742_v62  ;;  %v1935_v27 = vadd.f32 0.5, %v1807_v51 }
 0x292   : > { %v7487_v9 = vpop.xlane.xlu0 %2280  ;;  %v2111_v35 = vmul.f32 %v7237_v5, %v1937_v52 }
 0x293   : > { %8870 = vst [vmem:[#allocation22_spill] sm:$0xff] %v7487_v9  ;;  %v1936_v9 = vadd.f32 0.5, %v1808_v63  ;;  %v2044_v48 = vmul.f32 %v7228_v10, %v1870_v26 }
 0x294   : > { %2354 = vadd.xlane.f32.xlu1 %v2105_v58 }
 0x295   : > { %2352 = vadd.xlane.f32.xlu0 %v2104_v12  ;;  %v7491_v16 = vpop.xlane.xlu1 %2166  ;;  %v1806_v12 = vmul.f32 0.5, %v6355_v39  ;;  %v2110_v1 = vmul.f32 %v7237_v5, %v1936_v9  ;;  %v2109_v39 = vmul.f32 %v7237_v5, %v1935_v27  ;;  %v6519_v9 = vmov 839922192  }
 0x296   : > { %v7493_v14 = vpop.xlane.xlu0 %2164  ;;  %v2497_v52 = vunpack.c.l.s4 %v6519_v9 }
 0x298   : > { %2238 = vadd.xlane.f32.xlu1 %v2047_v56  ;;  %v2045_v56 = vmul.f32 %v7228_v10, %v1871_v41  ;;  %v2498_v10 = vunpack.c.0.s8 %v2497_v52 }
 0x299   : > { %2236 = vadd.xlane.f32.xlu0 %v2046_v55  ;;  %v7497_v3 = vpop.xlane.xlu1 %2294  ;;  %v1934_v55 = vadd.f32 0.5, %v1806_v12 }
 0x29a   : > { %v7499_v58 = vpop.xlane.xlu0 %2292 }
 0x29b   : > { %v2108_v51 = vmul.f32 %v7237_v5, %v1934_v55 }
 0x29c   : > { %2366 = vadd.xlane.f32.xlu1 %v2111_v35  ;;  %v6520_v35 = vmov 1985246804  }
 0x29d   : > { %2364 = vadd.xlane.f32.xlu0 %v2110_v1  ;;  %v7503_v42 = vpop.xlane.xlu1 %2162  ;;  %v2504_v1 = vunpack.c.l.s4 %v6520_v35 }
 0x29e   : > { %v7505_v63 = vpop.xlane.xlu0 %2160 }
 0x29f   : > { %v2505_v26 = vunpack.c.0.s8 %v2504_v1 }
 0x2a0   : > { %2234 = vadd.xlane.f32.xlu1 %v2045_v56 }
 0x2a1   : > { %2232 = vadd.xlane.f32.xlu0 %v2044_v48  ;;  %v7509_v36 = vpop.xlane.xlu1 %2290 }
 0x2a2   : > { %v7511_v62 = vpop.xlane.xlu0 %2288 }
 0x2a3   : > { %8871 = vst [vmem:[#allocation24_spill] sm:$0xff] %v7511_v62  ;;  %v8874_v62 = vld [vmem:[#allocation16_spill] sm:$0xff] }
 0x2a4   : > { %2362 = vadd.xlane.f32.xlu1 %v2109_v39  ;;  %v7524_v27 = vsub.s32 %v2498_v10, %v8874_v62  ;;  %v7527_v9 = vsub.s32 %v2505_v26, %v8874_v62 }
 0x2a5   : > { %2360 = vadd.xlane.f32.xlu0 %v2108_v51  ;;  %v7515_v41 = vpop.xlane.xlu1 %2174 }
 0x2a6   : > { %v7517_v12 = vpop.xlane.xlu0 %2172  ;;  %v2530_v55 = vrot.slane %v7262_v54, %v7524_v27  ;;  %v2537_v39 = vrot.slane %v7262_v54, %v7527_v9  ;;  %v3426_v51 = vrot.slane %v7264_v21, %v7524_v27  ;;  %v3433_v10 = vrot.slane %v7264_v21, %v7527_v9 }
 0x2a7   : > { %8872 = vst [vmem:[#allocation25_spill] sm:$0xff] %v7517_v12  ;;  %v2502_v62 = vrot.slane %v7274_v34, %v7524_v27 }
 0x2a8   : > { %v4290_v26 = vcombine.low %v2530_v55, %v2537_v39  ;;  %v4354_v12 = vcombine.low %v3426_v51, %v3433_v10  ;;  %v3440_v55 = vrot.slane %v7278_v11, %v7524_v27  ;;  %v3447_v39 = vrot.slane %v7278_v11, %v7527_v9 }
 0x2a9   : > { %v7519_v56 = vpop.xlane.xlu1 %2302  ;;  %v2544_v51 = vrot.slane %v7270_v24, %v7524_v27  ;;  %v2551_v10 = vrot.slane %v7270_v24, %v7527_v9  ;;  %v3419_v11 = vrot.slane %v7292_v28, %v7527_v9  ;;  %v2523_v24 = vrot.slane %v7294_v46, %v7527_v9 }
 0x2aa   : > { %v7521_v48 = vpop.xlane.xlu0 %2300 }
 0x2ab   : > { %8873 = vst [vmem:[#allocation26_spill] sm:$0xff] %v7521_v48 }
 0x2ad   : > { %v7529_v35 = vpop.xlane.xlu1 %2170 }
 0x2ae   : > { %v7531_v5 = vpop.xlane.xlu0 %2168 }
 0x2af   : > { %8875 = vst [vmem:[#allocation28_spill] sm:$0xff] %v7531_v5  ;;  %v2509_v5 = vrot.slane %v7274_v34, %v7527_v9 }
 0x2b1   : > { %v7537_v52 = vpop.xlane.xlu1 %2298  ;;  %v4288_v21 = vcombine.low %v2502_v62, %v2509_v5  ;;  %v3412_v62 = vrot.slane %v7292_v28, %v7524_v27  ;;  %v3503_v28 = vrot.slane %v7310_v47, %v7527_v9 }
 0x2b2   : > { %8876 = vst [vmem:[#allocation27_spill] sm:$0xff] %v7537_v52  ;;  %v7539_v1 = vpop.xlane.xlu0 %2296  ;;  %v3405_v52 = vrot.slane %v7282_v53, %v7527_v9 }
 0x2b3   : > { %8877 = vst [vmem:[#allocation31_spill] sm:$0xff] %v7539_v1  ;;  %v3398_v1 = vrot.slane %v7282_v53, %v7524_v27  ;;  %v4355_v53 = vcombine.low %v3440_v55, %v3447_v39  ;;  %v2586_v39 = vrot.slane %v7304_v60, %v7524_v27 }
 0x2b5   : > { %4423 = vperm.xlu1 %6026, %v4290_v26   ;;  %v7549_v48 = vpop.xlane.xlu1 %2182 }
 0x2b6   : > { %v7551_v54 = vpop.xlane.xlu0 %2180 }
 0x2b7   : > { %8878 = vst [vmem:[#allocation29_spill] sm:$0xff] %v7551_v54  ;;  %v4352_v54 = vcombine.low %v3398_v1, %v3405_v52  ;;  %v4353_v52 = vcombine.low %v3412_v62, %v3419_v11  ;;  %v3496_v1 = vrot.slane %v7310_v47, %v7524_v27  ;;  %v3475_v47 = vrot.slane %v7332_v50, %v7527_v9 }
 0x2b8   : > { %v3482_v62 = vrot.slane %v7314_v61, %v7524_v27 }
 0x2b9   : > { %4615 = vperm.xlu1 %6026, %v4354_v12   ;;  %v7561_v34 = vpop.xlane.xlu1 %2310 }
 0x2ba   : > { %8879 = vst [vmem:[#allocation32_spill] sm:$0xff] %v7561_v34  ;;  %v7563_v26 = vpop.xlane.xlu0 %2308  ;;  %v2516_v34 = vrot.slane %v7294_v46, %v7524_v27  ;;  %v2593_v46 = vrot.slane %v7304_v60, %v7527_v9  ;;  %v3489_v60 = vrot.slane %v7314_v61, %v7527_v9  ;;  %v2565_v61 = vrot.slane %v7322_v45, %v7527_v9 }
 0x2bb   : > { %8880 = vst [vmem:[#allocation30_spill] sm:$0xff] %v7563_v26  ;;  %4417 = vperm.xlu0 %6027, %v4288_v21   ;;  %v4291_v26 = vcombine.low %v2544_v51, %v2551_v10  ;;  %v4359_v51 = vcombine.low %v3496_v1, %v3503_v28  ;;  %v3468_v10 = vrot.slane %v7332_v50, %v7524_v27 }
 0x2bc   : > { %v4289_v55 = vcombine.low %v2516_v34, %v2523_v24  ;;  %v4294_v34 = vcombine.low %v2586_v39, %v2593_v46  ;;  %v2656_v24 = vrot.slane %v7342_v37, %v7524_v27  ;;  %v2663_v50 = vrot.slane %v7342_v37, %v7527_v9 }
 0x2bd   : > { %v7573_v12 = vpop.xlane.xlu1 %2178  ;;  %4609 = vperm.xlu1 %6026, %v4352_v54   ;;  %v4357_v11 = vcombine.low %v3468_v10, %v3475_v47  ;;  %v4358_v28 = vcombine.low %v3482_v62, %v3489_v60  ;;  %v3552_v46 = vrot.slane %v7350_v32, %v7524_v27  ;;  %v3559_v37 = vrot.slane %v7350_v32, %v7527_v9 }
 0x2be   : > { %v7575_v5 = vpop.xlane.xlu0 %2176  ;;  %v4299_v39 = vcombine.low %v2656_v24, %v2663_v50  ;;  %v2628_v60 = vrot.slane %v7360_v4, %v7524_v27  ;;  %v2635_v32 = vrot.slane %v7360_v4, %v7527_v9  ;;  %v2600_v50 = vrot.slane %v7302_v30, %v7524_v27 }
 0x2bf   : > { %4618 = vperm.xlu0 %6027, %v4355_v53   ;;  %v4363_v62 = vcombine.low %v3552_v46, %v3559_v37  ;;  %v3531_v4 = vrot.slane %v7372_v44, %v7527_v9 }
 0x2c1   : > { %v7585_v21 = vpop.xlane.xlu1 %2306  ;;  %4426 = vperm.xlu1 %6026, %v4291_v26  }
 0x2c2   : > { %v7587_v54 = vpop.xlane.xlu0 %2304 }
 0x2c3   : > { %4612 = vperm.xlu0 %6027, %v4353_v52  }
 0x2c5   : > { %v7597_v53 = vpop.xlane.xlu1 %2190  ;;  %4420 = vperm.xlu1 %6026, %v4289_v55   ;;  %v2558_v55 = vrot.slane %v7322_v45, %v7524_v27  ;;  %v3461_v45 = vrot.slane %v7334_v31, %v7527_v9 }
 0x2c6   : > { %v7599_v26 = vpop.xlane.xlu0 %2188 }
 0x2c7   : > { %4630 = vperm.xlu0 %6027, %v4359_v51   ;;  %v4292_v47 = vcombine.low %v2558_v55, %v2565_v61  ;;  %v4297_v55 = vcombine.low %v2628_v60, %v2635_v32  ;;  %v3524_v61 = vrot.slane %v7372_v44, %v7524_v27  ;;  %v2719_v44 = vrot.slane %v7380_v20, %v7527_v9 }
 0x2c9   : > { %v7609_v52 = vpop.xlane.xlu1 %2318  ;;  %4435 = vperm.xlu1 %6026, %v4294_v34   ;;  %v3454_v34 = vrot.slane %v7334_v31, %v7524_v27 }
 0x2ca   : > { %v7611_v1 = vpop.xlane.xlu0 %2316 }
 0x2cb   : > { %4624 = vperm.xlu0 %6027, %v4357_v11   ;;  %v4356_v31 = vcombine.low %v3454_v34, %v3461_v45  ;;  %v4361_v34 = vcombine.low %v3524_v61, %v3531_v4  ;;  %v2712_v45 = vrot.slane %v7380_v20, %v7524_v27  ;;  %v3615_v20 = vrot.slane %v7388_v22, %v7527_v9 }
 0x2cd   : > { %v7621_v51 = vpop.xlane.xlu1 %2186  ;;  %4627 = vperm.xlu1 %6026, %v4358_v28   ;;  %v2607_v28 = vrot.slane %v7302_v30, %v7527_v9  ;;  %v2579_v30 = vrot.slane %v7318_v17, %v7527_v9 }
 0x2ce   : > { %v7623_v10 = vpop.xlane.xlu0 %2184 }
 0x2cf   : > { %4450 = vperm.xlu0 %6027, %v4299_v39   ;;  %v4295_v37 = vcombine.low %v2600_v50, %v2607_v28  ;;  %v2642_v50 = vrot.slane %v7344_v2, %v7524_v27  ;;  %v4303_v28 = vcombine.low %v2712_v45, %v2719_v44 }
 0x2d1   : > { %v7633_v11 = vpop.xlane.xlu1 %2314  ;;  %4429 = vperm.xlu1 %6026, %v4292_v47   ;;  %v2572_v47 = vrot.slane %v7318_v17, %v7524_v27  ;;  %v2649_v17 = vrot.slane %v7344_v2, %v7527_v9  ;;  %v3545_v2 = vrot.slane %v7354_v15, %v7527_v9 }
 0x2d2   : > { %v7635_v24 = vpop.xlane.xlu0 %2312 }
 0x2d3   : > { %4642 = vperm.xlu0 %6027, %v4363_v62   ;;  %v4293_v32 = vcombine.low %v2572_v47, %v2579_v30  ;;  %v4298_v4 = vcombine.low %v2642_v50, %v2649_v17  ;;  %v2684_v30 = vrot.slane %v7398_v25, %v7524_v27  ;;  %v3580_v17 = vrot.slane %v7415_v6, %v7524_v27 }
 0x2d5   : > { %v7645_v39 = vpop.xlane.xlu1 %2198  ;;  %4621 = vperm.xlu1 %6026, %v4356_v31   ;;  %v3608_v31 = vrot.slane %v7388_v22, %v7524_v27  ;;  %v2691_v22 = vrot.slane %v7398_v25, %v7527_v9  ;;  %v3587_v25 = vrot.slane %v7415_v6, %v7527_v9  ;;  %v2775_v6 = vrot.slane %v7425_v29, %v7527_v9 }
 0x2d6   : > { %v7647_v46 = vpop.xlane.xlu0 %2196 }
 0x2d7   : > { %4444 = vperm.xlu0 %6027, %v4297_v55   ;;  %v4367_v47 = vcombine.low %v3608_v31, %v3615_v20  ;;  %v4301_v50 = vcombine.low %v2684_v30, %v2691_v22 }
 0x2d9   : > { %v7657_v62 = vpop.xlane.xlu1 %2326  ;;  %4438 = vperm.xlu1 %6026, %v4295_v37   ;;  %v3538_v37 = vrot.slane %v7354_v15, %v7524_v27  ;;  %v2621_v15 = vrot.slane %v7362_v13, %v7527_v9 }
 0x2da   : > { %v7659_v60 = vpop.xlane.xlu0 %2324 }
 0x2db   : > { %4636 = vperm.xlu0 %6027, %v4361_v34   ;;  %v4362_v44 = vcombine.low %v3538_v37, %v3545_v2  ;;  %v4365_v37 = vcombine.low %v3580_v17, %v3587_v25  ;;  %v2768_v2 = vrot.slane %v7425_v29, %v7524_v27  ;;  %v3671_v29 = vrot.slane %v7435_v43, %v7527_v9 }
 0x2dd   : > { %v7669_v55 = vpop.xlane.xlu1 %2194  ;;  %4432 = vperm.xlu1 %6026, %v4293_v32   ;;  %v2614_v32 = vrot.slane %v7362_v13, %v7524_v27  ;;  %v3517_v13 = vrot.slane %v7374_v38, %v7527_v9 }
 0x2de   : > { %v7671_v61 = vpop.xlane.xlu0 %2192 }
 0x2df   : > { %4462 = vperm.xlu0 %6027, %v4303_v28   ;;  %v4296_v20 = vcombine.low %v2614_v32, %v2621_v15  ;;  %v4307_v32 = vcombine.low %v2768_v2, %v2775_v6  ;;  %v3664_v15 = vrot.slane %v7435_v43, %v7524_v27  ;;  %v2747_v43 = vrot.slane %v7443_v40, %v7527_v9 }
 0x2e1   : > { %v7681_v34 = vpop.xlane.xlu1 %2322  ;;  %4447 = vperm.xlu1 %6026, %v4298_v4   ;;  %v3510_v4 = vrot.slane %v7374_v38, %v7524_v27  ;;  %v2705_v38 = vrot.slane %v7384_v23, %v7527_v9 }
 0x2e2   : > { %v7683_v45 = vpop.xlane.xlu0 %2320 }
 0x2e3   : > { %4654 = vperm.xlu0 %6027, %v4367_v47   ;;  %v4360_v22 = vcombine.low %v3510_v4, %v3517_v13  ;;  %v4371_v4 = vcombine.low %v3664_v15, %v3671_v29  ;;  %v2740_v13 = vrot.slane %v7443_v40, %v7524_v27  ;;  %v3643_v40 = vrot.slane %v7457_v0, %v7527_v9 }
 0x2e5   : > { %v7693_v28 = vpop.xlane.xlu1 %2206  ;;  %4639 = vperm.xlu1 %6026, %v4362_v44   ;;  %v2698_v44 = vrot.slane %v7384_v23, %v7524_v27  ;;  %v3601_v23 = vrot.slane %v7392_v59, %v7527_v9 }
 0x2e6   : > { %v7695_v31 = vpop.xlane.xlu0 %2204 }
 0x2e7   : > { %4456 = vperm.xlu0 %6027, %v4301_v50   ;;  %v4302_v25 = vcombine.low %v2698_v44, %v2705_v38  ;;  %v4305_v44 = vcombine.low %v2740_v13, %v2747_v43  ;;  %v3636_v38 = vrot.slane %v7457_v0, %v7524_v27  ;;  %v2831_v0 = vrot.slane %v7465_v19, %v7527_v9 }
 0x2e9   : > { %v7705_v47 = vpop.xlane.xlu1 %2334  ;;  %4441 = vperm.xlu1 %6026, %v4296_v20   ;;  %v3594_v20 = vrot.slane %v7392_v59, %v7524_v27  ;;  %v2677_v59 = vrot.slane %v7402_v18, %v7527_v9 }
 0x2ea   : > { %8881 = vst [vmem:[#allocation33_spill] sm:$0xff] %v7705_v47  ;;  %v7707_v30 = vpop.xlane.xlu0 %2332 }
 0x2eb   : > { %8882 = vst [vmem:[#allocation34_spill] sm:$0xff] %v7707_v30  ;;  %4648 = vperm.xlu0 %6027, %v4365_v37   ;;  %v4366_v6 = vcombine.low %v3594_v20, %v3601_v23  ;;  %v4369_v20 = vcombine.low %v3636_v38, %v3643_v40  ;;  %v2824_v23 = vrot.slane %v7465_v19, %v7524_v27 }
 0x2ec   : > { %v3727_v19 = vrot.slane %v7473_v7, %v7527_v9 }
 0x2ed   : > { %v7717_v50 = vpop.xlane.xlu1 %2202  ;;  %4633 = vperm.xlu1 %6026, %v4360_v22   ;;  %v2670_v22 = vrot.slane %v7402_v18, %v7524_v27  ;;  %v3573_v18 = vrot.slane %v7419_v57, %v7527_v9 }
 0x2ee   : > { %v7719_v17 = vpop.xlane.xlu0 %2200 }
 0x2ef   : > { %4474 = vperm.xlu0 %6027, %v4307_v32   ;;  %v4300_v29 = vcombine.low %v2670_v22, %v2677_v59  ;;  %v4311_v59 = vcombine.low %v2824_v23, %v2831_v0  ;;  %v2796_v23 = vrot.slane %v7479_v33, %v7524_v27 }
 0x2f1   : > { %v7729_v37 = vpop.xlane.xlu1 %2330  ;;  %4459 = vperm.xlu1 %6026, %v4302_v25   ;;  %v3566_v25 = vrot.slane %v7419_v57, %v7524_v27 }
 0x2f2   : > { %v7731_v2 = vpop.xlane.xlu0 %2328 }
 0x2f3   : > { %4666 = vperm.xlu0 %6027, %v4371_v4   ;;  %v4364_v43 = vcombine.low %v3566_v25, %v3573_v18  ;;  %v8884_v25 = vld [vmem:[#allocation18_spill] sm:$0xff] }
 0x2f4   : > { %v3650_v18 = vrot.slane %v8884_v25, %v7524_v27 }
 0x2f5   : > { %v7741_v32 = vpop.xlane.xlu1 %2214  ;;  %4651 = vperm.xlu1 %6026, %v4366_v6   ;;  %v8883_v6 = vld [vmem:[#allocation17_spill] sm:$0xff] }
 0x2f6   : > { %v7743_v15 = vpop.xlane.xlu0 %2212  ;;  %v2754_v22 = vrot.slane %v8883_v6, %v7524_v27  ;;  %v2761_v57 = vrot.slane %v8883_v6, %v7527_v9  ;;  %v3657_v6 = vrot.slane %v8884_v25, %v7527_v9 }
 0x2f7   : > { %4468 = vperm.xlu0 %6027, %v4305_v44   ;;  %v3720_v44 = vrot.slane %v7473_v7, %v7524_v27  ;;  %v2803_v7 = vrot.slane %v7479_v33, %v7527_v9  ;;  %v3699_v33 = vrot.slane %v7485_v49, %v7527_v9 }
 0x2f9   : > { %v7753_v4 = vpop.xlane.xlu1 %2342  ;;  %4453 = vperm.xlu1 %6026, %v4300_v29   ;;  %v4306_v29 = vcombine.low %v2754_v22, %v2761_v57  ;;  %v4370_v22 = vcombine.low %v3650_v18, %v3657_v6  ;;  %v8885_v57 = vld [vmem:[#allocation19_spill] sm:$0xff]  ;;  %v3622_v6 = vrot.slane %v7459_v8, %v7524_v27 }
 0x2fa   : > { %v7755_v13 = vpop.xlane.xlu0 %2340  ;;  %v2726_v47 = vrot.slane %v8885_v57, %v7524_v27  ;;  %v2733_v25 = vrot.slane %v8885_v57, %v7527_v9  ;;  %v3629_v57 = vrot.slane %v7459_v8, %v7527_v9 }
 0x2fb   : > { %4660 = vperm.xlu0 %6027, %v4369_v20   ;;  %v4375_v20 = vcombine.low %v3720_v44, %v3727_v19  ;;  %v3692_v44 = vrot.slane %v7485_v49, %v7524_v27  ;;  %v2887_v49 = vrot.slane %v7491_v16, %v7527_v9 }
 0x2fc   : > { %v4304_v18 = vcombine.low %v2726_v47, %v2733_v25  ;;  %v4368_v47 = vcombine.low %v3622_v6, %v3629_v57  ;;  %v8887_v25 = vld [vmem:[#allocation20_spill] sm:$0xff]  ;;  %v8889_v57 = vld [vmem:[#allocation21_spill] sm:$0xff] }
 0x2fd   : > { %v7765_v38 = vpop.xlane.xlu1 %2210  ;;  %4645 = vperm.xlu1 %6026, %v4364_v43   ;;  %v2810_v30 = vrot.slane %v8887_v25, %v7524_v27  ;;  %v2817_v8 = vrot.slane %v8887_v25, %v7527_v9  ;;  %v3713_v25 = vrot.slane %v8889_v57, %v7527_v9 }
 0x2fe   : > { %v7767_v40 = vpop.xlane.xlu0 %2208 }
 0x2ff   : > { %4486 = vperm.xlu0 %6027, %v4311_v59   ;;  %v4309_v59 = vcombine.low %v2796_v23, %v2803_v7  ;;  %v2880_v23 = vrot.slane %v7491_v16, %v7524_v27  ;;  %v3783_v16 = vrot.slane %v7497_v3, %v7527_v9  ;;  %v4310_v6 = vcombine.low %v2810_v30, %v2817_v8  ;;  %v8891_v8 = vld [vmem:[#allocation23_spill] sm:$0xff] }
 0x301   : > { %v7777_v0 = vpop.xlane.xlu1 %2338  ;;  %4471 = vperm.xlu1 %6026, %v4306_v29  }
 0x302   : > { %v7779_v43 = vpop.xlane.xlu0 %2336 }
 0x303   : > { %4678 = vperm.xlu0 %6027, %v4375_v20   ;;  %v4373_v20 = vcombine.low %v3692_v44, %v3699_v33  ;;  %v3776_v44 = vrot.slane %v7497_v3, %v7524_v27  ;;  %v2859_v3 = vrot.slane %v7503_v42, %v7527_v9 }
 0x305   : > { %v7789_v19 = vpop.xlane.xlu1 %2222  ;;  %4663 = vperm.xlu1 %6026, %v4370_v22  }
 0x306   : > { %v7791_v29 = vpop.xlane.xlu0 %2220 }
 0x307   : > { %4480 = vperm.xlu0 %6027, %v4309_v59   ;;  %v4315_v59 = vcombine.low %v2880_v23, %v2887_v49  ;;  %v2852_v23 = vrot.slane %v7503_v42, %v7524_v27  ;;  %v3755_v42 = vrot.slane %v7509_v36, %v7527_v9 }
 0x309   : > { %v7801_v7 = vpop.xlane.xlu1 %2350  ;;  %4465 = vperm.xlu1 %6026, %v4304_v18  }
 0x30a   : > { %8886 = vst [vmem:[#allocation36_spill] sm:$0xff] %v7801_v7  ;;  %v7803_v22 = vpop.xlane.xlu0 %2348  ;;  %v3706_v7 = vrot.slane %v8889_v57, %v7524_v27  ;;  %v2789_v57 = vrot.slane %v8891_v8, %v7527_v9 }
 0x30b   : > { %4672 = vperm.xlu0 %6027, %v4373_v20   ;;  %v4379_v20 = vcombine.low %v3776_v44, %v3783_v16  ;;  %v3748_v44 = vrot.slane %v7509_v36, %v7524_v27  ;;  %v2943_v36 = vrot.slane %v7515_v41, %v7527_v9 }
 0x30c   : > { %v4374_v30 = vcombine.low %v3706_v7, %v3713_v25  ;;  %v8893_v25 = vld [vmem:[#allocation22_spill] sm:$0xff] }
 0x30d   : > { %v7813_v33 = vpop.xlane.xlu1 %2218  ;;  %4657 = vperm.xlu1 %6026, %v4368_v47  }
 0x30e   : > { %v7815_v18 = vpop.xlane.xlu0 %2216 }
 0x30f   : > { %8888 = vst [vmem:[#allocation35_spill] sm:$0xff] %v7815_v18  ;;  %4498 = vperm.xlu0 %6027, %v4315_v59   ;;  %v2782_v18 = vrot.slane %v8891_v8, %v7524_v27  ;;  %v4313_v59 = vcombine.low %v2852_v23, %v2859_v3  ;;  %v3685_v8 = vrot.slane %v8893_v25, %v7527_v9 }
 0x310   : > { %v2936_v23 = vrot.slane %v7515_v41, %v7524_v27  ;;  %v3839_v41 = vrot.slane %v7519_v56, %v7527_v9 }
 0x311   : > { %v7825_v49 = vpop.xlane.xlu1 %2346  ;;  %4483 = vperm.xlu1 %6026, %v4310_v6   ;;  %v4308_v7 = vcombine.low %v2782_v18, %v2789_v57  ;;  %v2866_v57 = vrot.slane %v7493_v14, %v7524_v27 }
 0x312   : > { %8890 = vst [vmem:[#allocation37_spill] sm:$0xff] %v7825_v49  ;;  %v7827_v47 = vpop.xlane.xlu0 %2344  ;;  %v3678_v49 = vrot.slane %v8893_v25, %v7524_v27  ;;  %v2873_v25 = vrot.slane %v7493_v14, %v7527_v9  ;;  %v3769_v14 = vrot.slane %v7499_v58, %v7527_v9 }
 0x313   : > { %4690 = vperm.xlu0 %6027, %v4379_v20   ;;  %v4377_v20 = vcombine.low %v3748_v44, %v3755_v42  ;;  %v3832_v44 = vrot.slane %v7519_v56, %v7524_v27  ;;  %v2915_v56 = vrot.slane %v7529_v35, %v7527_v9 }
 0x314   : > { %v4372_v18 = vcombine.low %v3678_v49, %v3685_v8  ;;  %v4314_v49 = vcombine.low %v2866_v57, %v2873_v25  ;;  %v3762_v8 = vrot.slane %v7499_v58, %v7524_v27  ;;  %v2838_v25 = vrot.slane %v7505_v63, %v7524_v27 }
 0x315   : > { %v7837_v16 = vpop.xlane.xlu1 %2230  ;;  %4675 = vperm.xlu1 %6026, %v4374_v30   ;;  %v2845_v58 = vrot.slane %v7505_v63, %v7527_v9 }
 0x316   : > { %v7839_v6 = vpop.xlane.xlu0 %2228  ;;  %v4378_v57 = vcombine.low %v3762_v8, %v3769_v14  ;;  %v8898_v14 = vld [vmem:[#allocation24_spill] sm:$0xff] }
 0x317   : > { %8892 = vst [vmem:[#allocation38_spill] sm:$0xff] %v7839_v6  ;;  %4492 = vperm.xlu0 %6027, %v4313_v59   ;;  %v4319_v59 = vcombine.low %v2936_v23, %v2943_v36  ;;  %v2908_v23 = vrot.slane %v7529_v35, %v7524_v27  ;;  %v4312_v8 = vcombine.low %v2838_v25, %v2845_v58  ;;  %v8900_v58 = vld [vmem:[#allocation25_spill] sm:$0xff] }
 0x318   : > { %v3741_v63 = vrot.slane %v8898_v14, %v7527_v9 }
 0x319   : > { %v7849_v3 = vpop.xlane.xlu1 %2358  ;;  %4477 = vperm.xlu1 %6026, %v4308_v7  }
 0x31a   : > { %v7851_v30 = vpop.xlane.xlu0 %2356 }
 0x31b   : > { %4684 = vperm.xlu0 %6027, %v4377_v20   ;;  %v4383_v20 = vcombine.low %v3832_v44, %v3839_v41  ;;  %v8896_v44 = vld [vmem:[#allocation27_spill] sm:$0xff] }
 0x31c   : > { %v3804_v41 = vrot.slane %v8896_v44, %v7524_v27  ;;  %v3811_v35 = vrot.slane %v8896_v44, %v7527_v9 }
 0x31d   : > { %v7861_v42 = vpop.xlane.xlu1 %2226  ;;  %4669 = vperm.xlu1 %6026, %v4372_v18  }
 0x31e   : > { %v7863_v7 = vpop.xlane.xlu0 %2224 }
 0x31f   : > { %8894 = vst [vmem:[#allocation40_spill] sm:$0xff] %v7863_v7  ;;  %4510 = vperm.xlu0 %6027, %v4319_v59   ;;  %v4317_v59 = vcombine.low %v2908_v23, %v2915_v56  ;;  %v2992_v23 = vrot.slane %v7549_v48, %v7524_v27  ;;  %v2999_v56 = vrot.slane %v7549_v48, %v7527_v9 }
 0x321   : > { %v7873_v36 = vpop.xlane.xlu1 %2354  ;;  %4495 = vperm.xlu1 %6026, %v4314_v49  }
 0x322   : > { %8895 = vst [vmem:[#allocation41_spill] sm:$0xff] %v7873_v36  ;;  %v7875_v18 = vpop.xlane.xlu0 %2352  ;;  %v3734_v36 = vrot.slane %v8898_v14, %v7524_v27  ;;  %v2929_v14 = vrot.slane %v8900_v58, %v7527_v9 }
 0x323   : > { %4702 = vperm.xlu0 %6027, %v4383_v20   ;;  %v4381_v20 = vcombine.low %v3804_v41, %v3811_v35  ;;  %v8901_v41 = vld [vmem:[#allocation32_spill] sm:$0xff] }
 0x324   : > { %v4376_v25 = vcombine.low %v3734_v36, %v3741_v63  ;;  %v3888_v35 = vrot.slane %v8901_v41, %v7524_v27  ;;  %v3895_v48 = vrot.slane %v8901_v41, %v7527_v9  ;;  %v8902_v36 = vld [vmem:[#allocation26_spill] sm:$0xff] }
 0x325   : > { %v7885_v7 = vpop.xlane.xlu1 %2238  ;;  %4687 = vperm.xlu1 %6026, %v4378_v57   ;;  %v3818_v63 = vrot.slane %v8902_v36, %v7524_v27 }
 0x326   : > { %v7887_v49 = vpop.xlane.xlu0 %2236 }
 0x327   : > { %8897 = vst [vmem:[#allocation39_spill] sm:$0xff] %v7887_v49  ;;  %4504 = vperm.xlu0 %6027, %v4317_v59   ;;  %v2922_v49 = vrot.slane %v8900_v58, %v7524_v27  ;;  %v4323_v59 = vcombine.low %v2992_v23, %v2999_v56  ;;  %v2964_v23 = vrot.slane %v7573_v12, %v7524_v27 }
 0x328   : > { %v2971_v56 = vrot.slane %v7573_v12, %v7527_v9 }
 0x329   : > { %v7897_v44 = vpop.xlane.xlu1 %2366  ;;  %4489 = vperm.xlu1 %6026, %v4312_v8   ;;  %v4318_v8 = vcombine.low %v2922_v49, %v2929_v14 }
 0x32a   : > { %8899 = vst [vmem:[#allocation17_spill] sm:$0xff] %v7897_v44  ;;  %v7899_v57 = vpop.xlane.xlu0 %2364  ;;  %v3825_v44 = vrot.slane %v8902_v36, %v7527_v9 }
 0x32b   : > { %4696 = vperm.xlu0 %6027, %v4381_v20   ;;  %v4387_v20 = vcombine.low %v3888_v35, %v3895_v48  ;;  %v3860_v35 = vrot.slane %v7585_v21, %v7524_v27  ;;  %v3867_v48 = vrot.slane %v7585_v21, %v7527_v9  ;;  %v3055_v21 = vrot.slane %v7597_v53, %v7527_v9 }
 0x32c   : > { %v4382_v49 = vcombine.low %v3818_v63, %v3825_v44 }
 0x32d   : > { %v7909_v6 = vpop.xlane.xlu1 %2234  ;;  %4681 = vperm.xlu1 %6026, %v4376_v25   ;;  %v8904_v25 = vld [vmem:[#allocation28_spill] sm:$0xff] }
 0x32e   : > { %v7915_v58 = vpop.xlane.xlu0 %2232  ;;  %v2894_v14 = vrot.slane %v8904_v25, %v7524_v27  ;;  %v2901_v36 = vrot.slane %v8904_v25, %v7527_v9 }
 0x32f   : > { %4522 = vperm.xlu0 %6027, %v4323_v59   ;;  %8903 = vst [vmem:[#allocation18_spill] sm:$0xff] %v7915_v58  ;;  %v4321_v59 = vcombine.low %v2964_v23, %v2971_v56  ;;  %v3048_v23 = vrot.slane %v7597_v53, %v7524_v27  ;;  %v3951_v53 = vrot.slane %v7609_v52, %v7527_v9 }
 0x330   : > { %v4316_v44 = vcombine.low %v2894_v14, %v2901_v36  ;;  %v8908_v36 = vld [vmem:[#allocation29_spill] sm:$0xff] }
 0x331   : > { %v7921_v41 = vpop.xlane.xlu1 %2362  ;;  %4507 = vperm.xlu1 %6026, %v4318_v8   ;;  %v8906_v8 = vld [vmem:[#allocation31_spill] sm:$0xff] }
 0x332   : > { %v7933_v12 = vpop.xlane.xlu0 %2360  ;;  %v3790_v63 = vrot.slane %v8906_v8, %v7524_v27  ;;  %v3797_v25 = vrot.slane %v8906_v8, %v7527_v9  ;;  %v2985_v8 = vrot.slane %v8908_v36, %v7527_v9 }
 0x333   : > { %4714 = vperm.xlu0 %6027, %v4387_v20   ;;  %v4385_v20 = vcombine.low %v3860_v35, %v3867_v48  ;;  %v3944_v35 = vrot.slane %v7609_v52, %v7524_v27  ;;  %v3027_v52 = vrot.slane %v7621_v51, %v7527_v9 }
 0x334   : > { %v4380_v14 = vcombine.low %v3790_v63, %v3797_v25  ;;  %v8909_v25 = vld [vmem:[#allocation30_spill] sm:$0xff] }
 0x335   : > { %v7931_v58 = vpop.permute.xlu1 %4423  ;;  %4699 = vperm.xlu1 %6026, %v4382_v49  }
 0x336   : > { %8905 = vst [vmem:[#allocation19_spill] sm:$0xff] %v7931_v58  ;;  %v2978_v58 = vrot.slane %v8908_v36, %v7524_v27  ;;  %v3881_v36 = vrot.slane %v8909_v25, %v7527_v9 }
 0x337   : > { %4516 = vperm.xlu0 %6027, %v4321_v59   ;;  %v4327_v59 = vcombine.low %v3048_v23, %v3055_v21  ;;  %v3020_v23 = vrot.slane %v7621_v51, %v7524_v27  ;;  %v3923_v51 = vrot.slane %v7633_v11, %v7527_v9 }
 0x338   : > { %v4322_v63 = vcombine.low %v2978_v58, %v2985_v8  ;;  %v2950_v8 = vrot.slane %v7575_v5, %v7524_v27 }
 0x339   : > { %v7943_v56 = vpop.permute.xlu1 %4615  ;;  %4501 = vperm.xlu1 %6026, %v4316_v44  }
 0x33a   : > { %v7945_v49 = vpop.permute.xlu0 %4417 }
 0x33b   : > { %8907 = vst [vmem:[#allocation20_spill] sm:$0xff] %v7945_v49  ;;  %4708 = vperm.xlu0 %6027, %v4385_v20   ;;  %v3874_v49 = vrot.slane %v8909_v25, %v7524_v27  ;;  %v4391_v20 = vcombine.low %v3944_v35, %v3951_v53  ;;  %v2957_v25 = vrot.slane %v7575_v5, %v7527_v9 }
 0x33c   : > { %v3916_v35 = vrot.slane %v7633_v11, %v7524_v27  ;;  %v3853_v5 = vrot.slane %v7587_v54, %v7527_v9  ;;  %v3111_v11 = vrot.slane %v7645_v39, %v7527_v9 }
 0x33d   : > { %v7955_v48 = vpop.permute.xlu1 %4609  ;;  %4693 = vperm.xlu1 %6026, %v4380_v14   ;;  %v4386_v58 = vcombine.low %v3874_v49, %v3881_v36  ;;  %v4320_v49 = vcombine.low %v2950_v8, %v2957_v25  ;;  %v3846_v36 = vrot.slane %v7587_v54, %v7524_v27  ;;  %v3034_v25 = vrot.slane %v7599_v26, %v7524_v27 }
 0x33e   : > { %v7957_v44 = vpop.permute.xlu0 %4618  ;;  %v3041_v54 = vrot.slane %v7599_v26, %v7527_v9  ;;  %v3937_v26 = vrot.slane %v7611_v1, %v7527_v9 }
 0x33f   : > { %4534 = vperm.xlu0 %6027, %v4327_v59   ;;  %v4325_v59 = vcombine.low %v3020_v23, %v3027_v52  ;;  %v3104_v23 = vrot.slane %v7645_v39, %v7524_v27  ;;  %v4384_v8 = vcombine.low %v3846_v36, %v3853_v5  ;;  %v3083_v39 = vrot.slane %v7669_v55, %v7527_v9 }
 0x340   : > { %v4326_v36 = vcombine.low %v3034_v25, %v3041_v54  ;;  %v3930_v5 = vrot.slane %v7611_v1, %v7524_v27  ;;  %v3006_v54 = vrot.slane %v7623_v10, %v7524_v27  ;;  %v3013_v1 = vrot.slane %v7623_v10, %v7527_v9 }
 0x341   : > { %v7967_v21 = vpop.permute.xlu1 %4426  ;;  %4519 = vperm.xlu1 %6026, %v4322_v63   ;;  %v3909_v10 = vrot.slane %v7635_v24, %v7527_v9 }
 0x342   : > { %8910 = vst [vmem:[#allocation21_spill] sm:$0xff] %v7967_v21  ;;  %v7969_v14 = vpop.permute.xlu0 %4612  ;;  %v4390_v25 = vcombine.low %v3930_v5, %v3937_v26  ;;  %v4324_v5 = vcombine.low %v3006_v54, %v3013_v1  ;;  %v3902_v26 = vrot.slane %v7635_v24, %v7524_v27  ;;  %v3090_v24 = vrot.slane %v7647_v46, %v7524_v27 }
 0x343   : > { %4726 = vperm.xlu0 %6027, %v4391_v20   ;;  %v4389_v20 = vcombine.low %v3916_v35, %v3923_v51  ;;  %v3076_v35 = vrot.slane %v7669_v55, %v7524_v27  ;;  %v3979_v55 = vrot.slane %v7681_v34, %v7527_v9  ;;  %v3958_v21 = vrot.slane %v7683_v45, %v7524_v27 }
 0x345   : > { %v7979_v53 = vpop.permute.xlu1 %4420  ;;  %4711 = vperm.xlu1 %6026, %v4386_v58  }
 0x346   : > { %v7981_v63 = vpop.permute.xlu0 %4630 }
 0x347   : > { %4528 = vperm.xlu0 %6027, %v4325_v59   ;;  %v4331_v59 = vcombine.low %v3104_v23, %v3111_v11  ;;  %v3972_v23 = vrot.slane %v7681_v34, %v7524_v27  ;;  %v3167_v34 = vrot.slane %v7693_v28, %v7527_v9 }
 0x349   : > { %v7991_v52 = vpop.permute.xlu1 %4435  ;;  %4513 = vperm.xlu1 %6026, %v4320_v49  }
 0x34a   : > { %8911 = vst [vmem:[#allocation23_spill] sm:$0xff] %v7991_v52  ;;  %v7993_v58 = vpop.permute.xlu0 %4624 }
 0x34b   : > { %4720 = vperm.xlu0 %6027, %v4389_v20   ;;  %v4329_v20 = vcombine.low %v3076_v35, %v3083_v39  ;;  %v3160_v35 = vrot.slane %v7693_v28, %v7524_v27  ;;  %v3132_v28 = vrot.slane %v7717_v50, %v7524_v27 }
 0x34d   : > { %v8003_v51 = vpop.permute.xlu1 %4627  ;;  %4705 = vperm.xlu1 %6026, %v4384_v8  }
 0x34e   : > { %v8005_v49 = vpop.permute.xlu0 %4450 }
 0x34f   : > { %8912 = vst [vmem:[#allocation22_spill] sm:$0xff] %v8005_v49  ;;  %4546 = vperm.xlu0 %6027, %v4331_v59   ;;  %v4393_v59 = vcombine.low %v3972_v23, %v3979_v55  ;;  %v4335_v55 = vcombine.low %v3160_v35, %v3167_v34  ;;  %v4098_v34 = vrot.slane %v7755_v13, %v7524_v27 }
 0x351   : > { %v8015_v11 = vpop.permute.xlu1 %4429  ;;  %4531 = vperm.xlu1 %6026, %v4326_v36  }
 0x352   : > { %v8017_v8 = vpop.permute.xlu0 %4642 }
 0x353   : > { %4540 = vperm.xlu0 %6027, %v4329_v20   ;;  %v8914_v20 = vlaneseq }
 0x355   : > { %v8027_v39 = vpop.permute.xlu1 %4621  ;;  %4723 = vperm.xlu1 %6026, %v4390_v25   ;;  %v8036_v23 = vand.u32 127, %v8914_v20  ;;  %v3139_v25 = vrot.slane %v7717_v50, %v7527_v9  ;;  %v4105_v50 = vrot.slane %v7755_v13, %v7527_v9  ;;  %v8916_v20 = vld [vmem:[#allocation16_spill] sm:$0xff] }
 0x356   : > { %v8029_v36 = vpop.permute.xlu0 %4444 }
 0x357   : > { %8913 = vst [vmem:[#allocation27_spill] sm:$0xff] %v8029_v36  ;;  %4732 = vperm.xlu0 %6027, %v4393_v59   ;;  %v4806_v49 = vadd.s32 4294967288, %v8036_v23  ;;  %v4388_v36 = vcombine.low %v3902_v26, %v3909_v10  ;;  %v3097_v59 = vrot.slane %v7647_v46, %v7527_v9  ;;  %v4333_v35 = vcombine.low %v3132_v28, %v3139_v25 }
 0x358   : > { %v3986_v46 = vrot.slane %v7659_v60, %v7524_v27  ;;  %v4813_v28 = vadd.s32 4294967280, %v8036_v23  ;;  %v8069_v13 = vsub.s32 %v8036_v23, %v8916_v20  ;;  %v4402_v25 = vcombine.low %v4098_v34, %v4105_v50 }
 0x359   : > { %v8043_v54 = vpop.permute.xlu1 %4438  ;;  %4525 = vperm.xlu1 %6026, %v4324_v5   ;;  %v4330_v10 = vcombine.low %v3090_v24, %v3097_v59  ;;  %v4077_v24 = vrot.slane %v7779_v43, %v7527_v9  ;;  %v3062_v34 = vrot.slane %v7671_v61, %v7524_v27  ;;  %v3069_v50 = vrot.slane %v7671_v61, %v7527_v9 }
 0x35a   : > { %8915 = vst [vmem:[#allocation24_spill] sm:$0xff] %v8043_v54  ;;  %v8045_v1 = vpop.permute.xlu0 %4636  ;;  %v8056_v54 = vsub.s32 %v4806_v49, %v8916_v20  ;;  %v4820_v49 = vadd.s32 4294967272, %v8036_v23 }
 0x35b   : > { %4558 = vperm.xlu0 %6027, %v4335_v55   ;;  %v3993_v55 = vrot.slane %v7659_v60, %v7527_v9 }
 0x35c   : > { %v5155_v59 = vrot.slane %v7969_v14, %v8056_v54  ;;  %v8090_v14 = vsub.s32 %v4813_v28, %v8916_v20 }
 0x35d   : > { %v8058_v5 = vpop.permute.xlu1 %4432  ;;  %4717 = vperm.xlu1 %6026, %v4388_v36   ;;  %v4070_v36 = vrot.slane %v7779_v43, %v7524_v27  ;;  %v4394_v52 = vcombine.low %v3986_v46, %v3993_v55  ;;  %v5151_v43 = vrot.slane %v7955_v48, %v8069_v13  ;;  %v3216_v46 = vrot.slane %v7741_v32, %v7524_v27 }
 0x35e   : > { %8917 = vst [vmem:[#allocation25_spill] sm:$0xff] %v8058_v5  ;;  %v8060_v26 = vpop.permute.xlu0 %4462  ;;  %v3223_v55 = vrot.slane %v7741_v32, %v7527_v9  ;;  %v5160_v28 = vrot.slane %v7943_v56, %v8090_v14  ;;  %v4328_v5 = vcombine.low %v3062_v34, %v3069_v50  ;;  %v3965_v32 = vrot.slane %v7683_v45, %v7527_v9 }
 0x35f   : > { %8918 = vst [vmem:[#allocation32_spill] sm:$0xff] %v8060_v26  ;;  %4552 = vperm.xlu0 %6027, %v4333_v35   ;;  %v4827_v35 = vadd.s32 4294967264, %v8036_v23  ;;  %v4400_v61 = vcombine.low %v4070_v36, %v4077_v24 }
 0x360   : > { %v4339_v24 = vcombine.low %v3216_v46, %v3223_v55 }
 0x361   : > { %v8078_v60 = vpop.permute.xlu1 %4447  ;;  %4543 = vperm.xlu1 %6026, %v4330_v10   ;;  %v8093_v10 = vsub.s32 %v4820_v49, %v8916_v20  ;;  %v8106_v49 = vsub.s32 %v4827_v35, %v8916_v20  ;;  %v3195_v35 = vrot.slane %v7765_v38, %v7527_v9 }
 0x362   : > { %8919 = vst [vmem:[#allocation26_spill] sm:$0xff] %v8078_v60  ;;  %v8081_v26 = vpop.permute.xlu0 %4654  ;;  %v5156_v60 = vsel %vm4811_vm0, %v5155_v59, %v5151_v43  ;;  %v3188_v59 = vrot.slane %v7765_v38, %v7524_v27  ;;  %v4007_v43 = vrot.slane %v7657_v62, %v7527_v9  ;;  %v4392_v38 = vcombine.low %v3958_v21, %v3965_v32 }
 0x363   : > { %8920 = vst [vmem:[#allocation28_spill] sm:$0xff] %v8081_v26  ;;  %4759 = vperm.xlu0 %6027, %v4402_v25   ;;  %v4834_v26 = vadd.s32 4294967256, %v8036_v23  ;;  %v5161_v36 = vsel %vm4818_vm1, %v5160_v28, %v5156_v60  ;;  %v5170_v56 = vrot.slane %v8027_v39, %v8106_v49  ;;  %v5165_v45 = vrot.slane %v7957_v44, %v8093_v10 }
 0x364   : > { %v4841_v60 = vadd.s32 4294967248, %v8036_v23  ;;  %v4000_v39 = vrot.slane %v7657_v62, %v7524_v27  ;;  %v4337_v55 = vcombine.low %v3188_v59, %v3195_v35  ;;  %v4161_v28 = vrot.slane %v7803_v22, %v7527_v9 }
 0x365   : > { %v8101_v48 = vpop.permute.xlu1 %4639  ;;  %4735 = vperm.xlu1 %6026, %v4394_v52   ;;  %v8116_v52 = vsub.s32 %v4834_v26, %v8916_v20  ;;  %v4848_v26 = vadd.s32 4294967240, %v8036_v23  ;;  %v5166_v46 = vsel %vm4825_vm2, %v5165_v45, %v5161_v36  ;;  %v4862_v35 = vadd.s32 4294967224, %v8036_v23 }
 0x366   : > { %v8108_v25 = vpop.permute.xlu0 %4456  ;;  %v5171_v44 = vsel %vm4832_vm3, %v5170_v56, %v5166_v46  ;;  %v8149_v32 = vsub.s32 %v4841_v60, %v8916_v20  ;;  %v4395_v56 = vcombine.low %v4000_v39, %v4007_v43  ;;  %v4126_v60 = vrot.slane %v7827_v47, %v7524_v27 }
 0x367   : > { %8921 = vst [vmem:[#allocation31_spill] sm:$0xff] %v8108_v25  ;;  %4753 = vperm.xlu0 %6027, %v4400_v61   ;;  %v4154_v61 = vrot.slane %v7803_v22, %v7524_v27  ;;  %v5175_v25 = vrot.slane %v7993_v58, %v8116_v52  ;;  %v8146_v21 = vsub.s32 %v4848_v26, %v8916_v20 }
 0x368   : > { %v3153_v22 = vrot.slane %v7695_v31, %v7527_v9  ;;  %v5180_v59 = vrot.slane %v8003_v51, %v8149_v32  ;;  %v4133_v39 = vrot.slane %v7827_v47, %v7527_v9  ;;  %v3118_v46 = vrot.slane %v7719_v17, %v7524_v27 }
 0x369   : > { %v8126_v34 = vpop.permute.xlu1 %4441  ;;  %4537 = vperm.xlu1 %6026, %v4328_v5   ;;  %v4855_v5 = vadd.s32 4294967232, %v8036_v23  ;;  %v5176_v58 = vsel %vm4839_vm4, %v5175_v25, %v5171_v44  ;;  %v4406_v26 = vcombine.low %v4154_v61, %v4161_v28  ;;  %v3125_v44 = vrot.slane %v7719_v17, %v7527_v9 }
 0x36a   : > { %v8130_v50 = vpop.permute.xlu0 %4648  ;;  %v5185_v47 = vrot.slane %v7981_v63, %v8146_v21  ;;  %v3272_v61 = vrot.slane %v7789_v19, %v7524_v27  ;;  %v3279_v28 = vrot.slane %v7789_v19, %v7527_v9  ;;  %v4876_v63 = vadd.s32 4294967208, %v8036_v23 }
 0x36b   : > { %4570 = vperm.xlu0 %6027, %v4339_v24   ;;  %v3146_v24 = vrot.slane %v7695_v31, %v7524_v27  ;;  %v8162_v45 = vsub.s32 %v4855_v5, %v8916_v20  ;;  %v5181_v31 = vsel %vm4846_vm5, %v5180_v59, %v5176_v58  ;;  %v8181_v5 = vsub.s32 %v4862_v35, %v8916_v20 }
 0x36c   : > { %v4332_v58 = vcombine.low %v3118_v46, %v3125_v44  ;;  %v4014_v59 = vrot.slane %v7731_v2, %v7524_v27  ;;  %v4021_v35 = vrot.slane %v7731_v2, %v7527_v9  ;;  %v4035_v44 = vrot.slane %v7729_v37, %v7527_v9 }
 0x36d   : > { %v4634_v62 = vpop.permute.xlu1 %4633  ;;  %4729 = vperm.xlu1 %6026, %v4392_v38   ;;  %v4334_v38 = vcombine.low %v3146_v24, %v3153_v22  ;;  %v5195_v19 = vrot.slane %v8045_v1, %v8181_v5  ;;  %v4028_v1 = vrot.slane %v7729_v37, %v7524_v27 }
 0x36e   : > { %v8151_v36 = vpop.permute.xlu0 %4474  ;;  %v5190_v51 = vrot.slane %v4634_v62, %v8162_v45  ;;  %v4404_v62 = vcombine.low %v4126_v60, %v4133_v39  ;;  %v4890_v60 = vadd.s32 4294967192, %v8036_v23  ;;  %v4883_v39 = vadd.s32 4294967200, %v8036_v23 }
 0x36f   : > { %4564 = vperm.xlu0 %6027, %v4337_v55   ;;  %v4869_v55 = vadd.s32 4294967216, %v8036_v23 }
 0x371   : > { %v8168_v43 = vpop.permute.xlu1 %4459  ;;  %4738 = vperm.xlu1 %6026, %v4395_v56   ;;  %v5186_v56 = vsel %vm4853_vm6, %v5185_v47, %v5181_v31  ;;  %v4343_v31 = vcombine.low %v3272_v61, %v3279_v28  ;;  %v4396_v61 = vcombine.low %v4014_v59, %v4021_v35  ;;  %v8222_v28 = vsub.s32 %v4876_v63, %v8916_v20 }
 0x372   : > { %v8172_v25 = vpop.permute.xlu0 %4666  ;;  %v5191_v24 = vsel %vm4860_vm7, %v5190_v51, %v5186_v56  ;;  %v3244_v51 = vrot.slane %v7813_v33, %v7524_v27  ;;  %v4397_v59 = vcombine.low %v4028_v1, %v4035_v44  ;;  %v3202_v35 = vrot.slane %v7743_v15, %v7524_v27 }
 0x373   : > { %4771 = vperm.xlu0 %6027, %v4406_v26   ;;  %v8202_v26 = vsub.s32 %v4869_v55, %v8916_v20  ;;  %v5196_v2 = vsel %vm4867_vm8, %v5195_v19, %v5191_v24  ;;  %v4217_v24 = vrot.slane %v7851_v30, %v7527_v9  ;;  %v5205_v63 = vrot.slane %v8017_v8, %v8222_v28 }
 0x375   : > { %v8189_v17 = vpop.permute.xlu1 %4651  ;;  %4555 = vperm.xlu1 %6026, %v4334_v38   ;;  %v3251_v38 = vrot.slane %v7813_v33, %v7527_v9  ;;  %v5200_v47 = vrot.slane %v8101_v48, %v8202_v26  ;;  %v8225_v33 = vsub.s32 %v4890_v60, %v8916_v20  ;;  %v4210_v48 = vrot.slane %v7851_v30, %v7524_v27 }
 0x376   : > { %v8193_v22 = vpop.permute.xlu0 %4468 }
 0x377   : > { %4765 = vperm.xlu0 %6027, %v4404_v62   ;;  %v8228_v62 = vsub.s32 %v4883_v39, %v8916_v20  ;;  %v5201_v56 = vsel %vm4874_vm9, %v5200_v47, %v5196_v2  ;;  %v4341_v37 = vcombine.low %v3244_v51, %v3251_v38  ;;  %v3209_v39 = vrot.slane %v7743_v15, %v7527_v9 }
 0x378   : > { %v5215_v30 = vrot.slane %v8130_v50, %v8225_v33  ;;  %v5206_v8 = vsel %vm8795_vm10, %v5205_v63, %v5201_v56  ;;  %v4410_v51 = vcombine.low %v4210_v48, %v4217_v24  ;;  %v4182_v38 = vrot.slane %v7875_v18, %v7524_v27 }
 0x379   : > { %v8211_v46 = vpop.permute.xlu1 %4453  ;;  %4549 = vperm.xlu1 %6026, %v4332_v58   ;;  %v4189_v2 = vrot.slane %v7875_v18, %v7527_v9  ;;  %v4338_v44 = vcombine.low %v3202_v35, %v3209_v39  ;;  %v3174_v47 = vrot.slane %v7767_v40, %v7524_v27  ;;  %v3328_v56 = vrot.slane %v7837_v16, %v7524_v27 }
 0x37a   : > { %v8219_v55 = vpop.permute.xlu0 %4660  ;;  %v3335_v18 = vrot.slane %v7837_v16, %v7527_v9  ;;  %v4112_v63 = vrot.slane %v7753_v4, %v7524_v27  ;;  %v4224_v35 = vrot.slane %v7849_v3, %v7524_v27  ;;  %v4231_v16 = vrot.slane %v7849_v3, %v7527_v9 }
 0x37b   : > { %4582 = vperm.xlu0 %6027, %v4343_v31   ;;  %v4918_v39 = vrot.slane %v8193_v22, %v8056_v54  ;;  %v4928_v3 = vrot.slane %v8151_v36, %v8093_v10 }
 0x37c   : > { %v4411_v22 = vcombine.low %v4224_v35, %v4231_v16  ;;  %v4266_v35 = vrot.slane %v7899_v57, %v7524_v27  ;;  %v4273_v16 = vrot.slane %v7899_v57, %v7527_v9  ;;  %v4238_v57 = vrot.slane %v7933_v12, %v7524_v27 }
 0x37d   : > { %v4646_v58 = vpop.permute.xlu1 %4645  ;;  %4741 = vperm.xlu1 %6026, %v4396_v61   ;;  %v3181_v61 = vrot.slane %v7767_v40, %v7527_v9  ;;  %v4347_v40 = vcombine.low %v3328_v56, %v3335_v18 }
 0x37e   : > { %v5210_v19 = vrot.slane %v4646_v58, %v8228_v62  ;;  %v8240_v60 = vpop.permute.xlu0 %4486  ;;  %v4119_v58 = vrot.slane %v7753_v4, %v7527_v9  ;;  %v4084_v4 = vrot.slane %v7777_v0, %v7524_v27 }
 0x37f   : > { %4576 = vperm.xlu0 %6027, %v4341_v37   ;;  %v4408_v37 = vcombine.low %v4182_v38, %v4189_v2 }
 0x380   : > { %v5211_v31 = vsel %vm4888_vm11, %v5210_v19, %v5206_v8 }
 0x381   : > { %v8253_v1 = vsel %vm4895_vm12, %v5215_v30, %v5211_v31  ;;  %v4472_v15 = vpop.permute.xlu1 %4471  ;;  %4744 = vperm.xlu1 %6026, %v4397_v59   ;;  %v4336_v59 = vcombine.low %v3174_v47, %v3181_v61  ;;  %v4403_v31 = vcombine.low %v4112_v63, %v4119_v58  ;;  %v3307_v47 = vrot.slane %v7861_v42, %v7527_v9 }
 0x382   : > { %v8255_v50 = vpop.permute.xlu0 %4678  ;;  %v4923_v38 = vrot.slane %v4472_v15, %v8090_v14  ;;  %v3258_v63 = vrot.slane %v7791_v29, %v7524_v27 }
 0x383   : > { %4783 = vperm.xlu0 %6027, %v4410_v51   ;;  %v4091_v51 = vrot.slane %v7777_v0, %v7527_v9  ;;  %v5234_v0 = vrot.slane %v8219_v55, %v8056_v54 }
 0x385   : > { %v4664_v48 = vpop.permute.xlu1 %4663  ;;  %4567 = vperm.xlu1 %6026, %v4338_v44   ;;  %v3300_v44 = vrot.slane %v7861_v42, %v7524_v27  ;;  %v3265_v42 = vrot.slane %v7791_v29, %v7527_v9 }
 0x386   : > { %v8265_v24 = vpop.permute.xlu0 %4480  ;;  %v5239_v58 = vrot.slane %v4664_v48, %v8090_v14 }
 0x387   : > { %4777 = vperm.xlu0 %6027, %v4408_v37   ;;  %v4401_v37 = vcombine.low %v4084_v4, %v4091_v51  ;;  %v4414_v51 = vcombine.low %v4266_v35, %v4273_v16  ;;  %v3363_v35 = vrot.slane %v7909_v6, %v7527_v9 }
 0x389   : > { %v4466_v19 = vpop.permute.xlu1 %4465  ;;  %4561 = vperm.xlu1 %6026, %v4336_v59   ;;  %v5244_v59 = vrot.slane %v8172_v25, %v8093_v10  ;;  %v8922_v25 = vld [vmem:[#allocation35_spill] sm:$0xff] }
 0x38a   : > { %v4914_v30 = vrot.slane %v4466_v19, %v8069_v13  ;;  %v8278_v8 = vpop.permute.xlu0 %4672  ;;  %v3237_v4 = vrot.slane %v8922_v25, %v7527_v9 }
 0x38b   : > { %4594 = vperm.xlu0 %6027, %v4347_v40   ;;  %v4345_v40 = vcombine.low %v3300_v44, %v3307_v47 }
 0x38c   : > { %v4919_v2 = vsel %vm4811_vm0, %v4918_v39, %v4914_v30  ;;  %v4342_v30 = vcombine.low %v3258_v63, %v3265_v42 }
 0x38d   : > { %v4924_v61 = vsel %vm4818_vm1, %v4923_v38, %v4919_v2  ;;  %v4658_v56 = vpop.permute.xlu1 %4657  ;;  %4762 = vperm.xlu1 %6026, %v4403_v31   ;;  %v3230_v31 = vrot.slane %v8922_v25, %v7524_v27  ;;  %v4245_v38 = vrot.slane %v7933_v12, %v7527_v9  ;;  %v4948_v25 = vrot.slane %v8240_v60, %v8146_v21 }
 0x38e   : > { %v5230_v15 = vrot.slane %v4658_v56, %v8069_v13  ;;  %v8296_v18 = vpop.permute.xlu0 %4498  ;;  %v4929_v36 = vsel %vm4825_vm2, %v4928_v3, %v4924_v61  ;;  %v3384_v56 = vrot.slane %v7885_v7, %v7524_v27  ;;  %v5254_v60 = vrot.slane %v8278_v8, %v8116_v52 }
 0x38f   : > { %4786 = vperm.xlu0 %6027, %v4411_v22   ;;  %v8923_v22 = vld [vmem:[#allocation36_spill] sm:$0xff]  ;;  %v4340_v61 = vcombine.low %v3230_v31, %v3237_v4 }
 0x390   : > { %v5235_v55 = vsel %vm4811_vm0, %v5234_v0, %v5230_v15  ;;  %v4168_v44 = vrot.slane %v8923_v22, %v7524_v27  ;;  %v4175_v47 = vrot.slane %v8923_v22, %v7527_v9  ;;  %v3391_v0 = vrot.slane %v7885_v7, %v7527_v9 }
 0x391   : > { %v5240_v19 = vsel %vm4818_vm1, %v5239_v58, %v5235_v55  ;;  %v4484_v39 = vpop.permute.xlu1 %4483  ;;  %4756 = vperm.xlu1 %6026, %v4401_v37   ;;  %v4412_v15 = vcombine.low %v4238_v57, %v4245_v38  ;;  %v8924_v37 = vld [vmem:[#allocation37_spill] sm:$0xff]  ;;  %v3356_v7 = vrot.slane %v7909_v6, %v7524_v27  ;;  %v8925_v6 = vld [vmem:[#allocation38_spill] sm:$0xff] }
 0x392   : > { %v8312_v29 = vpop.permute.xlu0 %4690  ;;  %v5245_v48 = vsel %vm4825_vm2, %v5244_v59, %v5240_v19  ;;  %v4140_v63 = vrot.slane %v8924_v37, %v7524_v27  ;;  %v4147_v42 = vrot.slane %v8924_v37, %v7527_v9  ;;  %v4407_v55 = vcombine.low %v4168_v44, %v4175_v47 }
 0x393   : > { %4588 = vperm.xlu0 %6027, %v4345_v40   ;;  %v4938_v40 = vrot.slane %v8265_v24, %v8116_v52  ;;  %v4943_v16 = vrot.slane %v4484_v39, %v8149_v32  ;;  %v3314_v39 = vrot.slane %v8925_v6, %v7524_v27  ;;  %v4349_v44 = vcombine.low %v3356_v7, %v3363_v35 }
 0x394   : > { %v4405_v24 = vcombine.low %v4140_v63, %v4147_v42 }
 0x395   : > { %v4676_v3 = vpop.permute.xlu1 %4675  ;;  %4579 = vperm.xlu1 %6026, %v4342_v30   ;;  %v4351_v30 = vcombine.low %v3384_v56, %v3391_v0  ;;  %v4252_v56 = vrot.slane %v7921_v41, %v7524_v27  ;;  %v4259_v0 = vrot.slane %v7921_v41, %v7527_v9 }
 0x396   : > { %v8323_v2 = vpop.permute.xlu0 %4492  ;;  %v5259_v47 = vrot.slane %v4676_v3, %v8149_v32 }
 0x397   : > { %4795 = vperm.xlu0 %6027, %v4414_v51   ;;  %v4413_v7 = vcombine.low %v4252_v56, %v4259_v0  ;;  %v4968_v56 = vrot.slane %v8296_v18, %v8222_v28 }
 0x399   : > { %v4478_v12 = vpop.permute.xlu1 %4477  ;;  %4573 = vperm.xlu1 %6026, %v4340_v61  }
 0x39a   : > { %v4933_v58 = vrot.slane %v4478_v12, %v8106_v49  ;;  %v8338_v59 = vpop.permute.xlu0 %4684 }
 0x39b   : > { %4789 = vperm.xlu0 %6027, %v4412_v15   ;;  %v5264_v15 = vrot.slane %v8255_v50, %v8146_v21  ;;  %v8927_v50 = vld [vmem:[#allocation17_spill] sm:$0xff]  ;;  %v5274_v18 = vrot.slane %v8338_v59, %v8181_v5 }
 0x39c   : > { %v4934_v19 = vsel %vm4832_vm3, %v4933_v58, %v4929_v36  ;;  %v3321_v36 = vrot.slane %v8925_v6, %v7527_v9 }
 0x39d   : > { %v4939_v31 = vsel %vm4839_vm4, %v4938_v40, %v4934_v19  ;;  %v4670_v4 = vpop.permute.xlu1 %4669  ;;  %4774 = vperm.xlu1 %6026, %v4407_v55   ;;  %v4280_v55 = vrot.slane %v8927_v50, %v7524_v27  ;;  %v4287_v40 = vrot.slane %v8927_v50, %v7527_v9 }
 0x39e   : > { %v5249_v51 = vrot.slane %v4670_v4, %v8106_v49  ;;  %v8352_v57 = vpop.permute.xlu0 %4510  ;;  %v4944_v38 = vsel %vm4846_vm5, %v4943_v16, %v4939_v31  ;;  %v4346_v3 = vcombine.low %v3314_v39, %v3321_v36 }
 0x39f   : > { %4606 = vperm.xlu0 %6027, %v4351_v30   ;;  %v4949_v22 = vsel %vm4853_vm6, %v4948_v25, %v4944_v38  ;;  %v8928_v30 = vld [vmem:[#allocation41_spill] sm:$0xff]  ;;  %v4415_v4 = vcombine.low %v4280_v55, %v4287_v40  ;;  %v5284_v55 = vrot.slane %v8312_v29, %v8222_v28  ;;  %v4897_v29 = vadd.s32 4294967184, %v8036_v23 }
 0x3a0   : > { %v5250_v61 = vsel %vm4832_vm3, %v5249_v51, %v5245_v48  ;;  %v8926_v48 = vld [vmem:[#allocation40_spill] sm:$0xff]  ;;  %v4196_v25 = vrot.slane %v8928_v30, %v7524_v27  ;;  %v4203_v31 = vrot.slane %v8928_v30, %v7527_v9  ;;  %v8929_v51 = vld [vmem:[#allocation39_spill] sm:$0xff] }
 0x3a1   : > { %v5255_v12 = vsel %vm4839_vm4, %v5254_v60, %v5250_v61  ;;  %v4496_v8 = vpop.permute.xlu1 %4495  ;;  %4768 = vperm.xlu1 %6026, %v4405_v24   ;;  %v3286_v42 = vrot.slane %v8926_v48, %v7524_v27  ;;  %v3293_v58 = vrot.slane %v8926_v48, %v7527_v9  ;;  %v3370_v38 = vrot.slane %v8929_v51, %v7524_v27 }
 0x3a2   : > { %v8371_v37 = vpop.permute.xlu0 %4702  ;;  %v5260_v63 = vsel %vm4846_vm5, %v5259_v47, %v5255_v12  ;;  %v3377_v6 = vrot.slane %v8929_v51, %v7527_v9  ;;  %v4409_v60 = vcombine.low %v4196_v25, %v4203_v31  ;;  %v4963_v47 = vrot.slane %v4496_v8, %v8202_v26  ;;  %v8931_v25 = vld [vmem:[#allocation34_spill] sm:$0xff]  ;;  %v8932_v51 = vld [vmem:[#allocation33_spill] sm:$0xff] }
 0x3a3   : > { %4600 = vperm.xlu0 %6027, %v4349_v44   ;;  %v5265_v41 = vsel %vm4853_vm6, %v5264_v15, %v5260_v63  ;;  %v4344_v19 = vcombine.low %v3286_v42, %v3293_v58  ;;  %v4958_v44 = vrot.slane %v8323_v2, %v8181_v5  ;;  %v8930_v2 = vld [vmem:[#allocation18_spill] sm:$0xff]  ;;  %v4042_v59 = vrot.slane %v8931_v25, %v7524_v27 }
 0x3a4   : > { %v4350_v12 = vcombine.low %v3370_v38, %v3377_v6  ;;  %v3342_v42 = vrot.slane %v8930_v2, %v7524_v27  ;;  %v4049_v31 = vrot.slane %v8931_v25, %v7527_v9  ;;  %v4056_v38 = vrot.slane %v8932_v51, %v7524_v27 }
 0x3a5   : > { %v4688_v35 = vpop.permute.xlu1 %4687  ;;  %4591 = vperm.xlu1 %6026, %v4346_v3   ;;  %v4063_v6 = vrot.slane %v8932_v51, %v7527_v9 }
 0x3a6   : > { %v8383_v16 = vpop.permute.xlu0 %4504  ;;  %v5279_v58 = vrot.slane %v4688_v35, %v8202_v26 }
 0x3a7   : > { %4792 = vperm.xlu0 %6027, %v4413_v7   ;;  %v4978_v27 = vrot.slane %v8383_v16, %v8225_v33 }
 0x3a9   : > { %v4490_v24 = vpop.permute.xlu1 %4489  ;;  %4585 = vperm.xlu1 %6026, %v4344_v19  }
 0x3aa   : > { %v4953_v39 = vrot.slane %v4490_v24, %v8162_v45  ;;  %v8394_v36 = vpop.permute.xlu0 %4696 }
 0x3ab   : > { %4798 = vperm.xlu0 %6027, %v4415_v4   ;;  %v5294_v16 = vrot.slane %v8394_v36, %v8225_v33 }
 0x3ac   : > { %v4954_v61 = vsel %vm4860_vm7, %v4953_v39, %v4949_v22  ;;  %v3349_v22 = vrot.slane %v8930_v2, %v7527_v9  ;;  %v4398_v39 = vcombine.low %v4042_v59, %v4049_v31 }
 0x3ad   : > { %v4959_v0 = vsel %vm4867_vm8, %v4958_v44, %v4954_v61  ;;  %v4682_v15 = vpop.permute.xlu1 %4681  ;;  %4780 = vperm.xlu1 %6026, %v4409_v60   ;;  %v4904_v60 = vadd.s32 4294967176, %v8036_v23 }
 0x3ae   : > { %v5269_v63 = vrot.slane %v4682_v15, %v8162_v45  ;;  %v8404_v3 = vpop.permute.xlu0 %4522  ;;  %v4964_v48 = vsel %vm4874_vm9, %v4963_v47, %v4959_v0  ;;  %v4348_v35 = vcombine.low %v3342_v42, %v3349_v22  ;;  %v8434_v47 = vsub.s32 %v4897_v29, %v8916_v20 }
 0x3af   : > { %v4969_v8 = vsel %vm8795_vm10, %v4968_v56, %v4964_v48  ;;  %v4399_v0 = vcombine.low %v4056_v38, %v4063_v6  ;;  %v8438_v15 = vsub.s32 %v4904_v60, %v8916_v20 }
 0x3b0   : > { %v5270_v50 = vsel %vm4860_vm7, %v5269_v63, %v5265_v41 }
 0x3b1   : > { %v5275_v40 = vsel %vm4867_vm8, %v5274_v18, %v5270_v50  ;;  %v4508_v7 = vpop.permute.xlu1 %4507  ;;  %4603 = vperm.xlu1 %6026, %v4350_v12   ;;  %v4988_v23 = vrot.slane %v8352_v57, %v8438_v15 }
 0x3b2   : > { %v8419_v19 = vpop.permute.xlu0 %4714  ;;  %v5280_v30 = vsel %vm4874_vm9, %v5279_v58, %v5275_v40  ;;  %v4983_v9 = vrot.slane %v4508_v7, %v8434_v47 }
 0x3b3   : > { %v5285_v41 = vsel %vm8795_vm10, %v5284_v55, %v5280_v30 }
 0x3b5   : > { %v4700_v4 = vpop.permute.xlu1 %4699  ;;  %4597 = vperm.xlu1 %6026, %v4348_v35  }
 0x3b6   : > { %v4517_v24 = vpop.permute.xlu0 %4516  ;;  %v5299_v18 = vrot.slane %v4700_v4, %v8434_v47 }
 0x3b7   : > { %v4997_v59 = vrot.slane %v4517_v24, %v8056_v54 }
 0x3b9   : > { %v4502_v44 = vpop.permute.xlu1 %4501  ;;  %4747 = vperm.xlu1 %6026, %v4398_v39  }
 0x3ba   : > { %v4973_v61 = vrot.slane %v4502_v44, %v8228_v62  ;;  %v4709_v56 = vpop.permute.xlu0 %4708  ;;  %v5323_v44 = vrot.slane %v8419_v19, %v8093_v10  ;;  %v8933_v19 = vld [vmem:[#allocation20_spill] sm:$0xff] }
 0x3bb   : > { %v5313_v38 = vrot.slane %v4709_v56, %v8056_v54 }
 0x3bc   : > { %v4974_v12 = vsel %vm4888_vm11, %v4973_v61, %v4969_v8  ;;  %v5304_v8 = vrot.slane %v8371_v37, %v8438_v15  ;;  %v5007_v37 = vrot.slane %v8404_v3, %v8093_v10 }
 0x3bd   : > { %v4979_v63 = vsel %vm4895_vm12, %v4978_v27, %v4974_v12  ;;  %v4694_v48 = vpop.permute.xlu1 %4693  ;;  %4750 = vperm.xlu1 %6026, %v4399_v0  }
 0x3be   : > { %v4984_v2 = vsel %vm4902_vm13, %v4983_v9, %v4979_v63  ;;  %v5289_v20 = vrot.slane %v4694_v48, %v8228_v62  ;;  %v4535_v42 = vpop.permute.xlu0 %4534 }
 0x3bf   : > { %v8452_v22 = vsel %vm4909_vm14, %v4988_v23, %v4984_v2  ;;  %v4810_v23 = vrot.slane %v7979_v53, %v8056_v54 }
 0x3c0   : > { %v5290_v57 = vsel %vm4888_vm11, %v5289_v20, %v5285_v41  ;;  %v4805_v20 = vrot.slane %v8933_v19, %v8069_v13 }
 0x3c1   : > { %v5295_v58 = vsel %vm4895_vm12, %v5294_v16, %v5290_v57  ;;  %v4520_v50 = vpop.permute.xlu1 %4519 }
 0x3c2   : > { %v5300_v55 = vsel %vm4902_vm13, %v5299_v18, %v5295_v58  ;;  %v4727_v40 = vpop.permute.xlu0 %4726  ;;  %v5002_v41 = vrot.slane %v4520_v50, %v8090_v14  ;;  %v5027_v58 = vrot.slane %v4535_v42, %v8146_v21  ;;  %v4831_v42 = vrot.slane %v8015_v11, %v8106_v49 }
 0x3c3   : > { %v8461_v7 = vsel %vm4909_vm14, %v5304_v8, %v5300_v55  ;;  %v4812_v8 = vsel %vm4811_vm0, %v4810_v23, %v4805_v20  ;;  %v8934_v55 = vld [vmem:[#allocation19_spill] sm:$0xff]  ;;  %v4859_v20 = vrot.slane %v8126_v34, %v8162_v45 }
 0x3c4   : > { %v8939_v34 = vld [vmem:[#allocation27_spill] sm:$0xff] }
 0x3c5   : > { %v4712_v36 = vpop.permute.xlu1 %4711 }
 0x3c6   : > { %v4529_v30 = vpop.permute.xlu0 %4528  ;;  %v5318_v60 = vrot.slane %v4712_v36, %v8090_v14  ;;  %v4817_v36 = vrot.slane %v8934_v55, %v8090_v14 }
 0x3c7   : > { %v5017_v16 = vrot.slane %v4529_v30, %v8116_v52 }
 0x3c9   : > { %v4514_v25 = vpop.permute.xlu1 %4513 }
 0x3ca   : > { %v4993_v31 = vrot.slane %v4514_v25, %v8069_v13  ;;  %v4721_v35 = vpop.permute.xlu0 %4720 }
 0x3cc   : > { %v4998_v4 = vsel %vm4811_vm0, %v4997_v59, %v4993_v31  ;;  %v5333_v31 = vrot.slane %v4721_v35, %v8116_v52 }
 0x3cd   : > { %v5003_v29 = vsel %vm4818_vm1, %v5002_v41, %v4998_v4  ;;  %v4706_v51 = vpop.permute.xlu1 %4705 }
 0x3ce   : > { %v5309_v6 = vrot.slane %v4706_v51, %v8069_v13  ;;  %v8472_v39 = vpop.permute.xlu0 %4546  ;;  %v5008_v24 = vsel %vm4825_vm2, %v5007_v37, %v5003_v29  ;;  %v4819_v37 = vsel %vm4818_vm1, %v4817_v36, %v4812_v8  ;;  %v8935_v51 = vld [vmem:[#allocation21_spill] sm:$0xff] }
 0x3d0   : > { %v5314_v3 = vsel %vm4811_vm0, %v5313_v38, %v5309_v6  ;;  %v4824_v38 = vrot.slane %v8935_v51, %v8093_v10  ;;  %v8936_v6 = vld [vmem:[#allocation25_spill] sm:$0xff] }
 0x3d1   : > { %v5319_v61 = vsel %vm4818_vm1, %v5318_v60, %v5314_v3  ;;  %v4532_v0 = vpop.permute.xlu1 %4531  ;;  %v5343_v60 = vrot.slane %v4727_v40, %v8146_v21 }
 0x3d2   : > { %v4541_v27 = vpop.permute.xlu0 %4540  ;;  %v5324_v9 = vsel %vm4825_vm2, %v5323_v44, %v5319_v61  ;;  %v5022_v18 = vrot.slane %v4532_v0, %v8149_v32  ;;  %v4826_v11 = vsel %vm4825_vm2, %v4824_v38, %v4819_v37 }
 0x3d5   : > { %v4724_v56 = vpop.permute.xlu1 %4723 }
 0x3d6   : > { %v8481_v12 = vpop.permute.xlu0 %4732  ;;  %v5338_v4 = vrot.slane %v4724_v56, %v8149_v32 }
 0x3d9   : > { %v4526_v63 = vpop.permute.xlu1 %4525 }
 0x3da   : > { %v5012_v48 = vrot.slane %v4526_v63, %v8106_v49  ;;  %v8486_v2 = vpop.permute.xlu0 %4558  ;;  %v8937_v63 = vld [vmem:[#allocation23_spill] sm:$0xff] }
 0x3dc   : > { %v5013_v57 = vsel %vm4832_vm3, %v5012_v48, %v5008_v24  ;;  %v4838_v24 = vrot.slane %v8936_v6, %v8116_v52  ;;  %v4845_v48 = vrot.slane %v8937_v63, %v8149_v32  ;;  %v8940_v6 = vld [vmem:[#allocation26_spill] sm:$0xff] }
 0x3dd   : > { %v5018_v53 = vsel %vm4839_vm4, %v5017_v16, %v5013_v57  ;;  %v4718_v50 = vpop.permute.xlu1 %4717  ;;  %v8938_v16 = vld [vmem:[#allocation24_spill] sm:$0xff]  ;;  %v8941_v63 = vld [vmem:[#allocation22_spill] sm:$0xff] }
 0x3de   : > { %v5328_v25 = vrot.slane %v4718_v50, %v8106_v49  ;;  %v8499_v59 = vpop.permute.xlu0 %4552  ;;  %v5023_v30 = vsel %vm4846_vm5, %v5022_v18, %v5018_v53  ;;  %v4852_v18 = vrot.slane %v8938_v16, %v8146_v21  ;;  %v5037_v50 = vrot.slane %v4541_v27, %v8181_v5 }
 0x3df   : > { %v5028_v41 = vsel %vm4853_vm6, %v5027_v58, %v5023_v30  ;;  %v4866_v30 = vrot.slane %v8939_v34, %v8181_v5  ;;  %v8943_v34 = vld [vmem:[#allocation32_spill] sm:$0xff] }
 0x3e0   : > { %v5329_v29 = vsel %vm4832_vm3, %v5328_v25, %v5324_v9  ;;  %v4833_v9 = vsel %vm4832_vm3, %v4831_v42, %v4826_v11  ;;  %v4887_v11 = vrot.slane %v8211_v46, %v8228_v62  ;;  %v8942_v46 = vld [vmem:[#allocation31_spill] sm:$0xff] }
 0x3e1   : > { %v5334_v35 = vsel %vm4839_vm4, %v5333_v31, %v5329_v29  ;;  %v4544_v44 = vpop.permute.xlu1 %4543  ;;  %v4840_v56 = vsel %vm4839_vm4, %v4838_v24, %v4833_v9  ;;  %v5047_v31 = vrot.slane %v8472_v39, %v8222_v28  ;;  %v4873_v24 = vrot.slane %v8940_v6, %v8202_v26 }
 0x3e2   : > { %v8515_v3 = vpop.permute.xlu0 %4759  ;;  %v5339_v61 = vsel %vm4846_vm5, %v5338_v4, %v5334_v35  ;;  %v4847_v19 = vsel %vm4846_vm5, %v4845_v48, %v4840_v56  ;;  %v5042_v36 = vrot.slane %v4544_v44, %v8202_v26  ;;  %v4880_v48 = vrot.slane %v8941_v63, %v8222_v28 }
 0x3e3   : > { %v5344_v0 = vsel %vm4853_vm6, %v5343_v60, %v5339_v61  ;;  %v4854_v53 = vsel %vm4853_vm6, %v4852_v18, %v4847_v19  ;;  %v4894_v18 = vrot.slane %v8942_v46, %v8225_v33 }
 0x3e4   : > { %v4861_v55 = vsel %vm4860_vm7, %v4859_v20, %v4854_v53  ;;  %v4901_v53 = vrot.slane %v8168_v43, %v8434_v47 }
 0x3e5   : > { %v4736_v23 = vpop.permute.xlu1 %4735  ;;  %v4868_v51 = vsel %vm4867_vm8, %v4866_v30, %v4861_v55  ;;  %v4908_v30 = vrot.slane %v8943_v34, %v8438_v15 }
 0x3e6   : > { %v8524_v40 = vpop.permute.xlu0 %4753  ;;  %v5358_v39 = vrot.slane %v4736_v23, %v8202_v26  ;;  %v4875_v61 = vsel %vm4874_vm9, %v4873_v24, %v4868_v51 }
 0x3e9   : > { %v4538_v57 = vpop.permute.xlu1 %4537 }
 0x3ea   : > { %v5032_v8 = vrot.slane %v4538_v57, %v8162_v45  ;;  %v8532_v58 = vpop.permute.xlu0 %4570 }
 0x3ec   : > { %v5033_v25 = vsel %vm4860_vm7, %v5032_v8, %v5028_v41  ;;  %v5353_v41 = vrot.slane %v8481_v12, %v8181_v5 }
 0x3ed   : > { %v5038_v37 = vsel %vm4867_vm8, %v5037_v50, %v5033_v25  ;;  %v4730_v42 = vpop.permute.xlu1 %4729  ;;  %v5057_v25 = vrot.slane %v8499_v59, %v8225_v33  ;;  %v8944_v59 = vld [vmem:[#allocation28_spill] sm:$0xff] }
 0x3ee   : > { %v5348_v4 = vrot.slane %v4730_v42, %v8162_v45  ;;  %v8545_v29 = vpop.permute.xlu0 %4564  ;;  %v5043_v27 = vsel %vm4874_vm9, %v5042_v36, %v5038_v37  ;;  %v5220_v36 = vrot.slane %v8189_v17, %v8434_v47  ;;  %v5225_v51 = vrot.slane %v8944_v59, %v8438_v15 }
 0x3ef   : > { %v5048_v38 = vsel %vm8795_vm10, %v5047_v31, %v5043_v27 }
 0x3f0   : > { %v5349_v60 = vsel %vm4860_vm7, %v5348_v4, %v5344_v0  ;;  %v4882_v0 = vsel %vm8795_vm10, %v4880_v48, %v4875_v61  ;;  %v5221_v43 = vsel %vm4902_vm13, %v5220_v36, %v8253_v1  ;;  %v5067_v4 = vrot.slane %v8486_v2, %v8438_v15 }
 0x3f1   : > { %v5354_v35 = vsel %vm4867_vm8, %v5353_v41, %v5349_v60  ;;  %v4739_v44 = vpop.permute.xlu1 %4738  ;;  %v4889_v20 = vsel %vm4888_vm11, %v4887_v11, %v4882_v0  ;;  %v5226_v1 = vsel %vm4909_vm14, %v5225_v51, %v5221_v43 }
 0x3f2   : > { %v5359_v9 = vsel %vm4874_vm9, %v5358_v39, %v5354_v35  ;;  %v5363_v12 = vrot.slane %v4739_v44, %v8222_v28  ;;  %v8562_v56 = vpop.permute.xlu0 %4771  ;;  %v4896_v57 = vsel %vm4895_vm12, %v4894_v18, %v4889_v20 }
 0x3f3   : > { %v4903_v31 = vsel %vm4902_vm13, %v4901_v53, %v4896_v57  ;;  %v5388_v57 = vrot.slane %v8524_v40, %v8069_v13  ;;  %v5086_v40 = vrot.slane %v8532_v58, %v8093_v10  ;;  %v5417_v58 = vrot.slane %v8562_v56, %v8149_v32 }
 0x3f4   : > { %v8567_v23 = vsel %vm8795_vm10, %v5363_v12, %v5359_v9  ;;  %vm5466_vm10 = vcmask 1042434  }
 0x3f5   : > { %v4556_v19 = vpop.permute.xlu1 %4555 }
 0x3f6   : > { %v8571_v16 = vpop.permute.xlu0 %4765  ;;  %v5062_v37 = vrot.slane %v4556_v19, %v8434_v47 }
 0x3f7   : > { %v5407_v43 = vrot.slane %v8571_v16, %v8106_v49 }
 0x3f9   : > { %v4550_v8 = vpop.permute.xlu1 %4549 }
 0x3fa   : > { %v5052_v50 = vrot.slane %v4550_v8, %v8228_v62  ;;  %v8579_v55 = vpop.permute.xlu0 %4582  ;;  %v5076_v8 = vrot.slane %v8545_v29, %v8056_v54 }
 0x3fc   : > { %v5053_v42 = vsel %vm4888_vm11, %v5052_v50, %v5048_v38  ;;  %v4910_v38 = vsel %vm4909_vm14, %v4908_v30, %v4903_v31  ;;  %v5397_v50 = vrot.slane %v8515_v3, %v8090_v14 }
 0x3fd   : > { %v5058_v17 = vsel %vm4895_vm12, %v5057_v25, %v5053_v42  ;;  %v8595_v27 = vpop.permute.xlu1 %4741 }
 0x3fe   : > { %v5063_v41 = vsel %vm4902_vm13, %v5062_v37, %v5058_v17  ;;  %v4577_v6 = vpop.permute.xlu0 %4576 }
 0x3ff   : > { %v5068_v24 = vsel %vm4909_vm14, %v5067_v4, %v5063_v41  ;;  %v5096_v59 = vrot.slane %v4577_v6, %v8116_v52 }
 0x400   : > { %v5465_v2 = vsel %vm5464_vm15, %v5068_v24, %v4910_v38 }
 0x401   : > { %v8604_v39 = vpop.permute.xlu1 %4744  ;;  %v8607_v60 = vsel %vm5466_vm10, %v5226_v1, %v5465_v2 }
 0x402   : > { %v4784_v35 = vpop.permute.xlu0 %4783 }
 0x405   : > { %v4568_v44 = vpop.permute.xlu1 %4567 }
 0x406   : > { %v4778_v61 = vpop.permute.xlu0 %4777  ;;  %v5081_v30 = vrot.slane %v4568_v44, %v8090_v14  ;;  %v5106_v44 = vrot.slane %v8579_v55, %v8146_v21 }
 0x407   : > { %v5427_v56 = vrot.slane %v4778_v61, %v8162_v45 }
 0x409   : > { %v4562_v11 = vpop.permute.xlu1 %4561 }
 0x40a   : > { %v8609_v9 = vpop.permute.xlu0 %4594  ;;  %v5072_v46 = vrot.slane %v4562_v11, %v8069_v13 }
 0x40c   : > { %v5077_v36 = vsel %vm4811_vm0, %v5076_v8, %v5072_v46 }
 0x40d   : > { %v4763_v12 = vpop.permute.xlu1 %4762  ;;  %v5082_v37 = vsel %vm4818_vm1, %v5081_v30, %v5077_v36 }
 0x40e   : > { %v4787_v63 = vpop.permute.xlu0 %4786  ;;  %v5402_v13 = vrot.slane %v4763_v12, %v8093_v10  ;;  %v5087_v14 = vsel %vm4825_vm2, %v5086_v40, %v5082_v37 }
 0x40f   : > { %v5442_v8 = vrot.slane %v4787_v63, %v8222_v28 }
 0x411   : > { %v4757_v48 = vpop.permute.xlu1 %4756 }
 0x412   : > { %v4589_v19 = vpop.permute.xlu0 %4588  ;;  %v5392_v20 = vrot.slane %v4757_v48, %v8056_v54 }
 0x413   : > { %v5116_v46 = vrot.slane %v4589_v19, %v8181_v5 }
 0x414   : > { %v5393_v53 = vsel %vm4811_vm0, %v5392_v20, %v5388_v57  ;;  %v5437_v20 = vrot.slane %v4784_v35, %v8202_v26  ;;  %vm8945_vm0 = vcmask 786112  }
 0x415   : > { %v4580_v0 = vpop.permute.xlu1 %4579  ;;  %v5398_v31 = vsel %vm4818_vm1, %v5397_v50, %v5393_v53  ;;  %vm8946_vm1 = vmmov %vm8945_vm0 }
 0x416   : > { %v8621_v25 = vpop.permute.xlu0 %4795  ;;  %v5403_v3 = vsel %vm4825_vm2, %v5402_v13, %v5398_v31  ;;  %v5101_v24 = vrot.slane %v4580_v0, %v8149_v32  ;;  %vm5468_vm2 = vcmask 1043459  }
 0x417   : > { %v5408_v51 = vsel %vm4832_vm3, %v5407_v43, %v5403_v3  ;;  %v5373_v3 = vrot.slane %v8604_v39, %v8225_v33 }
 0x419   : > { %v4574_v18 = vpop.permute.xlu1 %4573 }
 0x41a   : > { %v5091_v54 = vrot.slane %v4574_v18, %v8106_v49  ;;  %v4790_v4 = vpop.permute.xlu0 %4789 }
 0x41b   : > { %v5447_v19 = vrot.slane %v4790_v4, %v8228_v62 }
 0x41c   : > { %v5092_v17 = vsel %vm4832_vm3, %v5091_v54, %v5087_v14  ;;  %v5457_v14 = vrot.slane %v8621_v25, %v8434_v47 }
 0x41d   : > { %v4775_v34 = vpop.permute.xlu1 %4774  ;;  %v5097_v38 = vsel %vm4839_vm4, %v5096_v59, %v5092_v17 }
 0x41e   : > { %v4607_v49 = vpop.permute.xlu0 %4606  ;;  %v5422_v2 = vrot.slane %v4775_v34, %v8146_v21 }
 0x421   : > { %v4769_v29 = vpop.permute.xlu1 %4768 }
 0x422   : > { %v5412_v42 = vrot.slane %v4769_v29, %v8116_v52  ;;  %v5102_v52 = vsel %vm4846_vm5, %v5101_v24, %v5097_v38  ;;  %v4601_v18 = vpop.permute.xlu0 %4600 }
 0x423   : > { %v5107_v12 = vsel %vm4853_vm6, %v5106_v44, %v5102_v52  ;;  %v5136_v31 = vrot.slane %v4601_v18, %v8225_v33 }
 0x424   : > { %v5413_v10 = vsel %vm4839_vm4, %v5412_v42, %v5408_v51 }
 0x425   : > { %v4592_v41 = vpop.permute.xlu1 %4591  ;;  %v5418_v16 = vsel %vm4846_vm5, %v5417_v58, %v5413_v10 }
 0x426   : > { %v5423_v11 = vsel %vm4853_vm6, %v5422_v2, %v5418_v16  ;;  %v5121_v53 = vrot.slane %v4592_v41, %v8202_v26  ;;  %v4793_v36 = vpop.permute.xlu0 %4792 }
 0x427   : > { %v5428_v57 = vsel %vm4860_vm7, %v5427_v56, %v5423_v11  ;;  %v5452_v37 = vrot.slane %v4793_v36, %v8225_v33 }
 0x429   : > { %v4586_v1 = vpop.permute.xlu1 %4585 }
 0x42a   : > { %v5111_v6 = vrot.slane %v4586_v1, %v8162_v45  ;;  %v4799_v4 = vpop.permute.xlu0 %4798 }
 0x42b   : > { %v5462_v25 = vrot.slane %v4799_v4, %v8438_v15 }
 0x42c   : > { %v5112_v48 = vsel %vm4860_vm7, %v5111_v6, %v5107_v12 }
 0x42d   : > { %v4781_v32 = vpop.permute.xlu1 %4780  ;;  %v5117_v55 = vsel %vm4867_vm8, %v5116_v46, %v5112_v48 }
 0x42e   : > { %v5432_v0 = vrot.slane %v4781_v32, %v8181_v5  ;;  %v5122_v35 = vsel %vm4874_vm9, %v5121_v53, %v5117_v55  ;;  %v5126_v5 = vrot.slane %v8609_v9, %v8222_v28  ;;  %v5368_v28 = vrot.slane %v8595_v27, %v8228_v62 }
 0x42f   : > { %v5146_v9 = vrot.slane %v4607_v49, %v8438_v15 }
 0x430   : > { %v5433_v21 = vsel %vm4867_vm8, %v5432_v0, %v5428_v57  ;;  %v5127_v26 = vsel %vm8946_vm1, %v5126_v5, %v5122_v35  ;;  %v5369_v59 = vsel %vm4888_vm11, %v5368_v28, %v8567_v23 }
 0x431   : > { %v5438_v45 = vsel %vm4874_vm9, %v5437_v20, %v5433_v21  ;;  %v4604_v61 = vpop.permute.xlu1 %4603  ;;  %v5374_v41 = vsel %vm4895_vm12, %v5373_v3, %v5369_v59 }
 0x432   : > { %v5443_v50 = vsel %vm8945_vm0, %v5442_v8, %v5438_v45  ;;  %v5141_v13 = vrot.slane %v4604_v61, %v8434_v47 }
 0x433   : > { %v5448_v63 = vsel %vm4888_vm11, %v5447_v19, %v5443_v50 }
 0x434   : > { %v5453_v42 = vsel %vm4895_vm12, %v5452_v37, %v5448_v63 }
 0x435   : > { %v4598_v34 = vpop.permute.xlu1 %4597  ;;  %v5458_v39 = vsel %vm4902_vm13, %v5457_v14, %v5453_v42 }
 0x436   : > { %v5131_v30 = vrot.slane %v4598_v34, %v8228_v62  ;;  %v5463_v10 = vsel %vm4909_vm14, %v5462_v25, %v5458_v39 }
 0x438   : > { %v5132_v54 = vsel %vm4888_vm11, %v5131_v30, %v5127_v26 }
 0x439   : > { %v5137_v40 = vsel %vm4895_vm12, %v5136_v31, %v5132_v54  ;;  %v4748_v29 = vpop.permute.xlu1 %4747 }
 0x43a   : > { %v5142_v43 = vsel %vm4902_vm13, %v5141_v13, %v5137_v40  ;;  %v5378_v27 = vrot.slane %v4748_v29, %v8434_v47 }
 0x43b   : > { %v5147_v62 = vsel %vm4909_vm14, %v5146_v9, %v5142_v43 }
 0x43c   : > { %v5470_v17 = vsel %vm5464_vm15, %v5147_v62, %v8452_v22  ;;  %v5379_v22 = vsel %vm4902_vm13, %v5378_v27, %v5374_v41 }
 0x43d   : > { %v4751_v33 = vpop.permute.xlu1 %4750  ;;  %v5471_v51 = vsel %vm5466_vm10, %v8461_v7, %v5470_v17 }
 0x43e   : > { %v5383_v47 = vrot.slane %v4751_v33, %v8438_v15  ;;  %v5472_v58 = vsel %vm5468_vm2, %v5463_v10, %v5471_v51 }
 0x440   : > { %v5384_v23 = vsel %vm4909_vm14, %v5383_v47, %v5379_v22 }
 0x441   : > { %v5469_v7 = vsel %vm5468_vm2, %v5384_v23, %v8607_v60 }
 0x442   : > { %v5473_v38 = vcombine.low %v5469_v7, %v5472_v58 }
 0x444   : > { %5475 = vst [vmem:[%s293_s24] sm:$0xff] %v5473_v38 }
 0x445   : > { %6428 = shalt.err (!%p6425_p6)
}
 0x446   : > { %s6429_s2 = scalar_lea.hbm %s8705_s7, 128  ;;  %s6433_s5 = scalar_lea.hbm %s8758_s4, 256 }
 0x447   : > { %p6430_p8 = scmp.ne.s32.totalorder %s8705_s7, %s6429_s2  ;;  %p6434_p11 = scmp.lt.u32.totalorder %s8705_s7, %s8758_s4 }
 0x448   : > { %p6435_p0 = scmp.lt.u32.totalorder %s6433_s5, %s6429_s2  ;;  %p6437_p10 = scmp.lt.u32.totalorder %s6429_s2, %s8705_s7 }
 0x449   : > { %p6431_p9 = pnand %p6430_p8, %p8947_p7 }
 0x44a   : > { %p6436_p3 = por %p6435_p0, %p6434_p11 }
 0x44b   : > { %p6432_p4 = pneg %p6431_p9 }
 0x44c   : > { %p6438_p12 = por %p6437_p10, %p6436_p3 }
 0x44e   : > { %p6439_p13 = pnand %p6438_p12, %p6432_p4 }
 0x450   : > { %6442 = shalt.err (!%p6439_p13)
}
 0x451   : > { %5946 = dma.vmem_to_hbm [thread:$0]  (%p8947_p7), %s8707_s10, 128, %s8705_s7, %s5477_s18  }
 0x452 PF: > { %s5505_s12 = sand.u32 1, %s6485_s15   ;;  %p8948_p1 = scmp.ne.s32.totalorder %s8801_s30, 0 }
 0x453   : > { %s5506_s13 = scalar_lea.sflag [#allocation4], %s5505_s12 }
 0x454   : > { %p5956_p2 = pnand %p5605_p5, %p8948_p1 }
 0x456   : > { %6480 = dma.done.wait (!%p5956_p2), %s5506_s13, 128  }
 0x457   : > { %6482 = vsyncadd (!%p5956_p2), %s5506_s13, 4294967168  ;;  %s21_s20 = sadd.s32 1, %s6505_s20   ;;  %s8949_s15 = smov %s6489_s16 }
 0x458   : > { %p18_p6 = scmp.ge.s32.totalorder %s21_s20, 4   ;;  %s8950_s16 = smov %s6493_s17 }
 0x459   : > { %s8951_s17 = smov %s6609_s29  ;;  %s8952_s18 = smov %s6501_s19 }
 0x45a   : > { %s8953_s19 = smov %s8955_s23  ;;  %20 = sbr.rel (!%p18_p6) target bundleno = 10 (0xa), region = 96 }
 0x461   :  { %5511 = vsyncpa [#allocation3], 1 }
 0x462   :  { %5513 = vsyncpa [#allocation3 + $0x1], 1 }
 0x463   :  { %5514 = vsyncpa [#allocation6], 1 }
 0x464   :  { %5516 = vsyncpa [#allocation6 + $0x1], 1 }
 0x465   :  { %5517 = vsyncpa [#allocation4], 1 }
 0x466   :  { %5519 = vsyncpa [#allocation4 + $0x1], 1 }

</bundles_post_ra>
